<compile_context>
chip_gen: v7x
topology: tpu7x:2x2x1
jax: 0.10.0
libtpu: 0.0.40
codegen_flags: <defaults>
</compile_context>

<pallas_src>
import functools

import jax
import jax.numpy as jnp
from jax.experimental import pallas as pl
from jax.experimental.pallas import tpu as pltpu


def _lrelu(x):
    return jnp.where(x > 0, x, jnp.float32(0.2) * x)


# -----------------------------------------------------------------------------
# Single fused kernel: whole batch + all weights live in VMEM (no grid).
# -----------------------------------------------------------------------------
def _fused_kernel(x_ref, wc1, bc1, wc2, bc2, wb, bb,
                  Lrest, wg0, wgrest, bg,
                  w1a, w1b, b1, sf, shf,
                  r1aw, r1ab, r1bw, r1bb,
                  r2aw, r2ab, r2bw, r2bb,
                  wcl, bcl, wd, bd,
                  out_ref, *, num_nodes):
    N = num_nodes
    BN_, F = x_ref.shape          # x is (B*N, F): per-sample node blocks stacked
    B = BN_ // N
    K1 = Lrest.shape[0]           # Chebyshev supports beyond L_0 = I
    f32 = jnp.float32

    def mmf(a, w_ref):            # f32 matmul (tiny attention path)
        return jnp.dot(a, w_ref[...], preferred_element_type=f32)

    def mmh(a, w_ref):            # bf16-weight matmul (head), f32 accumulation
        return jnp.dot(a.astype(w_ref.dtype), w_ref[...],
                       preferred_element_type=f32)

    x = x_ref[...].astype(f32)                                    # (B*N, F)

    # ---- EnhancedChannelAttention: CBAM-style squeeze-excite over bands -----
    # avg & max node-pooled stats for all samples stacked -> one (2B, F) MLP.
    stats = ([jnp.mean(x[b * N:(b + 1) * N, :], axis=0, keepdims=True)
              for b in range(B)] +
             [jnp.max(x[b * N:(b + 1) * N, :], axis=0, keepdims=True)
              for b in range(B)])
    s = jnp.concatenate(stats, axis=0)                            # (2B, F)
    h = jnp.maximum(mmf(s, wc1) + bc1[...], 0.0)
    se = mmf(h, wc2) + bc2[...]                                   # (2B, F)
    gate = jax.nn.sigmoid(se[:B, :] + se[B:, :])                  # (B, F)
    xs = [x[b * N:(b + 1) * N, :] * gate[b:b + 1, :] for b in range(B)]

    # ---- EnhancedBandAttention: softmax gate over bands from mean stats -----
    sm = jnp.concatenate(
        [jnp.mean(xs[b], axis=0, keepdims=True) for b in range(B)], axis=0)
    score = mmf(sm, wb) + bb[...]                                 # (B, F)
    band_w = jax.nn.softmax(score, axis=-1) * f32(F)
    xs = [xs[b] * band_w[b:b + 1, :] for b in range(B)]

    # ---- DynamicGraphConvolution: relu(sum_k L_k @ x @ W_k + b), L_0 = I ----
    x2 = jnp.concatenate(xs, axis=0)                              # (B*N, F)
    acc = mmf(x2, wg0)                                            # identity support
    for k in range(K1):                                           # K is small & static
        Lk = Lrest[k]                                             # (N, N)
        Lx = jnp.concatenate(
            [jnp.dot(Lk, xs[b], preferred_element_type=f32) for b in range(B)],
            axis=0)                                               # (B*N, F)
        acc = acc + mmf(Lx, wgrest[k])
    g = jnp.maximum(acc + bg[...], 0.0)                           # (B*N, O)

    # ---- MultiScalePooling (mean & max over nodes) fed straight into the ----
    # ---- head's first linear:  [mean,max] @ W1 == mean @ W1a + max @ W1b ----
    mean_g = jnp.concatenate(
        [jnp.mean(g[b * N:(b + 1) * N, :], axis=0, keepdims=True)
         for b in range(B)], axis=0)                              # (B, O)
    max_g = jnp.concatenate(
        [jnp.max(g[b * N:(b + 1) * N, :], axis=0, keepdims=True)
         for b in range(B)], axis=0)                              # (B, O)

    # ---- Dense head (BatchNorms folded into weights at prep time) -----------
    # TODO(synk): PyTorch BatchNorm1d in train mode uses batch statistics;
    # inference running stats (mean=0, var=1) are folded here.
    h = _lrelu(mmh(mean_g, w1a) + mmh(max_g, w1b) + b1[...])
    h = h * sf[...] + shf[...]                                    # feat BatchNorm

    def resblock(h, aw, ab, bw, bbias):
        t = _lrelu(mmh(h, aw) + ab[...])
        t = mmh(t, bw) + bbias[...]          # both block BNs folded into bw/bbias
        return _lrelu(h + t)

    h = resblock(h, r1aw, r1ab, r1bw, r1bb)
    h = resblock(h, r2aw, r2ab, r2bw, r2bb)
    h = _lrelu(mmh(h, wcl) + bcl[...])                            # cls Linear+LReLU
    out_ref[...] = (mmh(h, wd) + bd[...]).astype(out_ref.dtype)   # cls BN+Linear folded


# -----------------------------------------------------------------------------
# Plain-JAX glue: graph Laplacian / Chebyshev supports (canonical DGCNN defs).
# -----------------------------------------------------------------------------
def normalize_A(A):
    A = jnp.maximum(A, 0.0)
    d = jnp.sum(A, axis=1)
    dinv = 1.0 / jnp.sqrt(d + 1e-10)
    D = jnp.diag(dinv)
    return D @ A @ D


def generate_cheby_adj(L, K):
    supports = [jnp.eye(L.shape[0], dtype=L.dtype)]
    if K > 1:
        supports.append(L)
    for _ in range(2, K):
        supports.append(supports[-1] @ L)
    return jnp.stack(supports[:K], axis=0)


# -----------------------------------------------------------------------------
# Deterministic parameter initialization (synthetic, no checkpoint load).
# -----------------------------------------------------------------------------
def init_params(key, num_nodes, num_bands, k_adj=2, num_out=88, nclass=3):
    keys = iter(jax.random.split(key, 32))

    def lin(k, fan_in, fan_out):
        w = (jax.random.normal(k, (fan_in, fan_out), jnp.float32)
             / jnp.sqrt(jnp.float32(fan_in)))
        b = jnp.zeros((1, fan_out), jnp.float32)
        return w, b

    fr = max(1, num_bands // 2)
    p = {}
    p['wc1'], p['bc1'] = lin(next(keys), num_bands, fr)          # channel attn
    p['wc2'], p['bc2'] = lin(next(keys), fr, num_bands)
    p['wb'], p['bb'] = lin(next(keys), num_bands, num_bands)     # band attn
    p['A'] = jax.random.normal(next(keys), (num_nodes, num_nodes), jnp.float32)
    p['wg'] = (jax.random.normal(next(keys), (k_adj, num_bands, num_out),
                                 jnp.float32)
               / jnp.sqrt(jnp.float32(num_bands)))               # GCN weights
    p['bg'] = jnp.zeros((1, num_out), jnp.float32)

    dim = 2 * num_out
    p['w1'], p['b1'] = lin(next(keys), dim, 512)                 # feat
    p['g1'] = jnp.ones((1, 512), jnp.float32)
    p['be1'] = jnp.zeros((1, 512), jnp.float32)
    for r in (1, 2):                                             # residual blocks
        p[f'r{r}w1'], p[f'r{r}b1'] = lin(next(keys), 512, 512)
        p[f'r{r}g1'] = jnp.ones((1, 512), jnp.float32)
        p[f'r{r}be1'] = jnp.zeros((1, 512), jnp.float32)
        p[f'r{r}w2'], p[f'r{r}b2'] = lin(next(keys), 512, 512)
        p[f'r{r}g2'] = jnp.ones((1, 512), jnp.float32)
        p[f'r{r}be2'] = jnp.zeros((1, 512), jnp.float32)
    p['wc'], p['bc'] = lin(next(keys), 512, 256)                 # classifier
    p['gc'] = jnp.ones((1, 256), jnp.float32)
    p['bec'] = jnp.zeros((1, 256), jnp.float32)
    p['wd'], p['bd'] = lin(next(keys), 256, nclass)
    return p


# -----------------------------------------------------------------------------
# One-time parameter preprocessing: Chebyshev supports, BatchNorm folding,
# head-weight bf16 cast.  Hoisted out of the per-call forward path.
# -----------------------------------------------------------------------------
def prepare_params(p, k_adj=2):
    inv = 1.0 / jnp.sqrt(jnp.float32(1.0 + 1e-5))   # BN inference: mean=0, var=1
    bf16 = jnp.bfloat16
    O = p['wg'].shape[2]

    adjs = generate_cheby_adj(normalize_A(p['A']), k_adj)   # (K, N, N); adjs[0]=I

    q = {}
    # attention params (tiny) stay f32
    for name in ('wc1', 'bc1', 'wc2', 'bc2', 'wb', 'bb', 'bg', 'b1'):
        q[name] = p[name]
    q['Lrest'] = adjs[1:]                    # (K-1, N, N), L_0=I handled analytically
    q['wg0'] = p['wg'][0]                    # (F, O)
    q['wgrest'] = p['wg'][1:]                # (K-1, F, O)

    # head: split W1 so the [mean,max] concat disappears, fold BNs, cast bf16
    q['w1a'] = p['w1'][:O].astype(bf16)
    q['w1b'] = p['w1'][O:].astype(bf16)
    q['sf'] = p['g1'] * inv                  # feat BN (feeds a residual add -> explicit)
    q['shf'] = p['be1']
    for r in (1, 2):
        s_a = p[f'r{r}g1'] * inv             # (1, 512)
        s_b = p[f'r{r}g2'] * inv
        q[f'r{r}aw'] = p[f'r{r}w1'].astype(bf16)
        q[f'r{r}ab'] = p[f'r{r}b1']
        bw_eff = (p[f'r{r}w2'] * s_a.reshape(-1, 1)) * s_b
        bb_eff = (p[f'r{r}be1'] @ p[f'r{r}w2'] + p[f'r{r}b2']) * s_b + p[f'r{r}be2']
        q[f'r{r}bw'] = bw_eff.astype(bf16)
        q[f'r{r}bb'] = bb_eff
    q['wcl'] = p['wc'].astype(bf16)
    q['bcl'] = p['bc']
    s_c = p['gc'] * inv                      # cls BN folded into final linear
    q['wd'] = (p['wd'] * s_c.reshape(-1, 1)).astype(bf16)
    q['bd'] = p['bec'] @ p['wd'] + p['bd']
    return q


# -----------------------------------------------------------------------------
# Forward pass: one fused pallas_call, no grid.
# -----------------------------------------------------------------------------
def channel_band_attention_m1(x, q):
    B, N, F = x.shape
    nclass = q['wd'].shape[1]
    x2 = x.reshape(B * N, F)                 # per-sample node blocks stacked

    args = (x2, q['wc1'], q['bc1'], q['wc2'], q['bc2'], q['wb'], q['bb'],
            q['Lrest'], q['wg0'], q['wgrest'], q['bg'],
            q['w1a'], q['w1b'], q['b1'], q['sf'], q['shf'],
            q['r1aw'], q['r1ab'], q['r1bw'], q['r1bb'],
            q['r2aw'], q['r2ab'], q['r2bw'], q['r2bb'],
            q['wcl'], q['bcl'], q['wd'], q['bd'])
    vmem = pl.BlockSpec(memory_space=pltpu.MemorySpace.VMEM)

    return pl.pallas_call(
        functools.partial(_fused_kernel, num_nodes=N),
        out_shape=jax.ShapeDtypeStruct((B, nclass), jnp.float32),
        in_specs=[vmem] * len(args),
        out_specs=vmem,
        compiler_params=pltpu.CompilerParams(vmem_limit_bytes=16 << 20),
    )(*args)


if __name__ == "__main__":
    # Small shapes consistent with the module's forward:
    # batch=2, num_nodes=16, num_bands=8, k_adj=2, num_out=88, nclass=3.
    B, N, F = 2, 16, 8
    K_ADJ, NUM_OUT, NCLASS = 2, 88, 3

    key = jax.random.PRNGKey(0)
    kx, kp = jax.random.split(key)
    x = jax.random.normal(kx, (B, N, F), jnp.float32)
    raw = init_params(kp, num_nodes=N, num_bands=F,
                      k_adj=K_ADJ, num_out=NUM_OUT, nclass=NCLASS)
    prepped = prepare_params(raw, k_adj=K_ADJ)   # one-time prep (supports + BN fold)

    fwd = jax.jit(channel_band_attention_m1)
    logits = fwd(x, prepped)
    jax.block_until_ready(logits)

    assert logits.shape == (B, NCLASS) and logits.dtype == jnp.float32
    assert bool(jnp.all(jnp.isfinite(logits)))
    print("KERNEL_OK")
</pallas_src>

<mosaic_0001>
module attributes {stable_mosaic.version = 11 : i64} {
  func.func @_fused_kernel(%arg0: memref<32x8xf32, #tpu.memory_space<vmem>>, %arg1: memref<8x4xf32, #tpu.memory_space<vmem>>, %arg2: memref<1x4xf32, #tpu.memory_space<vmem>>, %arg3: memref<4x8xf32, #tpu.memory_space<vmem>>, %arg4: memref<1x8xf32, #tpu.memory_space<vmem>>, %arg5: memref<8x8xf32, #tpu.memory_space<vmem>>, %arg6: memref<1x8xf32, #tpu.memory_space<vmem>>, %arg7: memref<1x16x16xf32, #tpu.memory_space<vmem>>, %arg8: memref<8x88xf32, #tpu.memory_space<vmem>>, %arg9: memref<1x8x88xf32, #tpu.memory_space<vmem>>, %arg10: memref<1x88xf32, #tpu.memory_space<vmem>>, %arg11: memref<88x512xbf16, #tpu.memory_space<vmem>>, %arg12: memref<88x512xbf16, #tpu.memory_space<vmem>>, %arg13: memref<1x512xf32, #tpu.memory_space<vmem>>, %arg14: memref<1x512xf32, #tpu.memory_space<vmem>>, %arg15: memref<1x512xf32, #tpu.memory_space<vmem>>, %arg16: memref<512x512xbf16, #tpu.memory_space<vmem>>, %arg17: memref<1x512xf32, #tpu.memory_space<vmem>>, %arg18: memref<512x512xbf16, #tpu.memory_space<vmem>>, %arg19: memref<1x512xf32, #tpu.memory_space<vmem>>, %arg20: memref<512x512xbf16, #tpu.memory_space<vmem>>, %arg21: memref<1x512xf32, #tpu.memory_space<vmem>>, %arg22: memref<512x512xbf16, #tpu.memory_space<vmem>>, %arg23: memref<1x512xf32, #tpu.memory_space<vmem>>, %arg24: memref<512x256xbf16, #tpu.memory_space<vmem>>, %arg25: memref<1x256xf32, #tpu.memory_space<vmem>>, %arg26: memref<256x3xbf16, #tpu.memory_space<vmem>>, %arg27: memref<1x3xf32, #tpu.memory_space<vmem>>, %arg28: memref<2x3xf32, #tpu.memory_space<vmem>>) attributes {dimension_semantics = [], scalar_prefetch = 0 : i64, scratch_operands = 0 : i64, tpu.core_type = #tpu.core_type<tc>} {
    %c0 = arith.constant 0 : index
    %c0_0 = arith.constant 0 : index
    %0 = vector.load %arg0[%c0, %c0_0] : memref<32x8xf32, #tpu.memory_space<vmem>>, vector<32x8xf32>
    %1 = vector.extract_strided_slice %0 {offsets = [0, 0], sizes = [16, 8], strides = [1, 1]} : vector<32x8xf32> to vector<16x8xf32>
    %cst = arith.constant dense<0.000000e+00> : vector<8xf32>
    %2 = vector.multi_reduction <add>, %1, %cst [0] : vector<16x8xf32> to vector<8xf32>
    %3 = vector.shape_cast %2 : vector<8xf32> to vector<1x8xf32>
    %cst_1 = arith.constant 1.600000e+01 : f32
    %4 = vector.broadcast %cst_1 : f32 to vector<1x8xf32>
    %5 = arith.divf %3, %4 : vector<1x8xf32>
    %6 = vector.extract_strided_slice %0 {offsets = [16, 0], sizes = [16, 8], strides = [1, 1]} : vector<32x8xf32> to vector<16x8xf32>
    %cst_2 = arith.constant dense<0.000000e+00> : vector<8xf32>
    %7 = vector.multi_reduction <add>, %6, %cst_2 [0] : vector<16x8xf32> to vector<8xf32>
    %8 = vector.shape_cast %7 : vector<8xf32> to vector<1x8xf32>
    %cst_3 = arith.constant 1.600000e+01 : f32
    %9 = vector.broadcast %cst_3 : f32 to vector<1x8xf32>
    %10 = arith.divf %8, %9 : vector<1x8xf32>
    %11 = vector.extract_strided_slice %0 {offsets = [0, 0], sizes = [16, 8], strides = [1, 1]} : vector<32x8xf32> to vector<16x8xf32>
    %cst_4 = arith.constant dense<0xFF800000> : vector<8xf32>
    %12 = vector.multi_reduction <maximumf>, %11, %cst_4 [0] : vector<16x8xf32> to vector<8xf32>
    %13 = vector.shape_cast %12 : vector<8xf32> to vector<1x8xf32>
    %14 = vector.extract_strided_slice %0 {offsets = [16, 0], sizes = [16, 8], strides = [1, 1]} : vector<32x8xf32> to vector<16x8xf32>
    %cst_5 = arith.constant dense<0xFF800000> : vector<8xf32>
    %15 = vector.multi_reduction <maximumf>, %14, %cst_5 [0] : vector<16x8xf32> to vector<8xf32>
    %16 = vector.shape_cast %15 : vector<8xf32> to vector<1x8xf32>
    %17 = tpu.concatenate %5, %10, %13, %16 in 0 : vector<1x8xf32>, vector<1x8xf32>, vector<1x8xf32>, vector<1x8xf32> -> vector<4x8xf32>
    %c0_6 = arith.constant 0 : index
    %c0_7 = arith.constant 0 : index
    %18 = vector.load %arg1[%c0_6, %c0_7] : memref<8x4xf32, #tpu.memory_space<vmem>>, vector<8x4xf32>
    %cst_8 = arith.constant dense<0.000000e+00> : vector<4x4xf32>
    %19 = tpu.matmul %17, %18, %cst_8 {dimension_numbers = #tpu.dot_dimension_numbers<[1], [0], [0], [1], [0, 0, 1, 1], [], []>} : vector<4x8xf32>, vector<8x4xf32>, vector<4x4xf32> -> vector<4x4xf32>
    %c0_9 = arith.constant 0 : index
    %c0_10 = arith.constant 0 : index
    %20 = vector.load %arg2[%c0_9, %c0_10] : memref<1x4xf32, #tpu.memory_space<vmem>>, vector<1x4xf32>
    %21 = vector.broadcast %20 : vector<1x4xf32> to vector<4x4xf32>
    %22 = arith.addf %19, %21 : vector<4x4xf32>
    %cst_11 = arith.constant 0.000000e+00 : f32
    %23 = vector.broadcast %cst_11 : f32 to vector<4x4xf32>
    %24 = arith.maximumf %22, %23 : vector<4x4xf32>
    %c0_12 = arith.constant 0 : index
    %c0_13 = arith.constant 0 : index
    %25 = vector.load %arg3[%c0_12, %c0_13] : memref<4x8xf32, #tpu.memory_space<vmem>>, vector<4x8xf32>
    %cst_14 = arith.constant dense<0.000000e+00> : vector<4x8xf32>
    %26 = tpu.matmul %24, %25, %cst_14 {dimension_numbers = #tpu.dot_dimension_numbers<[1], [0], [0], [1], [0, 0, 1, 1], [], []>} : vector<4x4xf32>, vector<4x8xf32>, vector<4x8xf32> -> vector<4x8xf32>
    %c0_15 = arith.constant 0 : index
    %c0_16 = arith.constant 0 : index
    %27 = vector.load %arg4[%c0_15, %c0_16] : memref<1x8xf32, #tpu.memory_space<vmem>>, vector<1x8xf32>
    %28 = vector.broadcast %27 : vector<1x8xf32> to vector<4x8xf32>
    %29 = arith.addf %26, %28 : vector<4x8xf32>
    %30 = vector.extract_strided_slice %29 {offsets = [0, 0], sizes = [2, 8], strides = [1, 1]} : vector<4x8xf32> to vector<2x8xf32>
    %31 = vector.extract_strided_slice %29 {offsets = [2, 0], sizes = [2, 8], strides = [1, 1]} : vector<4x8xf32> to vector<2x8xf32>
    %32 = arith.addf %30, %31 : vector<2x8xf32>
    %33 = arith.negf %32 : vector<2x8xf32>
    %34 = math.exp %33 : vector<2x8xf32>
    %cst_17 = arith.constant 1.000000e+00 : f32
    %35 = vector.broadcast %cst_17 : f32 to vector<2x8xf32>
    %36 = arith.addf %35, %34 : vector<2x8xf32>
    %37 = arith.divf %35, %36 : vector<2x8xf32>
    %38 = vector.extract_strided_slice %0 {offsets = [0, 0], sizes = [16, 8], strides = [1, 1]} : vector<32x8xf32> to vector<16x8xf32>
    %39 = vector.extract_strided_slice %37 {offsets = [0, 0], sizes = [1, 8], strides = [1, 1]} : vector<2x8xf32> to vector<1x8xf32>
    %40 = vector.broadcast %39 : vector<1x8xf32> to vector<16x8xf32>
    %41 = arith.mulf %38, %40 : vector<16x8xf32>
    %42 = vector.extract_strided_slice %0 {offsets = [16, 0], sizes = [16, 8], strides = [1, 1]} : vector<32x8xf32> to vector<16x8xf32>
    %43 = vector.extract_strided_slice %37 {offsets = [1, 0], sizes = [1, 8], strides = [1, 1]} : vector<2x8xf32> to vector<1x8xf32>
    %44 = vector.broadcast %43 : vector<1x8xf32> to vector<16x8xf32>
    %45 = arith.mulf %42, %44 : vector<16x8xf32>
    %cst_18 = arith.constant dense<0.000000e+00> : vector<8xf32>
    %46 = vector.multi_reduction <add>, %41, %cst_18 [0] : vector<16x8xf32> to vector<8xf32>
    %47 = vector.shape_cast %46 : vector<8xf32> to vector<1x8xf32>
    %cst_19 = arith.constant 1.600000e+01 : f32
    %48 = vector.broadcast %cst_19 : f32 to vector<1x8xf32>
    %49 = arith.divf %47, %48 : vector<1x8xf32>
    %cst_20 = arith.constant dense<0.000000e+00> : vector<8xf32>
    %50 = vector.multi_reduction <add>, %45, %cst_20 [0] : vector<16x8xf32> to vector<8xf32>
    %51 = vector.shape_cast %50 : vector<8xf32> to vector<1x8xf32>
    %cst_21 = arith.constant 1.600000e+01 : f32
    %52 = vector.broadcast %cst_21 : f32 to vector<1x8xf32>
    %53 = arith.divf %51, %52 : vector<1x8xf32>
    %54 = tpu.concatenate %49, %53 in 0 : vector<1x8xf32>, vector<1x8xf32> -> vector<2x8xf32>
    %c0_22 = arith.constant 0 : index
    %c0_23 = arith.constant 0 : index
    %55 = vector.load %arg5[%c0_22, %c0_23] : memref<8x8xf32, #tpu.memory_space<vmem>>, vector<8x8xf32>
    %cst_24 = arith.constant dense<0.000000e+00> : vector<2x8xf32>
    %56 = tpu.matmul %54, %55, %cst_24 {dimension_numbers = #tpu.dot_dimension_numbers<[1], [0], [0], [1], [0, 0, 1, 1], [], []>} : vector<2x8xf32>, vector<8x8xf32>, vector<2x8xf32> -> vector<2x8xf32>
    %c0_25 = arith.constant 0 : index
    %c0_26 = arith.constant 0 : index
    %57 = vector.load %arg6[%c0_25, %c0_26] : memref<1x8xf32, #tpu.memory_space<vmem>>, vector<1x8xf32>
    %58 = vector.broadcast %57 : vector<1x8xf32> to vector<2x8xf32>
    %59 = arith.addf %56, %58 : vector<2x8xf32>
    %cst_27 = arith.constant dense<0xFF800000> : vector<2xf32>
    %60 = vector.multi_reduction <maximumf>, %59, %cst_27 [1] : vector<2x8xf32> to vector<2xf32>
    %cst_28 = arith.constant 0xFF800000 : f32
    %61 = vector.broadcast %cst_28 : f32 to vector<2xf32>
    %62 = arith.maximumf %61, %60 : vector<2xf32>
    %63 = vector.shape_cast %62 : vector<2xf32> to vector<2x1xf32>
    %64 = vector.broadcast %63 : vector<2x1xf32> to vector<2x8xf32>
    %65 = arith.subf %59, %64 : vector<2x8xf32>
    %66 = math.exp %65 : vector<2x8xf32>
    %cst_29 = arith.constant dense<0.000000e+00> : vector<2xf32>
    %67 = vector.multi_reduction <add>, %66, %cst_29 [1] : vector<2x8xf32> to vector<2xf32>
    %68 = vector.shape_cast %67 : vector<2xf32> to vector<2x1xf32>
    %69 = vector.broadcast %68 : vector<2x1xf32> to vector<2x8xf32>
    %70 = arith.divf %66, %69 : vector<2x8xf32>
    %cst_30 = arith.constant 8.000000e+00 : f32
    %71 = vector.broadcast %cst_30 : f32 to vector<2x8xf32>
    %72 = arith.mulf %70, %71 : vector<2x8xf32>
    %73 = vector.extract_strided_slice %72 {offsets = [0, 0], sizes = [1, 8], strides = [1, 1]} : vector<2x8xf32> to vector<1x8xf32>
    %74 = vector.broadcast %73 : vector<1x8xf32> to vector<16x8xf32>
    %75 = arith.mulf %41, %74 : vector<16x8xf32>
    %76 = vector.extract_strided_slice %72 {offsets = [1, 0], sizes = [1, 8], strides = [1, 1]} : vector<2x8xf32> to vector<1x8xf32>
    %77 = vector.broadcast %76 : vector<1x8xf32> to vector<16x8xf32>
    %78 = arith.mulf %45, %77 : vector<16x8xf32>
    %79 = tpu.concatenate %75, %78 in 0 : vector<16x8xf32>, vector<16x8xf32> -> vector<32x8xf32>
    %c0_31 = arith.constant 0 : index
    %c0_32 = arith.constant 0 : index
    %80 = vector.load %arg8[%c0_31, %c0_32] : memref<8x88xf32, #tpu.memory_space<vmem>>, vector<8x88xf32>
    %cst_33 = arith.constant dense<0.000000e+00> : vector<32x88xf32>
    %81 = tpu.matmul %79, %80, %cst_33 {dimension_numbers = #tpu.dot_dimension_numbers<[1], [0], [0], [1], [0, 0, 1, 1], [], []>} : vector<32x8xf32>, vector<8x88xf32>, vector<32x88xf32> -> vector<32x88xf32>
    %c0_34 = arith.constant 0 : index
    %c0_35 = arith.constant 0 : index
    %c0_36 = arith.constant 0 : index
    %82 = vector.load %arg7[%c0_34, %c0_35, %c0_36] : memref<1x16x16xf32, #tpu.memory_space<vmem>>, vector<1x16x16xf32>
    %83 = vector.shape_cast %82 : vector<1x16x16xf32> to vector<16x16xf32>
    %cst_37 = arith.constant dense<0.000000e+00> : vector<16x8xf32>
    %84 = tpu.matmul %83, %75, %cst_37 {dimension_numbers = #tpu.dot_dimension_numbers<[1], [0], [0], [1], [0, 0, 1, 1], [], []>} : vector<16x16xf32>, vector<16x8xf32>, vector<16x8xf32> -> vector<16x8xf32>
    %cst_38 = arith.constant dense<0.000000e+00> : vector<16x8xf32>
    %85 = tpu.matmul %83, %78, %cst_38 {dimension_numbers = #tpu.dot_dimension_numbers<[1], [0], [0], [1], [0, 0, 1, 1], [], []>} : vector<16x16xf32>, vector<16x8xf32>, vector<16x8xf32> -> vector<16x8xf32>
    %86 = tpu.concatenate %84, %85 in 0 : vector<16x8xf32>, vector<16x8xf32> -> vector<32x8xf32>
    %c0_39 = arith.constant 0 : index
    %c0_40 = arith.constant 0 : index
    %c0_41 = arith.constant 0 : index
    %87 = vector.load %arg9[%c0_39, %c0_40, %c0_41] : memref<1x8x88xf32, #tpu.memory_space<vmem>>, vector<1x8x88xf32>
    %88 = vector.shape_cast %87 : vector<1x8x88xf32> to vector<8x88xf32>
    %cst_42 = arith.constant dense<0.000000e+00> : vector<32x88xf32>
    %89 = tpu.matmul %86, %88, %cst_42 {dimension_numbers = #tpu.dot_dimension_numbers<[1], [0], [0], [1], [0, 0, 1, 1], [], []>} : vector<32x8xf32>, vector<8x88xf32>, vector<32x88xf32> -> vector<32x88xf32>
    %90 = arith.addf %81, %89 : vector<32x88xf32>
    %c0_43 = arith.constant 0 : index
    %c0_44 = arith.constant 0 : index
    %91 = vector.load %arg10[%c0_43, %c0_44] : memref<1x88xf32, #tpu.memory_space<vmem>>, vector<1x88xf32>
    %92 = vector.broadcast %91 : vector<1x88xf32> to vector<32x88xf32>
    %93 = arith.addf %90, %92 : vector<32x88xf32>
    %cst_45 = arith.constant 0.000000e+00 : f32
    %94 = vector.broadcast %cst_45 : f32 to vector<32x88xf32>
    %95 = arith.maximumf %93, %94 : vector<32x88xf32>
    %96 = vector.extract_strided_slice %95 {offsets = [0, 0], sizes = [16, 88], strides = [1, 1]} : vector<32x88xf32> to vector<16x88xf32>
    %cst_46 = arith.constant dense<0.000000e+00> : vector<88xf32>
    %97 = vector.multi_reduction <add>, %96, %cst_46 [0] : vector<16x88xf32> to vector<88xf32>
    %98 = vector.shape_cast %97 : vector<88xf32> to vector<1x88xf32>
    %cst_47 = arith.constant 1.600000e+01 : f32
    %99 = vector.broadcast %cst_47 : f32 to vector<1x88xf32>
    %100 = arith.divf %98, %99 : vector<1x88xf32>
    %101 = vector.extract_strided_slice %95 {offsets = [16, 0], sizes = [16, 88], strides = [1, 1]} : vector<32x88xf32> to vector<16x88xf32>
    %cst_48 = arith.constant dense<0.000000e+00> : vector<88xf32>
    %102 = vector.multi_reduction <add>, %101, %cst_48 [0] : vector<16x88xf32> to vector<88xf32>
    %103 = vector.shape_cast %102 : vector<88xf32> to vector<1x88xf32>
    %cst_49 = arith.constant 1.600000e+01 : f32
    %104 = vector.broadcast %cst_49 : f32 to vector<1x88xf32>
    %105 = arith.divf %103, %104 : vector<1x88xf32>
    %106 = tpu.concatenate %100, %105 in 0 : vector<1x88xf32>, vector<1x88xf32> -> vector<2x88xf32>
    %107 = vector.extract_strided_slice %95 {offsets = [0, 0], sizes = [16, 88], strides = [1, 1]} : vector<32x88xf32> to vector<16x88xf32>
    %cst_50 = arith.constant dense<0xFF800000> : vector<88xf32>
    %108 = vector.multi_reduction <maximumf>, %107, %cst_50 [0] : vector<16x88xf32> to vector<88xf32>
    %109 = vector.shape_cast %108 : vector<88xf32> to vector<1x88xf32>
    %110 = vector.extract_strided_slice %95 {offsets = [16, 0], sizes = [16, 88], strides = [1, 1]} : vector<32x88xf32> to vector<16x88xf32>
    %cst_51 = arith.constant dense<0xFF800000> : vector<88xf32>
    %111 = vector.multi_reduction <maximumf>, %110, %cst_51 [0] : vector<16x88xf32> to vector<88xf32>
    %112 = vector.shape_cast %111 : vector<88xf32> to vector<1x88xf32>
    %113 = tpu.concatenate %109, %112 in 0 : vector<1x88xf32>, vector<1x88xf32> -> vector<2x88xf32>
    %114 = arith.truncf %106 : vector<2x88xf32> to vector<2x88xbf16>
    %c0_52 = arith.constant 0 : index
    %c0_53 = arith.constant 0 : index
    %115 = vector.load %arg11[%c0_52, %c0_53] : memref<88x512xbf16, #tpu.memory_space<vmem>>, vector<88x512xbf16>
    %cst_54 = arith.constant dense<0.000000e+00> : vector<2x512xf32>
    %116 = tpu.matmul %114, %115, %cst_54 {dimension_numbers = #tpu.dot_dimension_numbers<[1], [0], [0], [1], [0, 0, 1, 1], [], []>} : vector<2x88xbf16>, vector<88x512xbf16>, vector<2x512xf32> -> vector<2x512xf32>
    %117 = arith.truncf %113 : vector<2x88xf32> to vector<2x88xbf16>
    %c0_55 = arith.constant 0 : index
    %c0_56 = arith.constant 0 : index
    %118 = vector.load %arg12[%c0_55, %c0_56] : memref<88x512xbf16, #tpu.memory_space<vmem>>, vector<88x512xbf16>
    %cst_57 = arith.constant dense<0.000000e+00> : vector<2x512xf32>
    %119 = tpu.matmul %117, %118, %cst_57 {dimension_numbers = #tpu.dot_dimension_numbers<[1], [0], [0], [1], [0, 0, 1, 1], [], []>} : vector<2x88xbf16>, vector<88x512xbf16>, vector<2x512xf32> -> vector<2x512xf32>
    %120 = arith.addf %116, %119 : vector<2x512xf32>
    %c0_58 = arith.constant 0 : index
    %c0_59 = arith.constant 0 : index
    %121 = vector.load %arg13[%c0_58, %c0_59] : memref<1x512xf32, #tpu.memory_space<vmem>>, vector<1x512xf32>
    %122 = vector.broadcast %121 : vector<1x512xf32> to vector<2x512xf32>
    %123 = arith.addf %120, %122 : vector<2x512xf32>
    %cst_60 = arith.constant 0.000000e+00 : f32
    %124 = vector.broadcast %cst_60 : f32 to vector<2x512xf32>
    %125 = arith.cmpf ogt, %123, %124 : vector<2x512xf32>
    %cst_61 = arith.constant 2.000000e-01 : f32
    %126 = vector.broadcast %cst_61 : f32 to vector<2x512xf32>
    %127 = arith.mulf %126, %123 : vector<2x512xf32>
    %128 = arith.select %125, %123, %127 : vector<2x512xi1>, vector<2x512xf32>
    %c0_62 = arith.constant 0 : index
    %c0_63 = arith.constant 0 : index
    %129 = vector.load %arg14[%c0_62, %c0_63] : memref<1x512xf32, #tpu.memory_space<vmem>>, vector<1x512xf32>
    %130 = vector.broadcast %129 : vector<1x512xf32> to vector<2x512xf32>
    %131 = arith.mulf %128, %130 : vector<2x512xf32>
    %c0_64 = arith.constant 0 : index
    %c0_65 = arith.constant 0 : index
    %132 = vector.load %arg15[%c0_64, %c0_65] : memref<1x512xf32, #tpu.memory_space<vmem>>, vector<1x512xf32>
    %133 = vector.broadcast %132 : vector<1x512xf32> to vector<2x512xf32>
    %134 = arith.addf %131, %133 : vector<2x512xf32>
    %135 = arith.truncf %134 : vector<2x512xf32> to vector<2x512xbf16>
    %c0_66 = arith.constant 0 : index
    %c0_67 = arith.constant 0 : index
    %136 = vector.load %arg16[%c0_66, %c0_67] : memref<512x512xbf16, #tpu.memory_space<vmem>>, vector<512x512xbf16>
    %cst_68 = arith.constant dense<0.000000e+00> : vector<2x512xf32>
    %137 = tpu.matmul %135, %136, %cst_68 {dimension_numbers = #tpu.dot_dimension_numbers<[1], [0], [0], [1], [0, 0, 1, 1], [], []>} : vector<2x512xbf16>, vector<512x512xbf16>, vector<2x512xf32> -> vector<2x512xf32>
    %c0_69 = arith.constant 0 : index
    %c0_70 = arith.constant 0 : index
    %138 = vector.load %arg17[%c0_69, %c0_70] : memref<1x512xf32, #tpu.memory_space<vmem>>, vector<1x512xf32>
    %139 = vector.broadcast %138 : vector<1x512xf32> to vector<2x512xf32>
    %140 = arith.addf %137, %139 : vector<2x512xf32>
    %cst_71 = arith.constant 0.000000e+00 : f32
    %141 = vector.broadcast %cst_71 : f32 to vector<2x512xf32>
    %142 = arith.cmpf ogt, %140, %141 : vector<2x512xf32>
    %cst_72 = arith.constant 2.000000e-01 : f32
    %143 = vector.broadcast %cst_72 : f32 to vector<2x512xf32>
    %144 = arith.mulf %143, %140 : vector<2x512xf32>
    %145 = arith.select %142, %140, %144 : vector<2x512xi1>, vector<2x512xf32>
    %146 = arith.truncf %145 : vector<2x512xf32> to vector<2x512xbf16>
    %c0_73 = arith.constant 0 : index
    %c0_74 = arith.constant 0 : index
    %147 = vector.load %arg18[%c0_73, %c0_74] : memref<512x512xbf16, #tpu.memory_space<vmem>>, vector<512x512xbf16>
    %cst_75 = arith.constant dense<0.000000e+00> : vector<2x512xf32>
    %148 = tpu.matmul %146, %147, %cst_75 {dimension_numbers = #tpu.dot_dimension_numbers<[1], [0], [0], [1], [0, 0, 1, 1], [], []>} : vector<2x512xbf16>, vector<512x512xbf16>, vector<2x512xf32> -> vector<2x512xf32>
    %c0_76 = arith.constant 0 : index
    %c0_77 = arith.constant 0 : index
    %149 = vector.load %arg19[%c0_76, %c0_77] : memref<1x512xf32, #tpu.memory_space<vmem>>, vector<1x512xf32>
    %150 = vector.broadcast %149 : vector<1x512xf32> to vector<2x512xf32>
    %151 = arith.addf %148, %150 : vector<2x512xf32>
    %152 = arith.addf %134, %151 : vector<2x512xf32>
    %cst_78 = arith.constant 0.000000e+00 : f32
    %153 = vector.broadcast %cst_78 : f32 to vector<2x512xf32>
    %154 = arith.cmpf ogt, %152, %153 : vector<2x512xf32>
    %cst_79 = arith.constant 2.000000e-01 : f32
    %155 = vector.broadcast %cst_79 : f32 to vector<2x512xf32>
    %156 = arith.mulf %155, %152 : vector<2x512xf32>
    %157 = arith.select %154, %152, %156 : vector<2x512xi1>, vector<2x512xf32>
    %158 = arith.truncf %157 : vector<2x512xf32> to vector<2x512xbf16>
    %c0_80 = arith.constant 0 : index
    %c0_81 = arith.constant 0 : index
    %159 = vector.load %arg20[%c0_80, %c0_81] : memref<512x512xbf16, #tpu.memory_space<vmem>>, vector<512x512xbf16>
    %cst_82 = arith.constant dense<0.000000e+00> : vector<2x512xf32>
    %160 = tpu.matmul %158, %159, %cst_82 {dimension_numbers = #tpu.dot_dimension_numbers<[1], [0], [0], [1], [0, 0, 1, 1], [], []>} : vector<2x512xbf16>, vector<512x512xbf16>, vector<2x512xf32> -> vector<2x512xf32>
    %c0_83 = arith.constant 0 : index
    %c0_84 = arith.constant 0 : index
    %161 = vector.load %arg21[%c0_83, %c0_84] : memref<1x512xf32, #tpu.memory_space<vmem>>, vector<1x512xf32>
    %162 = vector.broadcast %161 : vector<1x512xf32> to vector<2x512xf32>
    %163 = arith.addf %160, %162 : vector<2x512xf32>
    %cst_85 = arith.constant 0.000000e+00 : f32
    %164 = vector.broadcast %cst_85 : f32 to vector<2x512xf32>
    %165 = arith.cmpf ogt, %163, %164 : vector<2x512xf32>
    %cst_86 = arith.constant 2.000000e-01 : f32
    %166 = vector.broadcast %cst_86 : f32 to vector<2x512xf32>
    %167 = arith.mulf %166, %163 : vector<2x512xf32>
    %168 = arith.select %165, %163, %167 : vector<2x512xi1>, vector<2x512xf32>
    %169 = arith.truncf %168 : vector<2x512xf32> to vector<2x512xbf16>
    %c0_87 = arith.constant 0 : index
    %c0_88 = arith.constant 0 : index
    %170 = vector.load %arg22[%c0_87, %c0_88] : memref<512x512xbf16, #tpu.memory_space<vmem>>, vector<512x512xbf16>
    %cst_89 = arith.constant dense<0.000000e+00> : vector<2x512xf32>
    %171 = tpu.matmul %169, %170, %cst_89 {dimension_numbers = #tpu.dot_dimension_numbers<[1], [0], [0], [1], [0, 0, 1, 1], [], []>} : vector<2x512xbf16>, vector<512x512xbf16>, vector<2x512xf32> -> vector<2x512xf32>
    %c0_90 = arith.constant 0 : index
    %c0_91 = arith.constant 0 : index
    %172 = vector.load %arg23[%c0_90, %c0_91] : memref<1x512xf32, #tpu.memory_space<vmem>>, vector<1x512xf32>
    %173 = vector.broadcast %172 : vector<1x512xf32> to vector<2x512xf32>
    %174 = arith.addf %171, %173 : vector<2x512xf32>
    %175 = arith.addf %157, %174 : vector<2x512xf32>
    %cst_92 = arith.constant 0.000000e+00 : f32
    %176 = vector.broadcast %cst_92 : f32 to vector<2x512xf32>
    %177 = arith.cmpf ogt, %175, %176 : vector<2x512xf32>
    %cst_93 = arith.constant 2.000000e-01 : f32
    %178 = vector.broadcast %cst_93 : f32 to vector<2x512xf32>
    %179 = arith.mulf %178, %175 : vector<2x512xf32>
    %180 = arith.select %177, %175, %179 : vector<2x512xi1>, vector<2x512xf32>
    %181 = arith.truncf %180 : vector<2x512xf32> to vector<2x512xbf16>
    %c0_94 = arith.constant 0 : index
    %c0_95 = arith.constant 0 : index
    %182 = vector.load %arg24[%c0_94, %c0_95] : memref<512x256xbf16, #tpu.memory_space<vmem>>, vector<512x256xbf16>
    %cst_96 = arith.constant dense<0.000000e+00> : vector<2x256xf32>
    %183 = tpu.matmul %181, %182, %cst_96 {dimension_numbers = #tpu.dot_dimension_numbers<[1], [0], [0], [1], [0, 0, 1, 1], [], []>} : vector<2x512xbf16>, vector<512x256xbf16>, vector<2x256xf32> -> vector<2x256xf32>
    %c0_97 = arith.constant 0 : index
    %c0_98 = arith.constant 0 : index
    %184 = vector.load %arg25[%c0_97, %c0_98] : memref<1x256xf32, #tpu.memory_space<vmem>>, vector<1x256xf32>
    %185 = vector.broadcast %184 : vector<1x256xf32> to vector<2x256xf32>
    %186 = arith.addf %183, %185 : vector<2x256xf32>
    %cst_99 = arith.constant 0.000000e+00 : f32
    %187 = vector.broadcast %cst_99 : f32 to vector<2x256xf32>
    %188 = arith.cmpf ogt, %186, %187 : vector<2x256xf32>
    %cst_100 = arith.constant 2.000000e-01 : f32
    %189 = vector.broadcast %cst_100 : f32 to vector<2x256xf32>
    %190 = arith.mulf %189, %186 : vector<2x256xf32>
    %191 = arith.select %188, %186, %190 : vector<2x256xi1>, vector<2x256xf32>
    %192 = arith.truncf %191 : vector<2x256xf32> to vector<2x256xbf16>
    %c0_101 = arith.constant 0 : index
    %c0_102 = arith.constant 0 : index
    %193 = vector.load %arg26[%c0_101, %c0_102] : memref<256x3xbf16, #tpu.memory_space<vmem>>, vector<256x3xbf16>
    %cst_103 = arith.constant dense<0.000000e+00> : vector<2x3xf32>
    %194 = tpu.matmul %192, %193, %cst_103 {dimension_numbers = #tpu.dot_dimension_numbers<[1], [0], [0], [1], [0, 0, 1, 1], [], []>} : vector<2x256xbf16>, vector<256x3xbf16>, vector<2x3xf32> -> vector<2x3xf32>
    %c0_104 = arith.constant 0 : index
    %c0_105 = arith.constant 0 : index
    %195 = vector.load %arg27[%c0_104, %c0_105] : memref<1x3xf32, #tpu.memory_space<vmem>>, vector<1x3xf32>
    %196 = vector.broadcast %195 : vector<1x3xf32> to vector<2x3xf32>
    %197 = arith.addf %194, %196 : vector<2x3xf32>
    %c0_106 = arith.constant 0 : index
    %c0_107 = arith.constant 0 : index
    %198 = vector.load %arg28[%c0_106, %c0_107] : memref<2x3xf32, #tpu.memory_space<vmem>>, vector<2x3xf32>
    tpu.vector_store %arg28[%c0_106, %c0_107], %197 {strides = array<i32>} : memref<2x3xf32, #tpu.memory_space<vmem>>, vector<2x3xf32>,
    return
  }
}

</mosaic_0001>

<bundles_post_ra>
// kernel: channel_band_attention_m1.1
= control target key start
LH: loop header
LB: loop body
LE: loop exit
PB: predicated region body
PF: predicated region fallthrough
CT: control target
= control target key end

     0   :  { %s8687_s0 = inlined_call_operand.vmem [shape: f32[32,8], index: 0, kind: input, shape index: {}]   ;;  %s8688_s1 = inlined_call_operand.vmem [shape: f32[8,4], index: 1, kind: input, shape index: {}]   ;;  %s8689_s2 = inlined_call_operand.vmem [shape: f32[1,4], index: 2, kind: input, shape index: {}]   ;;  %s8690_s3 = inlined_call_operand.vmem [shape: f32[4,8], index: 3, kind: input, shape index: {}]   ;;  %s8691_s4 = inlined_call_operand.vmem [shape: f32[1,8], index: 4, kind: input, shape index: {}]   ;;  %s8692_s5 = inlined_call_operand.vmem [shape: f32[8,8], index: 5, kind: input, shape index: {}]   ;;  %s8693_s6 = inlined_call_operand.vmem [shape: f32[1,8], index: 6, kind: input, shape index: {}]   ;;  %s8694_s7 = inlined_call_operand.vmem [shape: f32[1,16,16], index: 7, kind: input, shape index: {}]   ;;  %s8695_s8 = inlined_call_operand.vmem [shape: f32[8,88], index: 8, kind: input, shape index: {}]   ;;  %s8696_s9 = inlined_call_operand.vmem [shape: f32[1,8,88], index: 9, kind: input, shape index: {}]   ;;  %s8697_s10 = inlined_call_operand.vmem [shape: f32[1,88], index: 10, kind: input, shape index: {}]   ;;  %s8698_s11 = inlined_call_operand.vmem [shape: bf16[88,512], index: 11, kind: input, shape index: {}]   ;;  %s8699_s12 = inlined_call_operand.hbm [shape: bf16[88,512], index: 12, kind: input, shape index: {}]   ;;  %s8700_s13 = inlined_call_operand.vmem [shape: f32[1,512], index: 13, kind: input, shape index: {}]   ;;  %s8701_s14 = inlined_call_operand.vmem [shape: f32[1,512], index: 14, kind: input, shape index: {}]   ;;  %s8702_s15 = inlined_call_operand.vmem [shape: f32[1,512], index: 15, kind: input, shape index: {}]   ;;  %s8703_s16 = inlined_call_operand.hbm [shape: bf16[512,512], index: 16, kind: input, shape index: {}]   ;;  %s8704_s17 = inlined_call_operand.vmem [shape: f32[1,512], index: 17, kind: input, shape index: {}]   ;;  %s8705_s18 = inlined_call_operand.hbm [shape: bf16[512,512], index: 18, kind: input, shape index: {}]   ;;  %s8706_s19 = inlined_call_operand.vmem [shape: f32[1,512], index: 19, kind: input, shape index: {}]   ;;  %s8707_s20 = inlined_call_operand.hbm [shape: bf16[512,512], index: 20, kind: input, shape index: {}]   ;;  %s8708_s21 = inlined_call_operand.vmem [shape: f32[1,512], index: 21, kind: input, shape index: {}]   ;;  %s8709_s22 = inlined_call_operand.hbm [shape: bf16[512,512], index: 22, kind: input, shape index: {}]   ;;  %s8710_s23 = inlined_call_operand.vmem [shape: f32[1,512], index: 23, kind: input, shape index: {}]   ;;  %s8711_s24 = inlined_call_operand.hbm [shape: bf16[512,256], index: 24, kind: input, shape index: {}]   ;;  %s8712_s25 = inlined_call_operand.vmem [shape: f32[1,256], index: 25, kind: input, shape index: {}]   ;;  %s8713_s26 = inlined_call_operand.vmem [shape: bf16[256,3], index: 26, kind: input, shape index: {}]   ;;  %s8714_s27 = inlined_call_operand.vmem [shape: f32[1,3], index: 27, kind: input, shape index: {}]   ;;  %s8715_s28 = inlined_call_operand.hbm [shape: f32[2,3], index: 28, kind: output, shape index: {}]  }
   0x1   :  { %8721 = sst [smem:[#allocation19_spill]] %s8687_s0 }
   0x2   :  { %8722 = sst [smem:[#allocation20_spill]] %s8688_s1 }
   0x3   :  { %8723 = sst [smem:[#allocation21_spill]] %s8689_s2 }
   0x4   :  { %8724 = sst [smem:[#allocation22_spill]] %s8690_s3 }
   0x5   :  { %8725 = sst [smem:[#allocation23_spill]] %s8691_s4 }
   0x6   :  { %8726 = sst [smem:[#allocation24_spill]] %s8692_s5 }
   0x7   :  { %8727 = sst [smem:[#allocation25_spill]] %s8693_s6 }
   0x8   :  { %8728 = sst [smem:[#allocation26_spill]] %s8694_s7 }
   0x9   :  { %8729 = sst [smem:[#allocation27_spill]] %s8695_s8 }
   0xa   :  { %8730 = sst [smem:[#allocation28_spill]] %s8696_s9 }
   0xb   :  { %8731 = sst [smem:[#allocation29_spill]] %s8697_s10 }
   0xc   :  { %8732 = sst [smem:[#allocation30_spill]] %s8698_s11 }
   0xd   :  { %8733 = sst [smem:[#allocation31_spill]] %s8699_s12 }
   0xe   :  { %8734 = sst [smem:[#allocation32_spill]] %s8715_s28 }
   0xf   :  { %33 = vsyncpa [#allocation3], 0 }
  0x10   :  { %34 = vsyncpa [#allocation6], 0 }
  0x11   :  { %35 = vsyncpa [#allocation9], 0 }
  0x12   :  { %36 = vsyncpa [#allocation12], 0 }
  0x13   :  { %37 = vsyncpa [#allocation4], 0  ;;  %s8015_s8 = smov [#allocation5]   ;;  %s8016_s9 = smov [#allocation8]  }
  0x14   :  { %s85_s5 = sshll.u32 %s8015_s8, 4  ;;  %s113_s30 = sshll.u32 %s8016_s9, 4  ;;  %s86_s5 = int_to_ptr.vmem [resolvable:$true] %s85_s5  ;;  %s8174_s30 = int_to_ptr.vmem [resolvable:$true] %s113_s30 }
  0x15   :  { %s7851_s10 = scalar_lea.hbm %s8703_s16, 16384 }
  0x16   :  { %p7852_p0 = scmp.ne.s32.totalorder %s8703_s16, %s7851_s10  ;;  %p7855_p1 = scmp.lt.u32.totalorder %s7851_s10, %s8703_s16 }
  0x18   :  { %p7857_p2 = pnand %p7855_p1, %p7852_p0 }
  0x1a   :  { %7860 = shalt.err (!%p7857_p2)
}
  0x1b   :  { %s7861_s7 = scalar_lea.vmem %s86_s5, 16384  ;;  %p7866_p4 = scmp.lt.s32.totalorder %s86_s5, %s86_s5 }
  0x1c   :  { %p7862_p3 = scmp.ne.s32.totalorder %s86_s5, %s7861_s7  ;;  %p7867_p5 = scmp.lt.s32.totalorder %s7861_s7, %s7861_s7 }
  0x1e   :  { %p7868_p6 = por %p7867_p5, %p7866_p4 }
  0x20   :  { %p7869_p7 = pnand %p7868_p6, %p7862_p3 }
  0x22   :  { %7872 = shalt.err (!%p7869_p7)
}
  0x23   :  { %s8017_s12 = smov 256   ;;  %s8018_s1 = smov 16  }
  0x24   :  { %91 = dma.hbm_to_vmem [thread:$0]  %s8703_s16, 16384, %s86_s5, [#allocation6], %s8017_s12, %s8017_s12, %s8018_s1  }
  0x25   :  { %s7873_s6 = scalar_lea.hbm %s8707_s20, 16384 }
  0x26   :  { %p7874_p8 = scmp.ne.s32.totalorder %s8707_s20, %s7873_s6  ;;  %p7877_p9 = scmp.lt.u32.totalorder %s7873_s6, %s8707_s20 }
  0x28   :  { %p7879_p10 = pnand %p7877_p9, %p7874_p8 }
  0x2a   :  { %7882 = shalt.err (!%p7879_p10)
}
  0x2b   :  { %s7883_s2 = scalar_lea.vmem %s8174_s30, 16384  ;;  %p7888_p12 = scmp.lt.s32.totalorder %s8174_s30, %s8174_s30 }
  0x2c   :  { %p7884_p11 = scmp.ne.s32.totalorder %s8174_s30, %s7883_s2  ;;  %p7889_p13 = scmp.lt.s32.totalorder %s7883_s2, %s7883_s2 }
  0x2e   :  { %p7890_p0 = por %p7889_p13, %p7888_p12 }
  0x30   :  { %p7891_p1 = pnand %p7890_p0, %p7884_p11 }
  0x32   :  { %7894 = shalt.err (!%p7891_p1)
}
  0x33   :  { %119 = dma.hbm_to_vmem [thread:$0]  %s8707_s20, 16384, %s8174_s30, [#allocation9], %s8017_s12, %s8017_s12, %s8018_s1  }
  0x34   :  { %s8019_s7 = smov [#allocation2]   ;;  %s8020_s8 = smov [#allocation7]  }
  0x35   :  { %s67_s4 = sshll.u32 %s8019_s7, 4  ;;  %s99_s9 = sshll.u32 %s8020_s8, 4  ;;  %s68_s4 = int_to_ptr.vmem [resolvable:$true] %s67_s4  ;;  %s8211_s9 = int_to_ptr.vmem [resolvable:$true] %s99_s9 }
  0x36   :  { %s8735_s10 = sld [smem:[#allocation31_spill]] }
  0x3c   :  { %s7895_s0 = scalar_lea.hbm %s8735_s10, 2816 }
  0x3d   :  { %p7896_p2 = scmp.ne.s32.totalorder %s8735_s10, %s7895_s0  ;;  %p7899_p3 = scmp.lt.u32.totalorder %s7895_s0, %s8735_s10 }
  0x3f   :  { %p7901_p4 = pnand %p7899_p3, %p7896_p2 }
  0x41   :  { %7904 = shalt.err (!%p7901_p4)
}
  0x42   :  { %s7905_s20 = scalar_lea.vmem %s68_s4, 2816  ;;  %p7910_p6 = scmp.lt.s32.totalorder %s68_s4, %s68_s4 }
  0x43   :  { %p7906_p5 = scmp.ne.s32.totalorder %s68_s4, %s7905_s20  ;;  %p7911_p7 = scmp.lt.s32.totalorder %s7905_s20, %s7905_s20 }
  0x45   :  { %p7912_p8 = por %p7911_p7, %p7910_p6 }
  0x47   :  { %p7913_p9 = pnand %p7912_p8, %p7906_p5 }
  0x49   :  { %7916 = shalt.err (!%p7913_p9)
}
  0x4a   :  { %73 = dma.hbm_to_vmem [thread:$0]  %s8735_s10, 2816, %s68_s4, [#allocation3], %s8017_s12, %s8017_s12, %s8018_s1  }
  0x4b   :  { %s7917_s28 = scalar_lea.hbm %s8705_s18, 16384 }
  0x4c   :  { %p7918_p10 = scmp.ne.s32.totalorder %s8705_s18, %s7917_s28  ;;  %p7921_p11 = scmp.lt.u32.totalorder %s7917_s28, %s8705_s18 }
  0x4e   :  { %p7923_p12 = pnand %p7921_p11, %p7918_p10 }
  0x50   :  { %7926 = shalt.err (!%p7923_p12)
}
  0x51   :  { %s7927_s11 = scalar_lea.vmem %s8211_s9, 16384  ;;  %p7932_p0 = scmp.lt.s32.totalorder %s8211_s9, %s8211_s9 }
  0x52   :  { %p7928_p13 = scmp.ne.s32.totalorder %s8211_s9, %s7927_s11  ;;  %p7933_p1 = scmp.lt.s32.totalorder %s7927_s11, %s7927_s11 }
  0x54   :  { %p7934_p2 = por %p7933_p1, %p7932_p0 }
  0x56   :  { %p7935_p3 = pnand %p7934_p2, %p7928_p13 }
  0x58   :  { %7938 = shalt.err (!%p7935_p3)
}
  0x59   :  { %105 = dma.hbm_to_vmem [thread:$0]  %s8705_s18, 16384, %s8211_s9, [#allocation6], %s8017_s12, %s8017_s12, %s8018_s1  }
  0x5a   :  { %s8021_s29 = smov [#allocation10]   ;;  %s8022_s20 = smov [#allocation11]  }
  0x5b   :  { %s127_s2 = sshll.u32 %s8021_s29, 4  ;;  %s141_s30 = sshll.u32 %s8022_s20, 4  ;;  %s128_s2 = int_to_ptr.vmem [resolvable:$true] %s127_s2  ;;  %s8248_s30 = int_to_ptr.vmem [resolvable:$true] %s141_s30 }
  0x5c   :  { %s7939_s7 = scalar_lea.hbm %s8709_s22, 16384 }
  0x5d   :  { %p7940_p4 = scmp.ne.s32.totalorder %s8709_s22, %s7939_s7  ;;  %p7943_p5 = scmp.lt.u32.totalorder %s7939_s7, %s8709_s22 }
  0x5f   :  { %p7945_p6 = pnand %p7943_p5, %p7940_p4 }
  0x61   :  { %7948 = shalt.err (!%p7945_p6)
}
  0x62   :  { %s7949_s18 = scalar_lea.vmem %s128_s2, 16384  ;;  %p7954_p8 = scmp.lt.s32.totalorder %s128_s2, %s128_s2 }
  0x63   :  { %p7950_p7 = scmp.ne.s32.totalorder %s128_s2, %s7949_s18  ;;  %p7955_p9 = scmp.lt.s32.totalorder %s7949_s18, %s7949_s18 }
  0x65   :  { %p7956_p10 = por %p7955_p9, %p7954_p8 }
  0x67   :  { %p7957_p11 = pnand %p7956_p10, %p7950_p7 }
  0x69   :  { %7960 = shalt.err (!%p7957_p11)
}
  0x6a   :  { %133 = dma.hbm_to_vmem [thread:$0]  %s8709_s22, 16384, %s128_s2, [#allocation9], %s8017_s12, %s8017_s12, %s8018_s1  }
  0x6b   :  { %s7961_s10 = scalar_lea.hbm %s8711_s24, 8192 }
  0x6c   :  { %p7962_p12 = scmp.ne.s32.totalorder %s8711_s24, %s7961_s10  ;;  %p7965_p13 = scmp.lt.u32.totalorder %s7961_s10, %s8711_s24 }
  0x6e   :  { %p7967_p0 = pnand %p7965_p13, %p7962_p12 }
  0x70   :  { %7970 = shalt.err (!%p7967_p0)
}
  0x71   :  { %s7971_s7 = scalar_lea.vmem %s8248_s30, 8192  ;;  %p7976_p2 = scmp.lt.s32.totalorder %s8248_s30, %s8248_s30 }
  0x72   :  { %p7972_p1 = scmp.ne.s32.totalorder %s8248_s30, %s7971_s7  ;;  %p7977_p3 = scmp.lt.s32.totalorder %s7971_s7, %s7971_s7 }
  0x74   :  { %p7978_p4 = por %p7977_p3, %p7976_p2 }
  0x76   :  { %p7979_p5 = pnand %p7978_p4, %p7972_p1 }
  0x78   :  { %7982 = shalt.err (!%p7979_p5)
}
  0x79   :  { %s8023_s22 = smov 128   ;;  %s8024_s12 = smov 8  }
  0x7a   :  { %147 = dma.hbm_to_vmem [thread:$0]  %s8711_s24, 8192, %s8248_s30, [#allocation12], %s8023_s22, %s8023_s22, %s8024_s12  }
  0x7b   :  { %8005 = dma.done.wait [#allocation3], 2816  }
  0x7c   :  { %8006 = vsyncadd [#allocation3], 4294964480 }
  0x7d   :  { %8007 = dma.done.wait [#allocation6], 32768  }
  0x7e   :  { %8008 = vsyncadd [#allocation6], 4294934528 }
  0x7f   :  { %8009 = dma.done.wait [#allocation9], 32768  }
  0x80   :  { %8010 = vsyncadd [#allocation9], 4294934528 }
  0x81   :  { %8011 = dma.done.wait [#allocation12], 8192  }
  0x82   :  { %8012 = vsyncadd [#allocation12], 4294959104  ;;  %v8025_v0 = vmov 0.0   ;;  %vm8026_vm0 = vmmov 0   ;;  %vm177_vm1 = vcmask 64512   ;;  %s8736_s24 = sld [smem:[#allocation20_spill]]  ;;  %v401_v63 = vlaneseq }
  0x83   :  { %6790 = vmatprep.subr.mxu0 %v8025_v0  ;;  %6792 = vmatprep.mubr.msk.f32.mxu0 %vm8026_vm0, %v8025_v0  ;;  %s8737_s6 = sld [smem:[#allocation19_spill]]  ;;  %vm217_vm2 = vcmask 1040384   ;;  %vm219_vm3 = vcmask 1041408   ;;  %vm221_vm4 = vcmask 1042432   ;;  %s8738_s16 = sld [smem:[#allocation22_spill]]  ;;  %vm317_vm5 = vcmask 1043456  }
  0x84   :  { %6795 = vmatprep.subr.mxu1 %v8025_v0  ;;  %6797 = vmatprep.mubr.msk.f32.mxu1 %vm8026_vm0, %v8025_v0  ;;  %s8739_s22 = sld [smem:[#allocation21_spill]]  ;;  %vm313_vm6 = vcmask 31744   ;;  %s8740_s2 = sld [smem:[#allocation24_spill]]  ;;  %vm515_vm7 = vcmask 58368   ;;  %vm543_vm8 = vcmask 130048   ;;  %vm910_vm9 = vcmask 719872  }
  0x85   :  { %s8742_s20 = sld [smem:[#allocation25_spill]]  ;;  %s8743_s7 = sld [smem:[#allocation26_spill]] }
  0x86   :  { %s8744_s1 = sld [smem:[#allocation28_spill]]  ;;  %s8745_s30 = sld [smem:[#allocation27_spill]] }
  0x87   :  { %s8746_s9 = sld [smem:[#allocation29_spill]]  ;;  %s8747_s4 = sld [smem:[#allocation30_spill]] }
  0x88   :  { %v223_v1 = vld [vmem:[%s8736_s24] sm:$0xff]  ;;  %s8741_s24 = sld [smem:[#allocation23_spill]]  ;;  %s8028_s3 = smov [#allocation13]  }
  0x89   :  { %v173_v2 = vld [vmem:[%s8737_s6] sm:$0xff]  ;;  %v174_v3 = vld [vmem:[%s8737_s6 + $0x8] sm:$0xff]  ;;  %6791 = vmatpush3.msra.mxu0 %v223_v1  ;;  %v175_v4 = vld [vmem:[%s8737_s6 + $0x10] sm:$0xff]  ;;  %s6062_s18 = sshll.u32 %s8028_s3, 4  ;;  %s6063_s18 = int_to_ptr.vmem [resolvable:$true] %s6062_s18 }
  0x8a   :  { %v176_v5 = vld [vmem:[%s8737_s6 + $0x18] sm:$0xff]  ;;  %v178_v6 = vsel %vm177_vm1, %v173_v2, 0.0  ;;  %v179_v7 = vsel %vm177_vm1, %v174_v3, 0.0  ;;  %v199_v8 = vsel %vm177_vm1, %v173_v2, -inf  ;;  %v200_v9 = vsel %vm177_vm1, %v174_v3, -inf  ;;  %6800 = vmatprep.subr.mxu0 %v8025_v0  ;;  %v434_v53 = vld [vmem:[%s8740_s2] sm:$0xff]  ;;  %p7988_p7 = scmp.lt.s32.totalorder %s6063_s18, %s6063_s18 }
  0x8b   :  { %v180_v10 = vadd.f32 %v179_v7, %v178_v6  ;;  %v189_v11 = vsel %vm177_vm1, %v175_v4, 0.0  ;;  %v190_v12 = vsel %vm177_vm1, %v176_v5, 0.0  ;;  %v201_v13 = vmax.f32 %v199_v8, %v200_v9  ;;  %v305_v47 = vld [vmem:[%s8738_s16] sm:$0xf]  ;;  %v7848_v8 = vld [vmem:[%s8737_s6 + $0x8] sm:$0xff] }
  0x8c   :  { %v191_v14 = vadd.f32 %v190_v12, %v189_v11  ;;  %v208_v15 = vsel %vm177_vm1, %v175_v4, -inf  ;;  %v209_v16 = vsel %vm177_vm1, %v176_v5, -inf  ;;  %6796 = vmatpush3.msk.msra.mxu1 %vm317_vm5, %v305_v47  ;;  %v6074_v48 = vld [vmem:[%s8739_s22] ss:$0 sm:$0xff]  ;;  %v7850_v12 = vld [vmem:[%s8737_s6 + $0x18] sm:$0xff] }
  0x8d   :  { %v181_v17 = vrot.slane %v180_v10, 4  ;;  %v202_v18 = vrot.slane %v201_v13, 4  ;;  %v210_v19 = vmax.f32 %v208_v15, %v209_v16  ;;  %v7847_v6 = vld [vmem:[%s8737_s6] sm:$0xff] }
  0x8e   :  { %v192_v20 = vrot.slane %v191_v14, 4  ;;  %v6076_v54 = vld [vmem:[%s8741_s24] ss:$0 sm:$0xff] }
  0x8f   :  { %v182_v21 = vadd.f32 %v181_v17, %v180_v10  ;;  %v203_v22 = vmax.f32 %v201_v13, %v202_v18  ;;  %v211_v23 = vrot.slane %v210_v19, 4  ;;  %v7849_v10 = vld [vmem:[%s8737_s6 + $0x10] sm:$0xff] }
  0x90   :  { %v193_v24 = vadd.f32 %v192_v20, %v191_v14 }
  0x91   :  { %v183_v25 = vrot.slane %v182_v21, 2  ;;  %v204_v26 = vrot.slane %v203_v22, 2  ;;  %v212_v27 = vmax.f32 %v210_v19, %v211_v23 }
  0x92   :  { %v194_v28 = vrot.slane %v193_v24, 2 }
  0x93   :  { %v184_v29 = vadd.f32 %v183_v25, %v182_v21  ;;  %v205_v30 = vmax.f32 %v203_v22, %v204_v26  ;;  %v213_v31 = vrot.slane %v212_v27, 2 }
  0x94   :  { %v195_v32 = vadd.f32 %v194_v28, %v193_v24 }
  0x95   :  { %v185_v33 = vrot.slane %v184_v29, 1  ;;  %v206_v34 = vrot.slane %v205_v30, 1  ;;  %v214_v35 = vmax.f32 %v212_v27, %v213_v31 }
  0x96   :  { %v196_v36 = vrot.slane %v195_v32, 1 }
  0x97   :  { %v186_v37 = vadd.f32 %v185_v33, %v184_v29  ;;  %v215_v38 = vrot.slane %v214_v35, 1  ;;  %v207_v41 = vmax.f32 %v205_v30, %v206_v34 }
  0x98   :  { %v197_v39 = vadd.f32 %v196_v36, %v195_v32 }
  0x99   :  { %v188_v40 = vmul.f32 0.0625, %v186_v37  ;;  %v216_v43 = vmax.f32 %v214_v35, %v215_v38  ;;  %v6080_v35 = vld [vmem:[%s8742_s20] ss:$0 sm:$0xff] }
  0x9a   :  { %v198_v42 = vmul.f32 0.0625, %v197_v39 }
  0x9c   :  { %v218_v44 = vsel %vm217_vm2, %v188_v40, %v198_v42 }
  0x9d   :  { %v220_v45 = vsel %vm219_vm3, %v218_v44, %v207_v41 }
  0x9e   :  { %v222_v46 = vsel %vm221_vm4, %v220_v45, %v216_v43  ;;  %v541_v45 = vld [vmem:[%s8743_s7] sm:$0xff] }
  0x9f   :  { %6793 = vmatmul.mubr.msk.f32.vlgmr.msra.gmra.mrb[0].mxu0 %vm177_vm1, %v222_v46  ;;  %v700_v46 = vld [vmem:[%s8744_s1] sm:$0xff] }
  0xa0   :  { %6802 = vmatprep.mubr.msk.f32.mxu0 %vm8026_vm0, %v8025_v0  ;;  %6801 = vmatpush3.msra.mxu0 %v434_v53  ;;  %v8323_v0 = vshrl.u32 %v401_v63, 7 }
  0xa1   :  { %6819 = vmatprep.subr.mxu1 %v700_v46 }
  0xa2   :  { %v8326_v1 = vsub.s32 0, %v8323_v0  ;;  %v8329_v2 = vsub.s32 1, %v8323_v0 }
 0x172   :  { %v300_v49 = vpop.f32.mrb[0].mxu0 }
 0x173   :  { %v301_v50 = vadd.f32 %v6074_v48, %v300_v49  ;;  %v6794_v51 = vpop.f32.mrb[1].mxu0 }
 0x175   :  { %v304_v52 = vmax.f32 %v301_v50, 0.0 }
 0x177   :  { %6798 = vmatmul.mubr.msk.f32.vlgmr.msra.gmra.mrb[0].mxu1 %vm313_vm6, %v304_v52 }
 0x178   :  { %6820 = vmatpush3.msra.mxu1 %v700_v46 }
 0x24a   :  { %v387_v55 = vpop.f32.mrb[0].mxu1 }
 0x24b   :  { %v388_v56 = vadd.f32 %v6076_v54, %v387_v55  ;;  %v6799_v57 = vpop.f32.mrb[1].mxu1 }
 0x24d   :  { %v392_v58 = vrot.slane %v388_v56, 2 }
 0x24f   :  { %v394_v59 = vadd.f32 %v392_v58, %v388_v56 }
 0x251   :  { %v6079_v60 = vmul.f32 -1.442695, %v394_v59  ;;  %v542_v59 = vld [vmem:[%s8743_s7 + $0x8] sm:$0xff] }
 0x253   :  { %7839 = vpow2.f32 %v6079_v60  ;;  %v540_v60 = vld [vmem:[%s8745_s30] sm:$0xff] }
 0x254   :  { %6827 = vmatprep.subr.mxu1 %v540_v60 }
 0x25d   :  { %v7840_v61 = vpop.eup %7839 }
 0x25e   :  { %v398_v62 = vadd.f32 1.0, %v7840_v61 }
 0x260   :  { %7841 = vrcp.f32 %v398_v62 }
 0x26a   :  { %v7842_v3 = vpop.eup %7841 }
 0x26b   :  { %v404_v4 = vrot.slane %v7842_v3, %v8326_v1  ;;  %v410_v5 = vrot.slane %v7842_v3, %v8329_v2 }
 0x26d   :  { %v405_v7 = vmul.f32 %v7847_v6, %v404_v4  ;;  %v406_v9 = vmul.f32 %v7848_v8, %v404_v4  ;;  %v411_v11 = vmul.f32 %v7849_v10, %v410_v5  ;;  %v412_v13 = vmul.f32 %v7850_v12, %v410_v5  ;;  %v6893_v4 = vld [vmem:[#allocation2 + $0x4] ss:$16 sps:$4 sm:$0xff]   ;;  %v6891_v5 = vld [vmem:[#allocation2] ss:$16 sps:$4 sm:$0xff]  }
 0x26e   :  { %v6896_v6 = vld [vmem:[#allocation2 + $0x24] ss:$16 sps:$4 sm:$0xff]  }
 0x26f   :  { %v413_v14 = vsel %vm177_vm1, %v405_v7, 0.0  ;;  %v414_v15 = vsel %vm177_vm1, %v406_v9, 0.0  ;;  %v423_v16 = vsel %vm177_vm1, %v411_v11, 0.0  ;;  %v424_v17 = vsel %vm177_vm1, %v412_v13, 0.0  ;;  %v6899_v8 = vld [vmem:[#allocation2 + $0x44] ss:$16 sps:$4 sm:$0xff]  }
 0x270   :  { %v415_v18 = vadd.f32 %v414_v15, %v413_v14  ;;  %v425_v19 = vadd.f32 %v424_v17, %v423_v16  ;;  %v6902_v10 = vld [vmem:[#allocation2 + $0x64] ss:$16 sps:$4 sm:$0xff]  }
 0x271   :  { %v6905_v12 = vld [vmem:[#allocation2 + $0x84] ss:$16 sps:$4 sm:$0xff]  }
 0x272   :  { %v416_v20 = vrot.slane %v415_v18, 4  ;;  %v426_v21 = vrot.slane %v425_v19, 4  ;;  %v995_v14 = vld [vmem:[#allocation2 + $0xa0] sm:$0xff] }
 0x273   :  { %v6116_v15 = vcombine.high %v995_v14, %v995_v14  ;;  %v6115_v16 = vcombine.low %v995_v14, %v995_v14 }
 0x274   :  { %v417_v22 = vadd.f32 %v416_v20, %v415_v18  ;;  %v427_v23 = vadd.f32 %v426_v21, %v425_v19  ;;  %v6910_v18 = vld [vmem:[#allocation2 + $0xc] ss:$16 sps:$4 sm:$0xff]   ;;  %v8027_v19 = vmov 0   ;;  %v6959_v20 = vld [vmem:[#allocation5] ss:$16 sps:$4 sm:$0xff]  }
 0x275   :  { %v1111_v17 = vsel %vm317_vm5, %v6115_v16, 0  ;;  %v6961_v21 = vld [vmem:[#allocation5 + $0x4] ss:$16 sps:$4 sm:$0xff]  }
 0x276   :  { %v418_v24 = vrot.slane %v417_v22, 2  ;;  %v428_v25 = vrot.slane %v427_v23, 2 }
 0x278   :  { %v419_v26 = vadd.f32 %v418_v24, %v417_v22  ;;  %v429_v27 = vadd.f32 %v428_v25, %v427_v23  ;;  %v6094_v22 = vld [vmem:[%s8746_s9] ss:$0 sm:$0xff]  ;;  %s7983_s9 = scalar_lea.vmem %s6063_s18, 32 }
 0x279   :  { %p7984_p6 = scmp.ne.s32.totalorder %s6063_s18, %s7983_s9  ;;  %p7989_p8 = scmp.lt.s32.totalorder %s7983_s9, %s7983_s9 }
 0x27a   :  { %v420_v28 = vrot.slane %v419_v26, 1  ;;  %v430_v29 = vrot.slane %v429_v27, 1 }
 0x27b   :  { %p7990_p9 = por %p7989_p8, %p7988_p7 }
 0x27c   :  { %v421_v30 = vadd.f32 %v420_v28, %v419_v26  ;;  %v431_v31 = vadd.f32 %v430_v29, %v429_v27 }
 0x27d   :  { %p7991_p10 = pnand %p7990_p9, %p7984_p6 }
 0x27e   :  { %v422_v32 = vmul.f32 0.0625, %v421_v30  ;;  %v432_v33 = vmul.f32 0.0625, %v431_v31 }
 0x280   :  { %v433_v34 = vsel %vm217_vm2, %v422_v32, %v432_v33 }
 0x281   :  { %6803 = vmatmul.mubr.msk.f32.vlgmr.msra.gmra.mrb[2].mxu0 %vm177_vm1, %v433_v34 }
 0x282   :  { %6809 = vmatprep.mubr.msk.f32.mxu0 %vm543_vm8, %v541_v45 }
 0x354   :  { %v511_v36 = vpop.f32.mrb[2].mxu0 }
 0x355   :  { %v512_v37 = vadd.f32 %v6080_v35, %v511_v36  ;;  %v6804_v38 = vpop.f32.mrb[3].mxu0 }
 0x357   :  { %v516_v39 = vsel %vm515_vm7, %v512_v37, -inf }
 0x358   :  { %517 = vmax.xlane.f32.xlu0 %v516_v39 }
 0x3e5   :  { %v518_v40 = vpop.xlane.xlu0 %517 }
 0x3e6   :  { %v519_v41 = vsub.f32 %v512_v37, %v518_v40 }
 0x3e8   :  { %v520_v42 = vmul.f32 1.442695, %v519_v41 }
 0x3ea   :  { %7843 = vpow2.f32 %v520_v42 }
 0x3f4   :  { %v7844_v43 = vpop.eup %7843 }
 0x3f5   :  { %v522_v44 = vsel %vm515_vm7, %v7844_v43, 0.0 }
 0x3f6   :  { %523 = vadd.xlane.f32.xlu0 %v522_v44 }
 0x483   :  { %v524_v47 = vpop.xlane.xlu0 %523 }
 0x484   :  { %7845 = vrcp.f32 %v524_v47 }
 0x48e   :  { %v7846_v48 = vpop.eup %7845 }
 0x48f   :  { %v526_v49 = vmul.f32 %v7846_v48, %v7844_v43 }
 0x491   :  { %v527_v50 = vmul.f32 8.0, %v526_v49 }
 0x493   :  { %v531_v51 = vrot.slane %v527_v50, %v8326_v1  ;;  %v537_v52 = vrot.slane %v527_v50, %v8329_v2 }
 0x495   :  { %v532_v53 = vmul.f32 %v531_v51, %v405_v7  ;;  %v533_v54 = vmul.f32 %v531_v51, %v406_v9  ;;  %v538_v55 = vmul.f32 %v537_v52, %v411_v11  ;;  %v539_v56 = vmul.f32 %v537_v52, %v412_v13  ;;  %v6894_v7 = vld [vmem:[#allocation2 + $0x20] ss:$16 sps:$4 sm:$0xff]  }
 0x496   :  { %v6897_v9 = vld [vmem:[#allocation2 + $0x40] ss:$16 sps:$4 sm:$0xff]  }
 0x497   :  { %v6835_v57 = vpack.c.bf16 %v533_v54, %v532_v53  ;;  %v6839_v58 = vpack.c.bf16 %v539_v56, %v538_v55  ;;  %v6900_v11 = vld [vmem:[#allocation2 + $0x60] ss:$16 sps:$4 sm:$0xff]  }
 0x498   :  { %v6903_v13 = vld [vmem:[#allocation2 + $0x80] ss:$16 sps:$4 sm:$0xff]  }
 0x499   :  { %6836 = vmatprep.subr.bf16.mxu0 %v6835_v57 }
 0x49a   :  { %6838 = vmatpush3.bf16.msra.mxu0 %v6835_v57 }
 0x49b   :  { %6840 = vmatprep.subr.bf16.mxu0 %v6839_v58 }
 0x49d   :  { %6810 = vmatmul.mubr.msk.f32.vlgmr.msra.gmra.mrb[4].mxu0 %vm543_vm8, %v542_v59 }
 0x49e   :  { %6842 = vmatpush3.bf16.msra.mxu0 %v6839_v58  ;;  %6816 = vmatprep.mubr.msk.f32.mxu0 %vm543_vm8, %v541_v45 }
 0x49f   :  { %2295 = vmatprep.subr.bf16.mxu0 %v6961_v21  ;;  %v6919_v21 = vld [vmem:[#allocation2 + $0x6c] ss:$16 sps:$4 sm:$0xff]  }
 0x4a1   :  { %6817 = vmatmul.mubr.msk.f32.vlgmr.msra.gmra.mrb[6].mxu0 %vm543_vm8, %v542_v59 }
 0x4a2   :  { %2296 = vmatpush1.bf16.msra.mxu0 %v6959_v20  ;;  %v6914_v20 = vld [vmem:[#allocation2 + $0x48] ss:$16 sps:$4 sm:$0xff]  }
 0x570   :  { %v6811_v61 = vpop.f32.mrb[4].mxu0 }
 0x571   :  { %v616_v62 = vpop.f32.mrb[5].mxu0 }
 0x572   :  { %6821 = vmatprep.mubr.msk.f32.mxu1 %vm177_vm1, %v616_v62 }
 0x573   :  { %6822 = vmatmul.mubr.msk.f32.vlgmr.msra.gmra.mrb[2].mxu1 %vm177_vm1, %v6811_v61 }
 0x574   :  { %v6818_v63 = vpop.f32.mrb[6].mxu0  ;;  %6828 = vmatpush3.msra.mxu1 %v540_v60 }
 0x575   :  { %v691_v3 = vpop.f32.mrb[7].mxu0  ;;  %1122 = vmatprep.subr.bf16.mxu1 %v6893_v4 }
 0x576   :  { %6824 = vmatprep.mubr.msk.f32.mxu1 %vm177_vm1, %v691_v3 }
 0x577   :  { %6825 = vmatmul.mubr.msk.f32.gmra.mrb[4].mxu1 %vm177_vm1, %v6818_v63 }
 0x578   :  { %6829 = vmatprep.mubr.msk.f32.mxu1 %vm177_vm1, %v532_v53 }
 0x57b   :  { %6830 = vmatmul.mubr.msk.f32.vlgmr.msra.gmra.mrb[2].mxu1 %vm177_vm1, %v533_v54 }
 0x57c   :  { %6832 = vmatprep.mubr.msk.f32.mxu1 %vm177_vm1, %v538_v55  ;;  %1123 = vmatpush1.bf16.msra.mxu1 %v6891_v5 }
 0x57d   :  { %1124 = vmatprep.subr.bf16.mxu1 %v6896_v6 }
 0x57f   :  { %6833 = vmatmul.mubr.msk.f32.gmra.mrb[4].mxu1 %vm177_vm1, %v539_v56 }
 0x580   :  { %1125 = vmatpush1.bf16.msra.mxu1 %v6894_v7  ;;  %1154 = vmatprep.mubr.bf16.mxu1 %v8027_v19 }
 0x581   :  { %1126 = vmatprep.subr.bf16.mxu1 %v6899_v8 }
 0x584   :  { %1127 = vmatpush1.bf16.msra.mxu1 %v6897_v9 }
 0x585   :  { %1128 = vmatprep.subr.bf16.mxu1 %v6902_v10 }
 0x588   :  { %1129 = vmatpush1.bf16.msra.mxu1 %v6900_v11 }
 0x589   :  { %1130 = vmatprep.subr.bf16.mxu1 %v6905_v12 }
 0x58c   :  { %1131 = vmatpush1.bf16.msra.mxu1 %v6903_v13  ;;  %v6908_v13 = vld [vmem:[#allocation2 + $0x8] ss:$16 sps:$4 sm:$0xff]  }
 0x58d   :  { %6119 = vmatprep.subr.msk.bf16.mxu1 %vm317_vm5, %v6116_v15  ;;  %v6913_v15 = vld [vmem:[#allocation2 + $0x2c] ss:$16 sps:$4 sm:$0xff]  }
 0x590   :  { %1133 = vmatpush1.bf16.msra.mxu1 %v1111_v17  ;;  %v6911_v17 = vld [vmem:[#allocation2 + $0x28] ss:$16 sps:$4 sm:$0xff]  }
 0x591   :  { %1163 = vmatprep.subr.bf16.mxu1 %v6910_v18  ;;  %v6916_v18 = vld [vmem:[#allocation2 + $0x4c] ss:$16 sps:$4 sm:$0xff]  }
 0x64e   :  { %v6831_v23 = vpop.f32.mrb[2].mxu1 }
 0x64f   :  { %v903_v24 = vadd.f32 %v6831_v23, %v6094_v22  ;;  %v876_v25 = vpop.f32.mrb[3].mxu1  ;;  %v6922_v23 = vld [vmem:[#allocation2 + $0x8c] ss:$16 sps:$4 sm:$0xff]  }
 0x650   :  { %v902_v26 = vadd.f32 %v6094_v22, %v876_v25  ;;  %v6920_v25 = vld [vmem:[#allocation2 + $0x88] ss:$16 sps:$4 sm:$0xff]  }
 0x651   :  { %v907_v27 = vmax.f32 %v903_v24, 0.0  ;;  %v996_v24 = vld [vmem:[#allocation2 + $0xa8] sm:$0xff] }
 0x652   :  { %v906_v28 = vmax.f32 %v902_v26, 0.0  ;;  %v6834_v29 = vpop.f32.mrb[4].mxu1  ;;  %v6118_v26 = vcombine.high %v996_v24, %v996_v24 }
 0x653   :  { %v912_v30 = vsel %vm910_vm9, %v907_v27, 0.0  ;;  %v933_v31 = vsel %vm910_vm9, %v907_v27, -inf  ;;  %v905_v32 = vadd.f32 %v6834_v29, %v6094_v22  ;;  %v886_v33 = vpop.f32.mrb[5].mxu1  ;;  %v6117_v27 = vcombine.low %v996_v24, %v996_v24  ;;  %v6927_v29 = vld [vmem:[%s8747_s4 + $0x4] ss:$16 sps:$4 sm:$0xff]  }
 0x654   :  { %v911_v34 = vsel %vm910_vm9, %v906_v28, 0.0  ;;  %v932_v35 = vsel %vm910_vm9, %v906_v28, -inf  ;;  %v904_v36 = vadd.f32 %v6094_v22, %v886_v33  ;;  %v6917_v22 = vld [vmem:[#allocation2 + $0x68] ss:$16 sps:$4 sm:$0xff]   ;;  %v6933_v33 = vld [vmem:[%s8747_s4 + $0x44] ss:$16 sps:$4 sm:$0xff]  }
 0x655   :  { %v913_v37 = vadd.f32 %v912_v30, %v911_v34  ;;  %v934_v38 = vmax.f32 %v932_v35, %v933_v31  ;;  %v909_v39 = vmax.f32 %v905_v32, 0.0  ;;  %v1117_v28 = vsel %vm317_vm5, %v6117_v27, 0  ;;  %v6925_v30 = vld [vmem:[%s8747_s4] ss:$16 sps:$4 sm:$0xff]   ;;  %v6930_v31 = vld [vmem:[%s8747_s4 + $0x24] ss:$16 sps:$4 sm:$0xff]  }
 0x656   :  { %v908_v40 = vmax.f32 %v904_v36, 0.0  ;;  %v6928_v32 = vld [vmem:[%s8747_s4 + $0x20] ss:$16 sps:$4 sm:$0xff]   ;;  %v6936_v35 = vld [vmem:[%s8747_s4 + $0x64] ss:$16 sps:$4 sm:$0xff]  }
 0x657   :  { %v914_v41 = vrot.slane %v913_v37, 4  ;;  %v935_v42 = vrot.slane %v934_v38, 4  ;;  %v922_v43 = vsel %vm910_vm9, %v909_v39, 0.0  ;;  %v942_v44 = vsel %vm910_vm9, %v909_v39, -inf  ;;  %v6931_v34 = vld [vmem:[%s8747_s4 + $0x40] ss:$16 sps:$4 sm:$0xff]  }
 0x658   :  { %v921_v45 = vsel %vm910_vm9, %v908_v40, 0.0  ;;  %v941_v46 = vsel %vm910_vm9, %v908_v40, -inf  ;;  %v6934_v36 = vld [vmem:[%s8747_s4 + $0x60] ss:$16 sps:$4 sm:$0xff]   ;;  %v7006_v24 = vld [vmem:[#allocation5 + $0xec] ss:$16 sps:$4 sm:$0xff]  }
 0x659   :  { %v915_v47 = vadd.f32 %v914_v41, %v913_v37  ;;  %v936_v48 = vmax.f32 %v934_v38, %v935_v42  ;;  %v923_v49 = vadd.f32 %v922_v43, %v921_v45  ;;  %v943_v50 = vmax.f32 %v941_v46, %v942_v44  ;;  %v6939_v37 = vld [vmem:[%s8747_s4 + $0x84] ss:$16 sps:$4 sm:$0xff]   ;;  %v6937_v39 = vld [vmem:[%s8747_s4 + $0x80] ss:$16 sps:$4 sm:$0xff]   ;;  %v6944_v43 = vld [vmem:[%s8747_s4 + $0xc] ss:$16 sps:$4 sm:$0xff]  }
 0x65a   :  { %v972_v38 = vld [vmem:[%s8747_s4 + $0xa0] sm:$0xff]  ;;  %v6942_v44 = vld [vmem:[%s8747_s4 + $0x8] ss:$16 sps:$4 sm:$0xff]   ;;  %v6947_v46 = vld [vmem:[%s8747_s4 + $0x2c] ss:$16 sps:$4 sm:$0xff]  }
 0x65b   :  { %v916_v51 = vrot.slane %v915_v47, 2  ;;  %v937_v52 = vrot.slane %v936_v48, 2  ;;  %v924_v53 = vrot.slane %v923_v49, 4  ;;  %v944_v54 = vrot.slane %v943_v50, 4  ;;  %v7009_v27 = vld [vmem:[#allocation5 + $0x104] ss:$16 sps:$4 sm:$0xff]  }
 0x65c   :  { %v6144_v40 = vcombine.high %v972_v38, %v972_v38  ;;  %v6143_v41 = vcombine.low %v972_v38, %v972_v38  ;;  %v7022_v38 = vld [vmem:[#allocation5 + $0x148] ss:$16 sps:$4 sm:$0xff]  }
 0x65d   :  { %v917_v55 = vadd.f32 %v916_v51, %v915_v47  ;;  %v938_v56 = vmax.f32 %v936_v48, %v937_v52  ;;  %v925_v57 = vadd.f32 %v924_v53, %v923_v49  ;;  %v945_v58 = vmax.f32 %v943_v50, %v944_v54  ;;  %v6945_v47 = vld [vmem:[%s8747_s4 + $0x28] ss:$16 sps:$4 sm:$0xff]   ;;  %v6950_v48 = vld [vmem:[%s8747_s4 + $0x4c] ss:$16 sps:$4 sm:$0xff]  }
 0x65e   :  { %v1318_v42 = vsel %vm317_vm5, %v6143_v41, 0  ;;  %v6948_v49 = vld [vmem:[%s8747_s4 + $0x48] ss:$16 sps:$4 sm:$0xff]   ;;  %v6953_v50 = vld [vmem:[%s8747_s4 + $0x6c] ss:$16 sps:$4 sm:$0xff]  }
 0x65f   :  { %v918_v59 = vrot.slane %v917_v55, 1  ;;  %v926_v60 = vrot.slane %v925_v57, 2  ;;  %v946_v61 = vrot.slane %v945_v58, 2  ;;  %v939_v62 = vrot.slane %v938_v56, 1  ;;  %v6956_v51 = vld [vmem:[%s8747_s4 + $0x8c] ss:$16 sps:$4 sm:$0xff]  }
 0x660   :  { %v973_v52 = vld [vmem:[%s8747_s4 + $0xa8] sm:$0xff]  ;;  %v7025_v41 = vld [vmem:[#allocation5 + $0x160] ss:$16 sps:$4 sm:$0xff]  }
 0x661   :  { %v927_v63 = vadd.f32 %v926_v60, %v925_v57  ;;  %v947_v3 = vmax.f32 %v945_v58, %v946_v61  ;;  %v919_v4 = vadd.f32 %v918_v59, %v917_v55  ;;  %v940_v7 = vmax.f32 %v938_v56, %v939_v62  ;;  %v6954_v53 = vld [vmem:[%s8747_s4 + $0x88] ss:$16 sps:$4 sm:$0xff]   ;;  %v6964_v57 = vld [vmem:[#allocation5 + $0xc] ss:$16 sps:$4 sm:$0xff]   ;;  %v6967_v59 = vld [vmem:[#allocation5 + $0x24] ss:$16 sps:$4 sm:$0xff]  }
 0x662   :  { %v6146_v54 = vcombine.high %v973_v52, %v973_v52  ;;  %v6145_v55 = vcombine.low %v973_v52, %v973_v52  ;;  %v6962_v58 = vld [vmem:[#allocation5 + $0x8] ss:$16 sps:$4 sm:$0xff]   ;;  %v6970_v60 = vld [vmem:[#allocation5 + $0x2c] ss:$16 sps:$4 sm:$0xff]   ;;  %v6965_v61 = vld [vmem:[#allocation5 + $0x20] ss:$16 sps:$4 sm:$0xff]   ;;  %2297 = vmatprep.subr.bf16.mxu0 %v6967_v59 }
 0x663   :  { %v928_v5 = vrot.slane %v927_v63, 1  ;;  %v948_v6 = vrot.slane %v947_v3, 1  ;;  %v920_v10 = vmul.f32 0.0625, %v919_v4  ;;  %v6968_v62 = vld [vmem:[#allocation5 + $0x28] ss:$16 sps:$4 sm:$0xff]   ;;  %2298 = vmatpush1.bf16.msra.mxu0 %v6965_v61 }
 0x664   :  { %v1324_v56 = vsel %vm317_vm5, %v6145_v55, 0  ;;  %v6974_v4 = vld [vmem:[#allocation5 + $0x48] ss:$16 sps:$4 sm:$0xff]   ;;  %v7043_v52 = vld [vmem:[#allocation5 + $0x1c0] ss:$16 sps:$4 sm:$0xff]  }
 0x665   :  { %v929_v8 = vadd.f32 %v928_v5, %v927_v63  ;;  %v949_v9 = vmax.f32 %v947_v3, %v948_v6  ;;  %v6973_v63 = vld [vmem:[#allocation5 + $0x44] ss:$16 sps:$4 sm:$0xff]   ;;  %v6971_v3 = vld [vmem:[#allocation5 + $0x40] ss:$16 sps:$4 sm:$0xff]   ;;  %v6976_v5 = vld [vmem:[#allocation5 + $0x4c] ss:$16 sps:$4 sm:$0xff]  }
 0x666   :  { %2299 = vmatprep.subr.bf16.mxu0 %v6973_v63  ;;  %v6979_v6 = vld [vmem:[#allocation5 + $0x64] ss:$16 sps:$4 sm:$0xff]   ;;  %v7060_v59 = vld [vmem:[#allocation5 + $0x20c] ss:$16 sps:$4 sm:$0xff]  }
 0x667   :  { %v930_v11 = vmul.f32 0.0625, %v929_v8  ;;  %v950_v12 = vsel %vm217_vm2, %v940_v7, %v949_v9  ;;  %v6982_v7 = vld [vmem:[#allocation5 + $0x6c] ss:$16 sps:$4 sm:$0xff]   ;;  %2300 = vmatpush1.bf16.msra.mxu0 %v6971_v3  ;;  %v6977_v8 = vld [vmem:[#allocation5 + $0x60] ss:$16 sps:$4 sm:$0xff]  }
 0x668   :  { %v974_v14 = vpack.c.bf16 %v950_v12, %v950_v12  ;;  %v6980_v9 = vld [vmem:[#allocation5 + $0x68] ss:$16 sps:$4 sm:$0xff]   ;;  %2301 = vmatprep.subr.bf16.mxu0 %v6979_v6  ;;  %v6983_v12 = vld [vmem:[#allocation5 + $0x80] ss:$16 sps:$4 sm:$0xff]   ;;  %v7051_v55 = vld [vmem:[#allocation5 + $0x1e4] ss:$16 sps:$4 sm:$0xff]  }
 0x669   :  { %v931_v16 = vsel %vm217_vm2, %v920_v10, %v930_v11  ;;  %v6985_v10 = vld [vmem:[#allocation5 + $0x84] ss:$16 sps:$4 sm:$0xff]   ;;  %v6988_v11 = vld [vmem:[#allocation5 + $0x8c] ss:$16 sps:$4 sm:$0xff]  }
 0x66a   :  { %6120 = vmatmul.mubr.msk.bf16.vlgmr.msra.gmra.mrb[8].mxu1 %vm910_vm9, %v974_v14  ;;  %v951_v45 = vpack.c.bf16 %v931_v16, %v931_v16  ;;  %v6989_v16 = vld [vmem:[#allocation5 + $0xa0] ss:$16 sps:$4 sm:$0xff]  }
 0x66b   :  { %1164 = vmatpush1.bf16.msra.mxu1 %v6908_v13  ;;  %1195 = vmatprep.mubr.bf16.mxu1 %v8027_v19  ;;  %v6986_v13 = vld [vmem:[#allocation5 + $0x88] ss:$16 sps:$4 sm:$0xff]  }
 0x66c   :  { %1165 = vmatprep.subr.bf16.mxu1 %v6913_v15  ;;  %2302 = vmatpush1.bf16.msra.mxu0 %v6977_v8  ;;  %v6994_v15 = vld [vmem:[#allocation5 + $0xac] ss:$16 sps:$4 sm:$0xff]  }
 0x66d   :  { %2303 = vmatprep.subr.bf16.mxu0 %v6985_v10 }
 0x66f   :  { %1166 = vmatpush1.bf16.msra.mxu1 %v6911_v17  ;;  %v6992_v17 = vld [vmem:[#allocation5 + $0xa8] ss:$16 sps:$4 sm:$0xff]  }
 0x670   :  { %1167 = vmatprep.subr.bf16.mxu1 %v6916_v18  ;;  %2304 = vmatpush1.bf16.msra.mxu0 %v6983_v12  ;;  %v6997_v18 = vld [vmem:[#allocation5 + $0xc4] ss:$16 sps:$4 sm:$0xff]   ;;  %v8489_v12 = vld [vmem:[%s8701_s14] sm:$0xf] }
 0x673   :  { %1168 = vmatpush1.bf16.msra.mxu1 %v6914_v20  ;;  %v7000_v20 = vld [vmem:[#allocation5 + $0xcc] ss:$16 sps:$4 sm:$0xff]  }
 0x674   :  { %1169 = vmatprep.subr.bf16.mxu1 %v6919_v21  ;;  %v6995_v21 = vld [vmem:[#allocation5 + $0xc0] ss:$16 sps:$4 sm:$0xff]  }
 0x677   :  { %1170 = vmatpush1.bf16.msra.mxu1 %v6917_v22  ;;  %v6998_v22 = vld [vmem:[#allocation5 + $0xc8] ss:$16 sps:$4 sm:$0xff]  }
 0x678   :  { %1171 = vmatprep.subr.bf16.mxu1 %v6922_v23  ;;  %v7003_v23 = vld [vmem:[#allocation5 + $0xe4] ss:$16 sps:$4 sm:$0xff]  }
 0x67b   :  { %1172 = vmatpush1.bf16.msra.mxu1 %v6920_v25  ;;  %v7001_v25 = vld [vmem:[#allocation5 + $0xe0] ss:$16 sps:$4 sm:$0xff]  }
 0x67c   :  { %6121 = vmatprep.subr.msk.bf16.mxu1 %vm317_vm5, %v6118_v26  ;;  %v7004_v26 = vld [vmem:[#allocation5 + $0xe8] ss:$16 sps:$4 sm:$0xff]  }
 0x67f   :  { %1174 = vmatpush1.bf16.msra.mxu1 %v1117_v28  ;;  %v7007_v28 = vld [vmem:[#allocation5 + $0x100] ss:$16 sps:$4 sm:$0xff]  }
 0x680   :  { %1329 = vmatprep.subr.bf16.mxu1 %v6927_v29  ;;  %v7010_v29 = vld [vmem:[#allocation5 + $0x108] ss:$16 sps:$4 sm:$0xff]  }
 0x682   :  { %6122 = vmatmul.mubr.msk.bf16.vlgmr.msra.gmra.mrb[12].mxu1 %vm910_vm9, %v974_v14  ;;  %v6991_v14 = vld [vmem:[#allocation5 + $0xa4] ss:$16 sps:$4 sm:$0xff]  }
 0x683   :  { %1330 = vmatpush1.bf16.msra.mxu1 %v6925_v30  ;;  %1361 = vmatprep.mubr.bf16.mxu1 %v8027_v19  ;;  %v7012_v30 = vld [vmem:[#allocation5 + $0x10c] ss:$16 sps:$4 sm:$0xff]  }
 0x684   :  { %1331 = vmatprep.subr.bf16.mxu1 %v6930_v31  ;;  %2305 = vmatprep.subr.bf16.mxu0 %v6991_v14  ;;  %v7015_v31 = vld [vmem:[#allocation5 + $0x124] ss:$16 sps:$4 sm:$0xff]  }
 0x685   :  { %2306 = vmatpush1.bf16.msra.mxu0 %v6989_v16 }
 0x686   :  { %2307 = vmatprep.subr.bf16.mxu0 %v6997_v18  ;;  %v8494_v18 = vld [vmem:[%s8702_s15] sm:$0xf] }
 0x687   :  { %1332 = vmatpush1.bf16.msra.mxu1 %v6928_v32  ;;  %v7018_v32 = vld [vmem:[#allocation5 + $0x12c] ss:$16 sps:$4 sm:$0xff]  }
 0x688   :  { %1333 = vmatprep.subr.bf16.mxu1 %v6933_v33  ;;  %v7013_v33 = vld [vmem:[#allocation5 + $0x120] ss:$16 sps:$4 sm:$0xff]  }
 0x689   :  { %2308 = vmatpush1.bf16.msra.mxu0 %v6995_v21 }
 0x68a   :  { %2309 = vmatprep.subr.bf16.mxu0 %v7003_v23  ;;  %v1458_v23 = vrot.slane %v8489_v12, %v8329_v2 }
 0x68b   :  { %1334 = vmatpush1.bf16.msra.mxu1 %v6931_v34  ;;  %v7016_v34 = vld [vmem:[#allocation5 + $0x128] ss:$16 sps:$4 sm:$0xff]  }
 0x68c   :  { %1335 = vmatprep.subr.bf16.mxu1 %v6936_v35  ;;  %v7021_v35 = vld [vmem:[#allocation5 + $0x144] ss:$16 sps:$4 sm:$0xff]  }
 0x68d   :  { %2310 = vmatpush1.bf16.msra.mxu0 %v7001_v25  ;;  %v1480_v25 = vrot.slane %v8494_v18, %v8326_v1 }
 0x68e   :  { %2311 = vmatprep.subr.bf16.mxu0 %v7009_v27  ;;  %v1484_v27 = vrot.slane %v8494_v18, %v8329_v2 }
 0x68f   :  { %1336 = vmatpush1.bf16.msra.mxu1 %v6934_v36  ;;  %v7024_v36 = vld [vmem:[#allocation5 + $0x14c] ss:$16 sps:$4 sm:$0xff]  }
 0x690   :  { %1337 = vmatprep.subr.bf16.mxu1 %v6939_v37  ;;  %v7019_v37 = vld [vmem:[#allocation5 + $0x140] ss:$16 sps:$4 sm:$0xff]  }
 0x691   :  { %2312 = vmatpush1.bf16.msra.mxu0 %v7007_v28 }
 0x692   :  { %2313 = vmatprep.subr.bf16.mxu0 %v7015_v31 }
 0x693   :  { %1338 = vmatpush1.bf16.msra.mxu1 %v6937_v39  ;;  %v7027_v39 = vld [vmem:[#allocation5 + $0x164] ss:$16 sps:$4 sm:$0xff]  }
 0x694   :  { %6147 = vmatprep.subr.msk.bf16.mxu1 %vm317_vm5, %v6144_v40  ;;  %v7030_v40 = vld [vmem:[#allocation5 + $0x16c] ss:$16 sps:$4 sm:$0xff]  }
 0x695   :  { %2314 = vmatpush1.bf16.msra.mxu0 %v7013_v33 }
 0x696   :  { %2315 = vmatprep.subr.bf16.mxu0 %v7021_v35  ;;  %v7058_v35 = vld [vmem:[#allocation5 + $0x208] ss:$16 sps:$4 sm:$0xff]  }
 0x697   :  { %1340 = vmatpush1.bf16.msra.mxu1 %v1318_v42  ;;  %v7028_v42 = vld [vmem:[#allocation5 + $0x168] ss:$16 sps:$4 sm:$0xff]  }
 0x698   :  { %1370 = vmatprep.subr.bf16.mxu1 %v6944_v43  ;;  %v7033_v43 = vld [vmem:[#allocation5 + $0x184] ss:$16 sps:$4 sm:$0xff]  }
 0x699   :  { %2316 = vmatpush1.bf16.msra.mxu0 %v7019_v37  ;;  %v7063_v37 = vld [vmem:[#allocation5 + $0x224] ss:$16 sps:$4 sm:$0xff]  }
 0x69a   :  { %6148 = vmatmul.mubr.msk.bf16.vlgmr.msra.gmra.mrb[16].mxu1 %vm910_vm9, %v951_v45  ;;  %2317 = vmatprep.subr.bf16.mxu0 %v7027_v39  ;;  %v7061_v39 = vld [vmem:[#allocation5 + $0x220] ss:$16 sps:$4 sm:$0xff]  }
 0x69b   :  { %1371 = vmatpush1.bf16.msra.mxu1 %v6942_v44  ;;  %1402 = vmatprep.mubr.bf16.mxu1 %v8027_v19  ;;  %v6951_v19 = vld [vmem:[%s8747_s4 + $0x68] ss:$16 sps:$4 sm:$0xff]   ;;  %v7036_v44 = vld [vmem:[#allocation5 + $0x18c] ss:$16 sps:$4 sm:$0xff]  }
 0x69c   :  { %1372 = vmatprep.subr.bf16.mxu1 %v6947_v46  ;;  %v7034_v46 = vld [vmem:[#allocation5 + $0x188] ss:$16 sps:$4 sm:$0xff]  }
 0x69d   :  { %2318 = vmatpush1.bf16.msra.mxu0 %v7025_v41  ;;  %v7069_v41 = vld [vmem:[#allocation5 + $0x244] ss:$16 sps:$4 sm:$0xff]  }
 0x69e   :  { %2319 = vmatprep.subr.bf16.mxu0 %v7033_v43  ;;  %v8513_v43 = vsub.s32 2, %v8323_v0 }
 0x69f   :  { %1373 = vmatpush1.bf16.msra.mxu1 %v6945_v47  ;;  %v7039_v47 = vld [vmem:[#allocation5 + $0x1a4] ss:$16 sps:$4 sm:$0xff]  }
 0x6a0   :  { %1374 = vmatprep.subr.bf16.mxu1 %v6950_v48  ;;  %v7042_v48 = vld [vmem:[#allocation5 + $0x1ac] ss:$16 sps:$4 sm:$0xff]  }
 0x6a3   :  { %1375 = vmatpush1.bf16.msra.mxu1 %v6948_v49  ;;  %v7037_v49 = vld [vmem:[#allocation5 + $0x1a0] ss:$16 sps:$4 sm:$0xff]  }
 0x6a4   :  { %1376 = vmatprep.subr.bf16.mxu1 %v6953_v50  ;;  %v7040_v50 = vld [vmem:[#allocation5 + $0x1a8] ss:$16 sps:$4 sm:$0xff]  }
 0x6a7   :  { %1377 = vmatpush1.bf16.msra.mxu1 %v6951_v19  ;;  %v7045_v19 = vld [vmem:[#allocation5 + $0x1c4] ss:$16 sps:$4 sm:$0xff]  }
 0x6a8   :  { %1378 = vmatprep.subr.bf16.mxu1 %v6956_v51  ;;  %v7048_v51 = vld [vmem:[#allocation5 + $0x1cc] ss:$16 sps:$4 sm:$0xff]  }
 0x6ab   :  { %1379 = vmatpush1.bf16.msra.mxu1 %v6954_v53  ;;  %v7046_v53 = vld [vmem:[#allocation5 + $0x1c8] ss:$16 sps:$4 sm:$0xff]  }
 0x6ac   :  { %6149 = vmatprep.subr.msk.bf16.mxu1 %vm317_vm5, %v6146_v54  ;;  %v7049_v54 = vld [vmem:[#allocation5 + $0x1e0] ss:$16 sps:$4 sm:$0xff]  }
 0x6af   :  { %1381 = vmatpush1.bf16.msra.mxu1 %v1324_v56  ;;  %v7052_v56 = vld [vmem:[#allocation5 + $0x1e8] ss:$16 sps:$4 sm:$0xff]  }
 0x6b0   :  { %2377 = vmatprep.subr.bf16.mxu1 %v6964_v57  ;;  %v7054_v57 = vld [vmem:[#allocation5 + $0x1ec] ss:$16 sps:$4 sm:$0xff]  }
 0x6b2   :  { %6150 = vmatmul.mubr.msk.bf16.vlgmr.msra.gmra.mrb[20].mxu1 %vm910_vm9, %v951_v45  ;;  %v7031_v45 = vld [vmem:[#allocation5 + $0x180] ss:$16 sps:$4 sm:$0xff]  }
 0x6b3   :  { %2378 = vmatpush1.bf16.msra.mxu1 %v6962_v58  ;;  %2320 = vmatpush1.bf16.msra.mxu0 %v7031_v45  ;;  %v7057_v58 = vld [vmem:[#allocation5 + $0x204] ss:$16 sps:$4 sm:$0xff]   ;;  %v7067_v45 = vld [vmem:[#allocation5 + $0x240] ss:$16 sps:$4 sm:$0xff]  }
 0x6b4   :  { %2379 = vmatprep.subr.bf16.mxu1 %v6970_v60  ;;  %2321 = vmatprep.subr.bf16.mxu0 %v7039_v47  ;;  %v7075_v47 = vld [vmem:[#allocation5 + $0x264] ss:$16 sps:$4 sm:$0xff]  }
 0x6b7   :  { %2380 = vmatpush1.bf16.msra.mxu1 %v6968_v62  ;;  %2322 = vmatpush1.bf16.msra.mxu0 %v7037_v49 }
 0x6b8   :  { %2381 = vmatprep.subr.bf16.mxu1 %v6976_v5  ;;  %2323 = vmatprep.subr.bf16.mxu0 %v7045_v19 }
 0x6bb   :  { %2382 = vmatpush1.bf16.msra.mxu1 %v6974_v4  ;;  %2324 = vmatpush1.bf16.msra.mxu0 %v7043_v52  ;;  %v7073_v52 = vld [vmem:[#allocation5 + $0x260] ss:$16 sps:$4 sm:$0xff]  }
 0x6bc   :  { %2383 = vmatprep.subr.bf16.mxu1 %v6982_v7  ;;  %2325 = vmatprep.subr.bf16.mxu0 %v7051_v55  ;;  %v8480_v7 = vld [vmem:[%s8700_s13] sm:$0xf] }
 0x6bd   :  { %v1416_v8 = vrot.slane %v8480_v7, %v8326_v1  ;;  %v1420_v10 = vrot.slane %v8480_v7, %v8329_v2  ;;  %v1424_v49 = vrot.slane %v8480_v7, %v8513_v43 }
 0x6bf   :  { %2384 = vmatpush1.bf16.msra.mxu1 %v6980_v9  ;;  %2326 = vmatpush1.bf16.msra.mxu0 %v7049_v54 }
 0x6c0   :  { %2385 = vmatprep.subr.bf16.mxu1 %v6988_v11  ;;  %2336 = vmatprep.subr.bf16.mxu0 %v7057_v58 }
 0x6c3   :  { %2386 = vmatpush1.bf16.msra.mxu1 %v6986_v13 }
 0x6c4   :  { %2387 = vmatprep.subr.bf16.mxu1 %v6994_v15 }
 0x6c7   :  { %2388 = vmatpush1.bf16.msra.mxu1 %v6992_v17 }
 0x6c8   :  { %2389 = vmatprep.subr.bf16.mxu1 %v7000_v20  ;;  %v1454_v20 = vrot.slane %v8489_v12, %v8326_v1 }
 0x6cb   :  { %2390 = vmatpush1.bf16.msra.mxu1 %v6998_v22 }
 0x6cc   :  { %2391 = vmatprep.subr.bf16.mxu1 %v7006_v24 }
 0x6cf   :  { %2392 = vmatpush1.bf16.msra.mxu1 %v7004_v26 }
 0x6d0   :  { %2393 = vmatprep.subr.bf16.mxu1 %v7012_v30 }
 0x6d3   :  { %2394 = vmatpush1.bf16.msra.mxu1 %v7010_v29 }
 0x6d4   :  { %2395 = vmatprep.subr.bf16.mxu1 %v7018_v32 }
 0x6d7   :  { %2396 = vmatpush1.bf16.msra.mxu1 %v7016_v34  ;;  %v7055_v34 = vld [vmem:[#allocation5 + $0x200] ss:$16 sps:$4 sm:$0xff]  }
 0x6d8   :  { %2397 = vmatprep.subr.bf16.mxu1 %v7024_v36 }
 0x6db   :  { %2398 = vmatpush1.bf16.msra.mxu1 %v7022_v38  ;;  %v7066_v38 = vld [vmem:[#allocation5 + $0x22c] ss:$16 sps:$4 sm:$0xff]  }
 0x6dc   :  { %2399 = vmatprep.subr.bf16.mxu1 %v7030_v40  ;;  %v7064_v40 = vld [vmem:[#allocation5 + $0x228] ss:$16 sps:$4 sm:$0xff]  }
 0x6df   :  { %2400 = vmatpush1.bf16.msra.mxu1 %v7028_v42  ;;  %v7072_v42 = vld [vmem:[#allocation5 + $0x24c] ss:$16 sps:$4 sm:$0xff]  }
 0x6e0   :  { %2401 = vmatprep.subr.bf16.mxu1 %v7036_v44  ;;  %v8516_v44 = vsub.s32 3, %v8323_v0 }
 0x6e2   :  { %v1428_v19 = vrot.slane %v8480_v7, %v8516_v44  ;;  %v7090_v7 = vld [vmem:[#allocation5 + $0x2ac] ss:$16 sps:$4 sm:$0xff]  }
 0x6e3   :  { %2402 = vmatpush1.bf16.msra.mxu1 %v7034_v46  ;;  %v7070_v46 = vld [vmem:[#allocation5 + $0x248] ss:$16 sps:$4 sm:$0xff]  }
 0x6e4   :  { %2403 = vmatprep.subr.bf16.mxu1 %v7042_v48  ;;  %v7078_v48 = vld [vmem:[#allocation5 + $0x26c] ss:$16 sps:$4 sm:$0xff]  }
 0x6e7   :  { %2404 = vmatpush1.bf16.msra.mxu1 %v7040_v50 }
 0x6e8   :  { %2405 = vmatprep.subr.bf16.mxu1 %v7048_v51 }
 0x6eb   :  { %2406 = vmatpush1.bf16.msra.mxu1 %v7046_v53  ;;  %v7076_v53 = vld [vmem:[#allocation5 + $0x268] ss:$16 sps:$4 sm:$0xff]  }
 0x6ec   :  { %2407 = vmatprep.subr.bf16.mxu1 %v7054_v57  ;;  %v7084_v57 = vld [vmem:[#allocation5 + $0x28c] ss:$16 sps:$4 sm:$0xff]  }
 0x6ef   :  { %2408 = vmatpush1.bf16.msra.mxu1 %v7052_v56  ;;  %v7081_v56 = vld [vmem:[#allocation5 + $0x284] ss:$16 sps:$4 sm:$0xff]  }
 0x6f0   :  { %2418 = vmatprep.subr.bf16.mxu1 %v7060_v59 }
 0x73d   :  { %v1156_v60 = vpop.f32.mrb[8].mxu1 }
 0x73e   :  { %v1158_v61 = vpop.f32.mrb[9].mxu1 }
 0x73f   :  { %v1160_v62 = vpop.f32.mrb[10].mxu1 }
 0x740   :  { %v1161_v63 = vpop.f32.mrb[11].mxu1  ;;  %v7079_v62 = vld [vmem:[#allocation5 + $0x280] ss:$16 sps:$4 sm:$0xff]  }
 0x741   :  { %v7082_v63 = vld [vmem:[#allocation5 + $0x288] ss:$16 sps:$4 sm:$0xff]  }
 0x755   :  { %v1197_v3 = vpop.f32.mrb[12].mxu1 }
 0x756   :  { %v8475_v4 = vpop.f32.mrb[13].mxu1 }
 0x757   :  { %v1201_v5 = vpop.f32.mrb[14].mxu1 }
 0x758   :  { %v1202_v6 = vpop.f32.mrb[15].mxu1  ;;  %v7087_v5 = vld [vmem:[#allocation5 + $0x2a4] ss:$16 sps:$4 sm:$0xff]  }
 0x76d   :  { %v1363_v9 = vpop.f32.mrb[16].mxu1 }
 0x76e   :  { %v1364_v11 = vadd.f32 %v1363_v9, %v1156_v60  ;;  %v1365_v13 = vpop.f32.mrb[17].mxu1  ;;  %v1462_v60 = vrot.slane %v8489_v12, %v8513_v43 }
 0x76f   :  { %v1366_v14 = vadd.f32 %v1365_v13, %v1158_v61  ;;  %v1367_v15 = vpop.f32.mrb[18].mxu1 }
 0x770   :  { %v1433_v16 = vadd.f32 %v1416_v8, %v1364_v11  ;;  %v1368_v17 = vpop.f32.mrb[19].mxu1  ;;  %v1488_v8 = vrot.slane %v8494_v18, %v8513_v43  ;;  %v7088_v15 = vld [vmem:[#allocation5 + $0x2a8] ss:$16 sps:$4 sm:$0xff]  }
 0x771   :  { %v1434_v21 = vadd.f32 %v1420_v10, %v1366_v14  ;;  %v1492_v10 = vrot.slane %v8494_v18, %v8516_v44  ;;  %v7085_v14 = vld [vmem:[#allocation5 + $0x2a0] ss:$16 sps:$4 sm:$0xff]   ;;  %v7096_v17 = vld [vmem:[#allocation5 + $0x2cc] ss:$16 sps:$4 sm:$0xff]  }
 0x772   :  { %vm1437_vm10 = vcmp.gt.f32.partialorder %v1433_v16, 0.0  ;;  %v1441_v22 = vmul.f32 0.2, %v1433_v16 }
 0x773   :  { %vm1438_vm11 = vcmp.gt.f32.partialorder %v1434_v21, 0.0  ;;  %v1442_v24 = vmul.f32 0.2, %v1434_v21 }
 0x774   :  { %v1445_v26 = vsel %vm1437_vm10, %v1433_v16, %v1441_v22  ;;  %v7091_v22 = vld [vmem:[#allocation5 + $0x2c0] ss:$16 sps:$4 sm:$0xff]  }
 0x775   :  { %v1471_v28 = vmul.f32 %v1454_v20, %v1445_v26  ;;  %v1446_v29 = vsel %vm1438_vm11, %v1434_v21, %v1442_v24  ;;  %v7099_v24 = vld [vmem:[#allocation5 + $0x2e4] ss:$16 sps:$4 sm:$0xff]   ;;  %v7097_v26 = vld [vmem:[#allocation5 + $0x2e0] ss:$16 sps:$4 sm:$0xff]  }
 0x776   :  { %v1472_v30 = vmul.f32 %v1458_v23, %v1446_v29  ;;  %v7094_v23 = vld [vmem:[#allocation5 + $0x2c8] ss:$16 sps:$4 sm:$0xff]   ;;  %v7108_v29 = vld [vmem:[#allocation5 + $0x30c] ss:$16 sps:$4 sm:$0xff]  }
 0x777   :  { %v8504_v31 = vadd.f32 %v1480_v25, %v1471_v28  ;;  %v7102_v25 = vld [vmem:[#allocation5 + $0x2ec] ss:$16 sps:$4 sm:$0xff]   ;;  %v7105_v28 = vld [vmem:[#allocation5 + $0x304] ss:$16 sps:$4 sm:$0xff]  }
 0x778   :  { %v8506_v32 = vadd.f32 %v1484_v27, %v1472_v30  ;;  %v7100_v27 = vld [vmem:[#allocation5 + $0x2e8] ss:$16 sps:$4 sm:$0xff]   ;;  %v7103_v30 = vld [vmem:[#allocation5 + $0x300] ss:$16 sps:$4 sm:$0xff]  }
 0x779   :  { %v1501_v36 = vpack.c.bf16 %v8504_v31, %v8504_v31 }
 0x77a   :  { %v1502_v33 = vpack.c.bf16 %v8506_v32, %v8506_v32 }
 0x77c   :  { %2327 = vmatprep.mubr.bf16.mxu0 %v1502_v33  ;;  %2409 = vmatprep.mubr.bf16.mxu1 %v1502_v33  ;;  %v7106_v33 = vld [vmem:[#allocation5 + $0x308] ss:$16 sps:$4 sm:$0xff]  }
 0x77d   :  { %2328 = vmatmul.mubr.bf16.vlgmr.msra.gmra.mrb[8].mxu0 %v1501_v36  ;;  %2410 = vmatmul.mubr.bf16.vlgmr.msra.gmra.mrb[24].mxu1 %v1501_v36  ;;  %v7109_v36 = vld [vmem:[#allocation5 + $0x320] ss:$16 sps:$4 sm:$0xff]  }
 0x77e   :  { %2337 = vmatpush1.bf16.msra.mxu0 %v7055_v34  ;;  %2419 = vmatpush1.bf16.msra.mxu1 %v7058_v35  ;;  %v7111_v34 = vld [vmem:[#allocation5 + $0x324] ss:$16 sps:$4 sm:$0xff]   ;;  %v7114_v35 = vld [vmem:[#allocation5 + $0x32c] ss:$16 sps:$4 sm:$0xff]  }
 0x77f   :  { %2338 = vmatprep.subr.bf16.mxu0 %v7063_v37  ;;  %2420 = vmatprep.subr.bf16.mxu1 %v7066_v38  ;;  %v7112_v37 = vld [vmem:[#allocation5 + $0x328] ss:$16 sps:$4 sm:$0xff]   ;;  %v7117_v38 = vld [vmem:[#allocation5 + $0x344] ss:$16 sps:$4 sm:$0xff]  }
 0x782   :  { %2339 = vmatpush1.bf16.msra.mxu0 %v7061_v39  ;;  %2421 = vmatpush1.bf16.msra.mxu1 %v7064_v40  ;;  %v7120_v39 = vld [vmem:[#allocation5 + $0x34c] ss:$16 sps:$4 sm:$0xff]   ;;  %v7115_v40 = vld [vmem:[#allocation5 + $0x340] ss:$16 sps:$4 sm:$0xff]  }
 0x783   :  { %2340 = vmatprep.subr.bf16.mxu0 %v7069_v41  ;;  %2422 = vmatprep.subr.bf16.mxu1 %v7072_v42  ;;  %v7118_v41 = vld [vmem:[#allocation5 + $0x348] ss:$16 sps:$4 sm:$0xff]   ;;  %v7123_v42 = vld [vmem:[#allocation5 + $0x364] ss:$16 sps:$4 sm:$0xff]  }
 0x785   :  { %v1404_v50 = vpop.f32.mrb[20].mxu1 }
 0x786   :  { %v1405_v51 = vadd.f32 %v1404_v50, %v1197_v3  ;;  %2341 = vmatpush1.bf16.msra.mxu0 %v7067_v45  ;;  %2423 = vmatpush1.bf16.msra.mxu1 %v7070_v46  ;;  %v1406_v0 = vpop.f32.mrb[21].mxu1  ;;  %v7126_v45 = vld [vmem:[#allocation5 + $0x36c] ss:$16 sps:$4 sm:$0xff]   ;;  %v7121_v46 = vld [vmem:[#allocation5 + $0x360] ss:$16 sps:$4 sm:$0xff]  }
 0x787   :  { %v1407_v54 = vadd.f32 %v1406_v0, %v8475_v4  ;;  %v1408_v55 = vpop.f32.mrb[22].mxu1  ;;  %2342 = vmatprep.subr.bf16.mxu0 %v7075_v47  ;;  %2424 = vmatprep.subr.bf16.mxu1 %v7078_v48  ;;  %v1466_v4 = vrot.slane %v8489_v12, %v8516_v44  ;;  %v7093_v12 = vld [vmem:[#allocation5 + $0x2c4] ss:$16 sps:$4 sm:$0xff]   ;;  %v7124_v47 = vld [vmem:[#allocation5 + $0x368] ss:$16 sps:$4 sm:$0xff]  }
 0x788   :  { %v1435_v58 = vadd.f32 %v1424_v49, %v1405_v51  ;;  %v1409_v59 = vpop.f32.mrb[23].mxu1  ;;  %v7129_v48 = vld [vmem:[#allocation5 + $0x384] ss:$16 sps:$4 sm:$0xff]   ;;  %v7132_v49 = vld [vmem:[#allocation5 + $0x38c] ss:$16 sps:$4 sm:$0xff]  }
 0x789   :  { %v1436_v61 = vadd.f32 %v1428_v19, %v1407_v54  ;;  %v7127_v50 = vld [vmem:[#allocation5 + $0x380] ss:$16 sps:$4 sm:$0xff]   ;;  %v7130_v19 = vld [vmem:[#allocation5 + $0x388] ss:$16 sps:$4 sm:$0xff]   ;;  %v7135_v51 = vld [vmem:[#allocation5 + $0x3a4] ss:$16 sps:$4 sm:$0xff]  }
 0x78a   :  { %vm1439_vm12 = vcmp.gt.f32.partialorder %v1435_v58, 0.0  ;;  %v1443_v3 = vmul.f32 0.2, %v1435_v58  ;;  %2343 = vmatpush1.bf16.msra.mxu0 %v7073_v52  ;;  %2425 = vmatpush1.bf16.msra.mxu1 %v7076_v53  ;;  %v7138_v0 = vld [vmem:[#allocation5 + $0x3ac] ss:$16 sps:$4 sm:$0xff]  }
 0x78b   :  { %vm1440_vm13 = vcmp.gt.f32.partialorder %v1436_v61, 0.0  ;;  %v1444_v6 = vmul.f32 0.2, %v1436_v61  ;;  %2344 = vmatprep.subr.bf16.mxu0 %v7081_v56  ;;  %2426 = vmatprep.subr.bf16.mxu1 %v7084_v57  ;;  %v7133_v52 = vld [vmem:[#allocation5 + $0x3a0] ss:$16 sps:$4 sm:$0xff]  }
 0x78c   :  { %v1447_v9 = vsel %vm1439_vm12, %v1435_v58, %v1443_v3  ;;  %v7136_v53 = vld [vmem:[#allocation5 + $0x3a8] ss:$16 sps:$4 sm:$0xff]   ;;  %v7141_v54 = vld [vmem:[#allocation5 + $0x3c4] ss:$16 sps:$4 sm:$0xff]   ;;  %v7144_v55 = vld [vmem:[#allocation5 + $0x3cc] ss:$16 sps:$4 sm:$0xff]  }
 0x78d   :  { %v1473_v11 = vmul.f32 %v1462_v60, %v1447_v9  ;;  %v1448_v13 = vsel %vm1440_vm13, %v1436_v61, %v1444_v6  ;;  %v7139_v56 = vld [vmem:[#allocation5 + $0x3c0] ss:$16 sps:$4 sm:$0xff]   ;;  %v7142_v57 = vld [vmem:[#allocation5 + $0x3c8] ss:$16 sps:$4 sm:$0xff]   ;;  %v7147_v58 = vld [vmem:[#allocation5 + $0x3e4] ss:$16 sps:$4 sm:$0xff]  }
 0x78e   :  { %2345 = vmatpush1.bf16.msra.mxu0 %v7079_v62  ;;  %2427 = vmatpush1.bf16.msra.mxu1 %v7082_v63  ;;  %v1474_v16 = vmul.f32 %v1466_v4, %v1448_v13  ;;  %v7150_v59 = vld [vmem:[#allocation5 + $0x3ec] ss:$16 sps:$4 sm:$0xff]   ;;  %v7145_v60 = vld [vmem:[#allocation5 + $0x3e0] ss:$16 sps:$4 sm:$0xff]   ;;  %v7148_v61 = vld [vmem:[#allocation5 + $0x3e8] ss:$16 sps:$4 sm:$0xff]  }
 0x78f   :  { %2346 = vmatprep.subr.bf16.mxu0 %v7087_v5  ;;  %2428 = vmatprep.subr.bf16.mxu1 %v7090_v7  ;;  %v8531_v20 = vadd.f32 %v1488_v8, %v1473_v11  ;;  %v7153_v62 = vld [vmem:[#allocation7 + $0x4] ss:$16 sps:$4 sm:$0xff]   ;;  %v7151_v3 = vld [vmem:[#allocation7] ss:$16 sps:$4 sm:$0xff]  }
 0x790   :  { %v8533_v21 = vadd.f32 %v1492_v10, %v1474_v16  ;;  %v7156_v63 = vld [vmem:[#allocation7 + $0x204] ss:$16 sps:$4 sm:$0xff]   ;;  %v7154_v5 = vld [vmem:[#allocation7 + $0x200] ss:$16 sps:$4 sm:$0xff]  }
 0x791   :  { %v1503_v4 = vpack.c.bf16 %v8531_v20, %v8531_v20  ;;  %v7159_v6 = vld [vmem:[#allocation7 + $0x24] ss:$16 sps:$4 sm:$0xff]   ;;  %v7157_v8 = vld [vmem:[#allocation7 + $0x20] ss:$16 sps:$4 sm:$0xff]  }
 0x792   :  { %2347 = vmatpush1.bf16.msra.mxu0 %v7085_v14  ;;  %2429 = vmatpush1.bf16.msra.mxu1 %v7088_v15  ;;  %v1504_v18 = vpack.c.bf16 %v8533_v21, %v8533_v21  ;;  %v7162_v7 = vld [vmem:[#allocation7 + $0x224] ss:$16 sps:$4 sm:$0xff]   ;;  %v7160_v9 = vld [vmem:[#allocation7 + $0x220] ss:$16 sps:$4 sm:$0xff]  }
 0x793   :  { %2348 = vmatprep.subr.bf16.mxu0 %v7093_v12  ;;  %2430 = vmatprep.subr.bf16.mxu1 %v7096_v17  ;;  %v7165_v10 = vld [vmem:[#allocation7 + $0x44] ss:$16 sps:$4 sm:$0xff]   ;;  %v7163_v13 = vld [vmem:[#allocation7 + $0x40] ss:$16 sps:$4 sm:$0xff]  }
 0x794   :  { %2368 = vmatprep.mubr.bf16.mxu0 %v1504_v18  ;;  %2450 = vmatprep.mubr.bf16.mxu1 %v1504_v18  ;;  %v7168_v11 = vld [vmem:[#allocation7 + $0x244] ss:$16 sps:$4 sm:$0xff]   ;;  %v7166_v14 = vld [vmem:[#allocation7 + $0x240] ss:$16 sps:$4 sm:$0xff]  }
 0x795   :  { %v7171_v15 = vld [vmem:[#allocation7 + $0x64] ss:$16 sps:$4 sm:$0xff]   ;;  %v7169_v12 = vld [vmem:[#allocation7 + $0x60] ss:$16 sps:$4 sm:$0xff]  }
 0x796   :  { %2349 = vmatpush1.bf16.msra.mxu0 %v7091_v22  ;;  %2431 = vmatpush1.bf16.msra.mxu1 %v7094_v23  ;;  %v7174_v16 = vld [vmem:[#allocation7 + $0x264] ss:$16 sps:$4 sm:$0xff]   ;;  %v7172_v17 = vld [vmem:[#allocation7 + $0x260] ss:$16 sps:$4 sm:$0xff]  }
 0x797   :  { %2350 = vmatprep.subr.bf16.mxu0 %v7099_v24  ;;  %2432 = vmatprep.subr.bf16.mxu1 %v7102_v25  ;;  %v7177_v22 = vld [vmem:[#allocation7 + $0x84] ss:$16 sps:$4 sm:$0xff]   ;;  %v7175_v23 = vld [vmem:[#allocation7 + $0x80] ss:$16 sps:$4 sm:$0xff]  }
 0x798   :  { %v7180_v18 = vld [vmem:[#allocation7 + $0x284] ss:$16 sps:$4 sm:$0xff]   ;;  %v7178_v24 = vld [vmem:[#allocation7 + $0x280] ss:$16 sps:$4 sm:$0xff]  }
 0x799   :  { %v7183_v25 = vld [vmem:[#allocation7 + $0xa4] ss:$16 sps:$4 sm:$0xff]  }
 0x79a   :  { %2351 = vmatpush1.bf16.msra.mxu0 %v7097_v26  ;;  %2433 = vmatpush1.bf16.msra.mxu1 %v7100_v27  ;;  %v7186_v26 = vld [vmem:[#allocation7 + $0x2a4] ss:$16 sps:$4 sm:$0xff]   ;;  %v7181_v27 = vld [vmem:[#allocation7 + $0xa0] ss:$16 sps:$4 sm:$0xff]  }
 0x79b   :  { %2352 = vmatprep.subr.bf16.mxu0 %v7105_v28  ;;  %2434 = vmatprep.subr.bf16.mxu1 %v7108_v29  ;;  %v7184_v28 = vld [vmem:[#allocation7 + $0x2a0] ss:$16 sps:$4 sm:$0xff]   ;;  %v7189_v29 = vld [vmem:[#allocation7 + $0xc4] ss:$16 sps:$4 sm:$0xff]  }
 0x79e   :  { %2353 = vmatpush1.bf16.msra.mxu0 %v7103_v30  ;;  %2435 = vmatpush1.bf16.msra.mxu1 %v7106_v33  ;;  %v7192_v30 = vld [vmem:[#allocation7 + $0x2c4] ss:$16 sps:$4 sm:$0xff]   ;;  %v7187_v33 = vld [vmem:[#allocation7 + $0xc0] ss:$16 sps:$4 sm:$0xff]  }
 0x79f   :  { %2354 = vmatprep.subr.bf16.mxu0 %v7111_v34  ;;  %2436 = vmatprep.subr.bf16.mxu1 %v7114_v35  ;;  %v7190_v34 = vld [vmem:[#allocation7 + $0x2c0] ss:$16 sps:$4 sm:$0xff]   ;;  %v7195_v35 = vld [vmem:[#allocation7 + $0xe4] ss:$16 sps:$4 sm:$0xff]  }
 0x7a2   :  { %2355 = vmatpush1.bf16.msra.mxu0 %v7109_v36  ;;  %2437 = vmatpush1.bf16.msra.mxu1 %v7112_v37  ;;  %v7198_v36 = vld [vmem:[#allocation7 + $0x2e4] ss:$16 sps:$4 sm:$0xff]   ;;  %v7193_v37 = vld [vmem:[#allocation7 + $0xe0] ss:$16 sps:$4 sm:$0xff]  }
 0x7a3   :  { %2356 = vmatprep.subr.bf16.mxu0 %v7117_v38  ;;  %2438 = vmatprep.subr.bf16.mxu1 %v7120_v39  ;;  %v7196_v38 = vld [vmem:[#allocation7 + $0x2e0] ss:$16 sps:$4 sm:$0xff]   ;;  %v7201_v39 = vld [vmem:[#allocation7 + $0x104] ss:$16 sps:$4 sm:$0xff]  }
 0x7a6   :  { %2357 = vmatpush1.bf16.msra.mxu0 %v7115_v40  ;;  %2439 = vmatpush1.bf16.msra.mxu1 %v7118_v41  ;;  %v7204_v40 = vld [vmem:[#allocation7 + $0x304] ss:$16 sps:$4 sm:$0xff]   ;;  %v7199_v41 = vld [vmem:[#allocation7 + $0x100] ss:$16 sps:$4 sm:$0xff]  }
 0x7a7   :  { %2358 = vmatprep.subr.bf16.mxu0 %v7123_v42  ;;  %2440 = vmatprep.subr.bf16.mxu1 %v7126_v45  ;;  %v7202_v42 = vld [vmem:[#allocation7 + $0x300] ss:$16 sps:$4 sm:$0xff]   ;;  %v7207_v45 = vld [vmem:[#allocation7 + $0x124] ss:$16 sps:$4 sm:$0xff]  }
 0x7aa   :  { %2359 = vmatpush1.bf16.msra.mxu0 %v7121_v46  ;;  %2441 = vmatpush1.bf16.msra.mxu1 %v7124_v47  ;;  %v7210_v46 = vld [vmem:[#allocation7 + $0x324] ss:$16 sps:$4 sm:$0xff]   ;;  %v7205_v47 = vld [vmem:[#allocation7 + $0x120] ss:$16 sps:$4 sm:$0xff]  }
 0x7ab   :  { %2360 = vmatprep.subr.bf16.mxu0 %v7129_v48  ;;  %2442 = vmatprep.subr.bf16.mxu1 %v7132_v49  ;;  %v7208_v48 = vld [vmem:[#allocation7 + $0x320] ss:$16 sps:$4 sm:$0xff]   ;;  %v7213_v49 = vld [vmem:[#allocation7 + $0x144] ss:$16 sps:$4 sm:$0xff]  }
 0x7ae   :  { %2361 = vmatpush1.bf16.msra.mxu0 %v7127_v50  ;;  %2443 = vmatpush1.bf16.msra.mxu1 %v7130_v19  ;;  %v7216_v50 = vld [vmem:[#allocation7 + $0x344] ss:$16 sps:$4 sm:$0xff]   ;;  %v7211_v19 = vld [vmem:[#allocation7 + $0x140] ss:$16 sps:$4 sm:$0xff]  }
 0x7af   :  { %2362 = vmatprep.subr.bf16.mxu0 %v7135_v51  ;;  %2444 = vmatprep.subr.bf16.mxu1 %v7138_v0  ;;  %v7214_v51 = vld [vmem:[#allocation7 + $0x340] ss:$16 sps:$4 sm:$0xff]   ;;  %v7219_v0 = vld [vmem:[#allocation7 + $0x164] ss:$16 sps:$4 sm:$0xff]  }
 0x7b2   :  { %2363 = vmatpush1.bf16.msra.mxu0 %v7133_v52  ;;  %2445 = vmatpush1.bf16.msra.mxu1 %v7136_v53  ;;  %v7222_v52 = vld [vmem:[#allocation7 + $0x364] ss:$16 sps:$4 sm:$0xff]   ;;  %v7217_v53 = vld [vmem:[#allocation7 + $0x160] ss:$16 sps:$4 sm:$0xff]  }
 0x7b3   :  { %2364 = vmatprep.subr.bf16.mxu0 %v7141_v54  ;;  %2446 = vmatprep.subr.bf16.mxu1 %v7144_v55  ;;  %v7220_v54 = vld [vmem:[#allocation7 + $0x360] ss:$16 sps:$4 sm:$0xff]   ;;  %v7225_v55 = vld [vmem:[#allocation7 + $0x184] ss:$16 sps:$4 sm:$0xff]  }
 0x7b6   :  { %2365 = vmatpush1.bf16.msra.mxu0 %v7139_v56  ;;  %2447 = vmatpush1.bf16.msra.mxu1 %v7142_v57  ;;  %v7228_v56 = vld [vmem:[#allocation7 + $0x384] ss:$16 sps:$4 sm:$0xff]   ;;  %v7223_v57 = vld [vmem:[#allocation7 + $0x180] ss:$16 sps:$4 sm:$0xff]  }
 0x7b7   :  { %2366 = vmatprep.subr.bf16.mxu0 %v7147_v58  ;;  %2448 = vmatprep.subr.bf16.mxu1 %v7150_v59  ;;  %v7226_v58 = vld [vmem:[#allocation7 + $0x380] ss:$16 sps:$4 sm:$0xff]   ;;  %v7231_v59 = vld [vmem:[#allocation7 + $0x1a4] ss:$16 sps:$4 sm:$0xff]  }
 0x7ba   :  { %2367 = vmatpush1.bf16.msra.mxu0 %v7145_v60  ;;  %2449 = vmatpush1.bf16.msra.mxu1 %v7148_v61  ;;  %v7234_v60 = vld [vmem:[#allocation7 + $0x3a4] ss:$16 sps:$4 sm:$0xff]   ;;  %v7229_v61 = vld [vmem:[#allocation7 + $0x1a0] ss:$16 sps:$4 sm:$0xff]  }
 0x7bb   :  { %3265 = vmatprep.subr.bf16.mxu0 %v7153_v62  ;;  %3306 = vmatprep.subr.bf16.mxu1 %v7156_v63  ;;  %v7232_v62 = vld [vmem:[#allocation7 + $0x3a0] ss:$16 sps:$4 sm:$0xff]   ;;  %v7237_v63 = vld [vmem:[#allocation7 + $0x1c4] ss:$16 sps:$4 sm:$0xff]  }
 0x7bd   :  { %2369 = vmatmul.mubr.bf16.vlgmr.msra.gmra.mrb[8].mxu0 %v1503_v4  ;;  %2451 = vmatmul.mubr.bf16.vlgmr.msra.gmra.mrb[24].mxu1 %v1503_v4  ;;  %v7238_v4 = vld [vmem:[#allocation7 + $0x3c0] ss:$16 sps:$4 sm:$0xff]  }
 0x7be   :  { %3266 = vmatpush1.bf16.msra.mxu0 %v7151_v3  ;;  %3307 = vmatpush1.bf16.msra.mxu1 %v7154_v5  ;;  %v7240_v3 = vld [vmem:[#allocation7 + $0x3c4] ss:$16 sps:$4 sm:$0xff]   ;;  %v7235_v5 = vld [vmem:[#allocation7 + $0x1c0] ss:$16 sps:$4 sm:$0xff]  }
 0x7bf   :  { %3267 = vmatprep.subr.bf16.mxu0 %v7159_v6  ;;  %3308 = vmatprep.subr.bf16.mxu1 %v7162_v7  ;;  %v7243_v6 = vld [vmem:[#allocation7 + $0x1e4] ss:$16 sps:$4 sm:$0xff]  }
 0x7c0   :  { %v7246_v7 = vld [vmem:[#allocation7 + $0x3e4] ss:$16 sps:$4 sm:$0xff]  }
 0x7c2   :  { %3268 = vmatpush1.bf16.msra.mxu0 %v7157_v8  ;;  %3309 = vmatpush1.bf16.msra.mxu1 %v7160_v9  ;;  %v7241_v8 = vld [vmem:[#allocation7 + $0x1e0] ss:$16 sps:$4 sm:$0xff]  }
 0x7c3   :  { %3269 = vmatprep.subr.bf16.mxu0 %v7165_v10  ;;  %3310 = vmatprep.subr.bf16.mxu1 %v7168_v11  ;;  %v7244_v9 = vld [vmem:[#allocation7 + $0x3e0] ss:$16 sps:$4 sm:$0xff]   ;;  %v7249_v10 = vld [vmem:[#allocation7 + $0xc] ss:$16 sps:$4 sm:$0xff]  }
 0x7c4   :  { %v7252_v11 = vld [vmem:[#allocation7 + $0x20c] ss:$16 sps:$4 sm:$0xff]  }
 0x7c6   :  { %3270 = vmatpush1.bf16.msra.mxu0 %v7163_v13  ;;  %3311 = vmatpush1.bf16.msra.mxu1 %v7166_v14  ;;  %v1633_v13 = vld [vmem:[%s8704_s17] sm:$0xf] }
 0x7c7   :  { %3271 = vmatprep.subr.bf16.mxu0 %v7171_v15  ;;  %3312 = vmatprep.subr.bf16.mxu1 %v7174_v16  ;;  %v1638_v14 = vrot.slane %v1633_v13, %v8326_v1  ;;  %v1646_v15 = vrot.slane %v1633_v13, %v8513_v43  ;;  %v1642_v16 = vrot.slane %v1633_v13, %v8329_v2 }
 0x7ca   :  { %3272 = vmatpush1.bf16.msra.mxu0 %v7169_v12  ;;  %3313 = vmatpush1.bf16.msra.mxu1 %v7172_v17  ;;  %v1650_v12 = vrot.slane %v1633_v13, %v8516_v44  ;;  %v7294_v13 = vld [vmem:[#allocation7 + $0x2ec] ss:$16 sps:$4 sm:$0xff]  }
 0x7cb   :  { %3273 = vmatprep.subr.bf16.mxu0 %v7177_v22  ;;  %3314 = vmatprep.subr.bf16.mxu1 %v7180_v18 }
 0x7ce   :  { %3274 = vmatpush1.bf16.msra.mxu0 %v7175_v23  ;;  %3315 = vmatpush1.bf16.msra.mxu1 %v7178_v24 }
 0x7cf   :  { %3275 = vmatprep.subr.bf16.mxu0 %v7183_v25  ;;  %3316 = vmatprep.subr.bf16.mxu1 %v7186_v26 }
 0x7d2   :  { %3276 = vmatpush1.bf16.msra.mxu0 %v7181_v27  ;;  %3317 = vmatpush1.bf16.msra.mxu1 %v7184_v28 }
 0x7d3   :  { %3277 = vmatprep.subr.bf16.mxu0 %v7189_v29  ;;  %3318 = vmatprep.subr.bf16.mxu1 %v7192_v30 }
 0x7d6   :  { %3278 = vmatpush1.bf16.msra.mxu0 %v7187_v33  ;;  %3319 = vmatpush1.bf16.msra.mxu1 %v7190_v34 }
 0x7d7   :  { %3279 = vmatprep.subr.bf16.mxu0 %v7195_v35  ;;  %3320 = vmatprep.subr.bf16.mxu1 %v7198_v36 }
 0x7da   :  { %3280 = vmatpush1.bf16.msra.mxu0 %v7193_v37  ;;  %3321 = vmatpush1.bf16.msra.mxu1 %v7196_v38 }
 0x7db   :  { %3281 = vmatprep.subr.bf16.mxu0 %v7201_v39  ;;  %3322 = vmatprep.subr.bf16.mxu1 %v7204_v40 }
 0x7de   :  { %3282 = vmatpush1.bf16.msra.mxu0 %v7199_v41  ;;  %3323 = vmatpush1.bf16.msra.mxu1 %v7202_v42 }
 0x7df   :  { %3283 = vmatprep.subr.bf16.mxu0 %v7207_v45  ;;  %3324 = vmatprep.subr.bf16.mxu1 %v7210_v46  ;;  %v7247_v46 = vld [vmem:[#allocation7 + $0x8] ss:$16 sps:$4 sm:$0xff]  }
 0x7e2   :  { %3284 = vmatpush1.bf16.msra.mxu0 %v7205_v47  ;;  %3325 = vmatpush1.bf16.msra.mxu1 %v7208_v48  ;;  %v7250_v47 = vld [vmem:[#allocation7 + $0x208] ss:$16 sps:$4 sm:$0xff]  }
 0x7e3   :  { %3285 = vmatprep.subr.bf16.mxu0 %v7213_v49  ;;  %3326 = vmatprep.subr.bf16.mxu1 %v7216_v50  ;;  %v7255_v50 = vld [vmem:[#allocation7 + $0x2c] ss:$16 sps:$4 sm:$0xff]  }
 0x7e6   :  { %3286 = vmatpush1.bf16.msra.mxu0 %v7211_v19  ;;  %3327 = vmatpush1.bf16.msra.mxu1 %v7214_v51  ;;  %v7258_v19 = vld [vmem:[#allocation7 + $0x22c] ss:$16 sps:$4 sm:$0xff]   ;;  %v7253_v51 = vld [vmem:[#allocation7 + $0x28] ss:$16 sps:$4 sm:$0xff]  }
 0x7e7   :  { %3287 = vmatprep.subr.bf16.mxu0 %v7219_v0  ;;  %3328 = vmatprep.subr.bf16.mxu1 %v7222_v52  ;;  %v7256_v0 = vld [vmem:[#allocation7 + $0x228] ss:$16 sps:$4 sm:$0xff]   ;;  %v7261_v52 = vld [vmem:[#allocation7 + $0x4c] ss:$16 sps:$4 sm:$0xff]  }
 0x7ea   :  { %3288 = vmatpush1.bf16.msra.mxu0 %v7217_v53  ;;  %3329 = vmatpush1.bf16.msra.mxu1 %v7220_v54  ;;  %v7264_v53 = vld [vmem:[#allocation7 + $0x24c] ss:$16 sps:$4 sm:$0xff]   ;;  %v7259_v54 = vld [vmem:[#allocation7 + $0x48] ss:$16 sps:$4 sm:$0xff]  }
 0x7eb   :  { %3289 = vmatprep.subr.bf16.mxu0 %v7225_v55  ;;  %3330 = vmatprep.subr.bf16.mxu1 %v7228_v56  ;;  %v7262_v55 = vld [vmem:[#allocation7 + $0x248] ss:$16 sps:$4 sm:$0xff]   ;;  %v7267_v56 = vld [vmem:[#allocation7 + $0x6c] ss:$16 sps:$4 sm:$0xff]  }
 0x7ee   :  { %3290 = vmatpush1.bf16.msra.mxu0 %v7223_v57  ;;  %3331 = vmatpush1.bf16.msra.mxu1 %v7226_v58  ;;  %v7270_v57 = vld [vmem:[#allocation7 + $0x26c] ss:$16 sps:$4 sm:$0xff]   ;;  %v7265_v58 = vld [vmem:[#allocation7 + $0x68] ss:$16 sps:$4 sm:$0xff]  }
 0x7ef   :  { %3291 = vmatprep.subr.bf16.mxu0 %v7231_v59  ;;  %3332 = vmatprep.subr.bf16.mxu1 %v7234_v60  ;;  %v7268_v59 = vld [vmem:[#allocation7 + $0x268] ss:$16 sps:$4 sm:$0xff]   ;;  %v7273_v60 = vld [vmem:[#allocation7 + $0x8c] ss:$16 sps:$4 sm:$0xff]  }
 0x7f2   :  { %3292 = vmatpush1.bf16.msra.mxu0 %v7229_v61  ;;  %3333 = vmatpush1.bf16.msra.mxu1 %v7232_v62  ;;  %v7276_v61 = vld [vmem:[#allocation7 + $0x28c] ss:$16 sps:$4 sm:$0xff]   ;;  %v7271_v62 = vld [vmem:[#allocation7 + $0x88] ss:$16 sps:$4 sm:$0xff]  }
 0x7f3   :  { %3293 = vmatprep.subr.bf16.mxu0 %v7237_v63  ;;  %3334 = vmatprep.subr.bf16.mxu1 %v7240_v3  ;;  %v7274_v63 = vld [vmem:[#allocation7 + $0x288] ss:$16 sps:$4 sm:$0xff]   ;;  %v7279_v3 = vld [vmem:[#allocation7 + $0xac] ss:$16 sps:$4 sm:$0xff]  }
 0x7f6   :  { %3294 = vmatpush1.bf16.msra.mxu0 %v7235_v5  ;;  %3335 = vmatpush1.bf16.msra.mxu1 %v7238_v4  ;;  %v7282_v5 = vld [vmem:[#allocation7 + $0x2ac] ss:$16 sps:$4 sm:$0xff]   ;;  %v7277_v4 = vld [vmem:[#allocation7 + $0xa8] ss:$16 sps:$4 sm:$0xff]  }
 0x7f7   :  { %3295 = vmatprep.subr.bf16.mxu0 %v7243_v6  ;;  %3336 = vmatprep.subr.bf16.mxu1 %v7246_v7  ;;  %v7280_v6 = vld [vmem:[#allocation7 + $0x2a8] ss:$16 sps:$4 sm:$0xff]   ;;  %v7285_v7 = vld [vmem:[#allocation7 + $0xcc] ss:$16 sps:$4 sm:$0xff]  }
 0x7fa   :  { %3296 = vmatpush1.bf16.msra.mxu0 %v7241_v8  ;;  %3337 = vmatpush1.bf16.msra.mxu1 %v7244_v9  ;;  %v7288_v8 = vld [vmem:[#allocation7 + $0x2cc] ss:$16 sps:$4 sm:$0xff]   ;;  %v7283_v9 = vld [vmem:[#allocation7 + $0xc8] ss:$16 sps:$4 sm:$0xff]  }
 0x7fb   :  { %3347 = vmatprep.subr.bf16.mxu0 %v7249_v10  ;;  %3388 = vmatprep.subr.bf16.mxu1 %v7252_v11  ;;  %v7286_v10 = vld [vmem:[#allocation7 + $0x2c8] ss:$16 sps:$4 sm:$0xff]   ;;  %v7291_v11 = vld [vmem:[#allocation7 + $0xec] ss:$16 sps:$4 sm:$0xff]  }
 0x890   :  { %v2370_v17 = vpop.f32.mrb[8].mxu0  ;;  %v2452_v22 = vpop.f32.mrb[24].mxu1 }
 0x891   :  { %v6843_v18 = vadd.f32 %v2370_v17, %v1638_v14  ;;  %v6845_v23 = vadd.f32 %v2452_v22, %v1646_v15  ;;  %v2372_v24 = vpop.f32.mrb[9].mxu0  ;;  %v2454_v25 = vpop.f32.mrb[25].mxu1  ;;  %v7289_v14 = vld [vmem:[#allocation7 + $0xe8] ss:$16 sps:$4 sm:$0xff]  }
 0x892   :  { %v6844_v26 = vadd.f32 %v2372_v24, %v1642_v16  ;;  %v6846_v27 = vadd.f32 %v2454_v25, %v1650_v12  ;;  %v2374_v28 = vpop.f32.mrb[10].mxu0  ;;  %v2456_v29 = vpop.f32.mrb[26].mxu1  ;;  %v7292_v15 = vld [vmem:[#allocation7 + $0x2e8] ss:$16 sps:$4 sm:$0xff]   ;;  %v7297_v16 = vld [vmem:[#allocation7 + $0x10c] ss:$16 sps:$4 sm:$0xff]  }
 0x893   :  { %vm2459_vm14 = vcmp.gt.f32.partialorder %v6843_v18, 0.0  ;;  %v2463_v30 = vmul.f32 0.2, %v6843_v18  ;;  %vm2461_vm15 = vcmp.gt.f32.partialorder %v6845_v23, 0.0  ;;  %v2465_v33 = vmul.f32 0.2, %v6845_v23 }
 0x894   :  { %vm2460_vm0 = vcmp.gt.f32.partialorder %v6844_v26, 0.0  ;;  %v2464_v34 = vmul.f32 0.2, %v6844_v26  ;;  %vm2462_vm1 = vcmp.gt.f32.partialorder %v6846_v27, 0.0  ;;  %v2466_v35 = vmul.f32 0.2, %v6846_v27 }
 0x895   :  { %v2467_v36 = vsel %vm2459_vm14, %v6843_v18, %v2463_v30  ;;  %v2469_v37 = vsel %vm2461_vm15, %v6845_v23, %v2465_v33  ;;  %v2375_v38 = vpop.f32.mrb[11].mxu0  ;;  %v2457_v39 = vpop.f32.mrb[27].mxu1  ;;  %v7300_v12 = vld [vmem:[#allocation7 + $0x30c] ss:$16 sps:$4 sm:$0xff]   ;;  %v7295_v17 = vld [vmem:[#allocation7 + $0x108] ss:$16 sps:$4 sm:$0xff]  }
 0x896   :  { %v2468_v40 = vsel %vm2460_vm0, %v6844_v26, %v2464_v34  ;;  %v2470_v41 = vsel %vm2462_vm1, %v6846_v27, %v2466_v35  ;;  %v8546_v48 = vpack.c.bf16 %v2467_v36, %v2467_v36  ;;  %v8548_v49 = vpack.c.bf16 %v2469_v37, %v2469_v37  ;;  %v7298_v22 = vld [vmem:[#allocation7 + $0x308] ss:$16 sps:$4 sm:$0xff]   ;;  %v7303_v18 = vld [vmem:[#allocation7 + $0x12c] ss:$16 sps:$4 sm:$0xff]  }
 0x897   :  { %v2472_v42 = vpack.c.bf16 %v2468_v40, %v2468_v40  ;;  %v2474_v45 = vpack.c.bf16 %v2470_v41, %v2470_v41  ;;  %v7306_v23 = vld [vmem:[#allocation7 + $0x32c] ss:$16 sps:$4 sm:$0xff]   ;;  %v7301_v24 = vld [vmem:[#allocation7 + $0x128] ss:$16 sps:$4 sm:$0xff]   ;;  %vm6054_vm0 = vcmask 17408  }
 0x898   :  { %v7304_v25 = vld [vmem:[#allocation7 + $0x328] ss:$16 sps:$4 sm:$0xff]   ;;  %v7309_v26 = vld [vmem:[#allocation7 + $0x14c] ss:$16 sps:$4 sm:$0xff]  }
 0x899   :  { %3297 = vmatprep.mubr.bf16.mxu0 %v2472_v42  ;;  %3338 = vmatprep.mubr.bf16.mxu1 %v2474_v45  ;;  %v7312_v27 = vld [vmem:[#allocation7 + $0x34c] ss:$16 sps:$4 sm:$0xff]   ;;  %v7307_v28 = vld [vmem:[#allocation7 + $0x148] ss:$16 sps:$4 sm:$0xff]  }
 0x89a   :  { %3298 = vmatmul.mubr.bf16.vlgmr.msra.gmra.mrb[12].mxu0 %v8546_v48  ;;  %3339 = vmatmul.mubr.bf16.vlgmr.msra.gmra.mrb[28].mxu1 %v8548_v49  ;;  %v7310_v29 = vld [vmem:[#allocation7 + $0x348] ss:$16 sps:$4 sm:$0xff]   ;;  %v7315_v30 = vld [vmem:[#allocation7 + $0x16c] ss:$16 sps:$4 sm:$0xff]  }
 0x89b   :  { %3348 = vmatpush1.bf16.msra.mxu0 %v7247_v46  ;;  %3389 = vmatpush1.bf16.msra.mxu1 %v7250_v47  ;;  %v7318_v33 = vld [vmem:[#allocation7 + $0x36c] ss:$16 sps:$4 sm:$0xff]   ;;  %v7313_v34 = vld [vmem:[#allocation7 + $0x168] ss:$16 sps:$4 sm:$0xff]  }
 0x89c   :  { %3379 = vmatprep.mubr.bf16.mxu0 %v2472_v42  ;;  %3420 = vmatprep.mubr.bf16.mxu1 %v2474_v45  ;;  %v7316_v35 = vld [vmem:[#allocation7 + $0x368] ss:$16 sps:$4 sm:$0xff]   ;;  %v7321_v36 = vld [vmem:[#allocation7 + $0x18c] ss:$16 sps:$4 sm:$0xff]  }
 0x89d   :  { %3349 = vmatprep.subr.bf16.mxu0 %v7255_v50  ;;  %3390 = vmatprep.subr.bf16.mxu1 %v7258_v19  ;;  %v7324_v37 = vld [vmem:[#allocation7 + $0x38c] ss:$16 sps:$4 sm:$0xff]   ;;  %v7319_v38 = vld [vmem:[#allocation7 + $0x188] ss:$16 sps:$4 sm:$0xff]  }
 0x89e   :  { %v7322_v39 = vld [vmem:[#allocation7 + $0x388] ss:$16 sps:$4 sm:$0xff]   ;;  %v7327_v40 = vld [vmem:[#allocation7 + $0x1ac] ss:$16 sps:$4 sm:$0xff]  }
 0x89f   :  { %3350 = vmatpush1.bf16.msra.mxu0 %v7253_v51  ;;  %3391 = vmatpush1.bf16.msra.mxu1 %v7256_v0  ;;  %v7330_v41 = vld [vmem:[#allocation7 + $0x3ac] ss:$16 sps:$4 sm:$0xff]   ;;  %v7325_v42 = vld [vmem:[#allocation7 + $0x1a8] ss:$16 sps:$4 sm:$0xff]  }
 0x8a0   :  { %3351 = vmatprep.subr.bf16.mxu0 %v7261_v52  ;;  %3392 = vmatprep.subr.bf16.mxu1 %v7264_v53  ;;  %v7328_v45 = vld [vmem:[#allocation7 + $0x3a8] ss:$16 sps:$4 sm:$0xff]   ;;  %v7333_v46 = vld [vmem:[#allocation7 + $0x1cc] ss:$16 sps:$4 sm:$0xff]  }
 0x8a1   :  { %v7336_v47 = vld [vmem:[#allocation7 + $0x3cc] ss:$16 sps:$4 sm:$0xff]   ;;  %v7331_v50 = vld [vmem:[#allocation7 + $0x1c8] ss:$16 sps:$4 sm:$0xff]  }
 0x8a2   :  { %v7334_v19 = vld [vmem:[#allocation7 + $0x3c8] ss:$16 sps:$4 sm:$0xff]   ;;  %v7339_v51 = vld [vmem:[#allocation7 + $0x1ec] ss:$16 sps:$4 sm:$0xff]  }
 0x8a3   :  { %3352 = vmatpush1.bf16.msra.mxu0 %v7259_v54  ;;  %3393 = vmatpush1.bf16.msra.mxu1 %v7262_v55  ;;  %v7342_v0 = vld [vmem:[#allocation7 + $0x3ec] ss:$16 sps:$4 sm:$0xff]   ;;  %v7337_v52 = vld [vmem:[#allocation7 + $0x1e8] ss:$16 sps:$4 sm:$0xff]   ;;  %v7345_v54 = vld [vmem:[#allocation8 + $0x4] ss:$16 sps:$4 sm:$0xff]  }
 0x8a4   :  { %3353 = vmatprep.subr.bf16.mxu0 %v7267_v56  ;;  %3394 = vmatprep.subr.bf16.mxu1 %v7270_v57  ;;  %v7340_v53 = vld [vmem:[#allocation7 + $0x3e8] ss:$16 sps:$4 sm:$0xff]   ;;  %v7348_v55 = vld [vmem:[#allocation8 + $0xc] ss:$16 sps:$4 sm:$0xff]   ;;  %v7343_v56 = vld [vmem:[#allocation8] ss:$16 sps:$4 sm:$0xff]  }
 0x8a5   :  { %v7346_v57 = vld [vmem:[#allocation8 + $0x8] ss:$16 sps:$4 sm:$0xff]  }
 0x8a7   :  { %3354 = vmatpush1.bf16.msra.mxu0 %v7265_v58  ;;  %3395 = vmatpush1.bf16.msra.mxu1 %v7268_v59  ;;  %v7351_v58 = vld [vmem:[#allocation8 + $0x24] ss:$16 sps:$4 sm:$0xff]   ;;  %v7354_v59 = vld [vmem:[#allocation8 + $0x2c] ss:$16 sps:$4 sm:$0xff]  }
 0x8a8   :  { %3355 = vmatprep.subr.bf16.mxu0 %v7273_v60  ;;  %3396 = vmatprep.subr.bf16.mxu1 %v7276_v61  ;;  %v7349_v60 = vld [vmem:[#allocation8 + $0x20] ss:$16 sps:$4 sm:$0xff]   ;;  %v7352_v61 = vld [vmem:[#allocation8 + $0x28] ss:$16 sps:$4 sm:$0xff]  }
 0x8ab   :  { %3356 = vmatpush1.bf16.msra.mxu0 %v7271_v62  ;;  %3397 = vmatpush1.bf16.msra.mxu1 %v7274_v63  ;;  %v7357_v62 = vld [vmem:[#allocation8 + $0x44] ss:$16 sps:$4 sm:$0xff]   ;;  %v7360_v63 = vld [vmem:[#allocation8 + $0x4c] ss:$16 sps:$4 sm:$0xff]  }
 0x8ac   :  { %3357 = vmatprep.subr.bf16.mxu0 %v7279_v3  ;;  %3398 = vmatprep.subr.bf16.mxu1 %v7282_v5  ;;  %v7355_v3 = vld [vmem:[#allocation8 + $0x40] ss:$16 sps:$4 sm:$0xff]   ;;  %v7358_v5 = vld [vmem:[#allocation8 + $0x48] ss:$16 sps:$4 sm:$0xff]  }
 0x8af   :  { %3358 = vmatpush1.bf16.msra.mxu0 %v7277_v4  ;;  %3399 = vmatpush1.bf16.msra.mxu1 %v7280_v6  ;;  %v7363_v4 = vld [vmem:[#allocation8 + $0x64] ss:$16 sps:$4 sm:$0xff]   ;;  %v7366_v6 = vld [vmem:[#allocation8 + $0x6c] ss:$16 sps:$4 sm:$0xff]  }
 0x8b0   :  { %3359 = vmatprep.subr.bf16.mxu0 %v7285_v7  ;;  %3400 = vmatprep.subr.bf16.mxu1 %v7288_v8  ;;  %v7369_v7 = vld [vmem:[#allocation8 + $0x84] ss:$16 sps:$4 sm:$0xff]   ;;  %v7372_v8 = vld [vmem:[#allocation8 + $0x8c] ss:$16 sps:$4 sm:$0xff]  }
 0x8b3   :  { %3360 = vmatpush1.bf16.msra.mxu0 %v7283_v9  ;;  %3401 = vmatpush1.bf16.msra.mxu1 %v7286_v10  ;;  %v7367_v9 = vld [vmem:[#allocation8 + $0x80] ss:$16 sps:$4 sm:$0xff]   ;;  %v7370_v10 = vld [vmem:[#allocation8 + $0x88] ss:$16 sps:$4 sm:$0xff]  }
 0x8b4   :  { %3361 = vmatprep.subr.bf16.mxu0 %v7291_v11  ;;  %3402 = vmatprep.subr.bf16.mxu1 %v7294_v13  ;;  %v7375_v11 = vld [vmem:[#allocation8 + $0xa4] ss:$16 sps:$4 sm:$0xff]   ;;  %v7378_v13 = vld [vmem:[#allocation8 + $0xac] ss:$16 sps:$4 sm:$0xff]  }
 0x8b7   :  { %3362 = vmatpush1.bf16.msra.mxu0 %v7289_v14  ;;  %3403 = vmatpush1.bf16.msra.mxu1 %v7292_v15  ;;  %v7373_v14 = vld [vmem:[#allocation8 + $0xa0] ss:$16 sps:$4 sm:$0xff]   ;;  %v7376_v15 = vld [vmem:[#allocation8 + $0xa8] ss:$16 sps:$4 sm:$0xff]  }
 0x8b8   :  { %3363 = vmatprep.subr.bf16.mxu0 %v7297_v16  ;;  %3404 = vmatprep.subr.bf16.mxu1 %v7300_v12  ;;  %v7381_v16 = vld [vmem:[#allocation8 + $0xc4] ss:$16 sps:$4 sm:$0xff]   ;;  %v7384_v12 = vld [vmem:[#allocation8 + $0xcc] ss:$16 sps:$4 sm:$0xff]  }
 0x8bb   :  { %3364 = vmatpush1.bf16.msra.mxu0 %v7295_v17  ;;  %3405 = vmatpush1.bf16.msra.mxu1 %v7298_v22  ;;  %v7379_v17 = vld [vmem:[#allocation8 + $0xc0] ss:$16 sps:$4 sm:$0xff]   ;;  %v7382_v22 = vld [vmem:[#allocation8 + $0xc8] ss:$16 sps:$4 sm:$0xff]  }
 0x8bc   :  { %3365 = vmatprep.subr.bf16.mxu0 %v7303_v18  ;;  %3406 = vmatprep.subr.bf16.mxu1 %v7306_v23  ;;  %v7387_v18 = vld [vmem:[#allocation8 + $0xe4] ss:$16 sps:$4 sm:$0xff]   ;;  %v7390_v23 = vld [vmem:[#allocation8 + $0xec] ss:$16 sps:$4 sm:$0xff]  }
 0x8bf   :  { %3366 = vmatpush1.bf16.msra.mxu0 %v7301_v24  ;;  %3407 = vmatpush1.bf16.msra.mxu1 %v7304_v25  ;;  %v7385_v24 = vld [vmem:[#allocation8 + $0xe0] ss:$16 sps:$4 sm:$0xff]   ;;  %v7388_v25 = vld [vmem:[#allocation8 + $0xe8] ss:$16 sps:$4 sm:$0xff]  }
 0x8c0   :  { %3367 = vmatprep.subr.bf16.mxu0 %v7309_v26  ;;  %3408 = vmatprep.subr.bf16.mxu1 %v7312_v27  ;;  %v7393_v26 = vld [vmem:[#allocation8 + $0x104] ss:$16 sps:$4 sm:$0xff]   ;;  %v7396_v27 = vld [vmem:[#allocation8 + $0x10c] ss:$16 sps:$4 sm:$0xff]  }
 0x8c3   :  { %3368 = vmatpush1.bf16.msra.mxu0 %v7307_v28  ;;  %3409 = vmatpush1.bf16.msra.mxu1 %v7310_v29  ;;  %v7391_v28 = vld [vmem:[#allocation8 + $0x100] ss:$16 sps:$4 sm:$0xff]   ;;  %v7394_v29 = vld [vmem:[#allocation8 + $0x108] ss:$16 sps:$4 sm:$0xff]  }
 0x8c4   :  { %3369 = vmatprep.subr.bf16.mxu0 %v7315_v30  ;;  %3410 = vmatprep.subr.bf16.mxu1 %v7318_v33  ;;  %v7399_v30 = vld [vmem:[#allocation8 + $0x124] ss:$16 sps:$4 sm:$0xff]   ;;  %v7402_v33 = vld [vmem:[#allocation8 + $0x12c] ss:$16 sps:$4 sm:$0xff]  }
 0x8c7   :  { %3370 = vmatpush1.bf16.msra.mxu0 %v7313_v34  ;;  %3411 = vmatpush1.bf16.msra.mxu1 %v7316_v35  ;;  %v7397_v34 = vld [vmem:[#allocation8 + $0x120] ss:$16 sps:$4 sm:$0xff]   ;;  %v7400_v35 = vld [vmem:[#allocation8 + $0x128] ss:$16 sps:$4 sm:$0xff]  }
 0x8c8   :  { %3371 = vmatprep.subr.bf16.mxu0 %v7321_v36  ;;  %3412 = vmatprep.subr.bf16.mxu1 %v7324_v37  ;;  %v7405_v36 = vld [vmem:[#allocation8 + $0x144] ss:$16 sps:$4 sm:$0xff]   ;;  %v7408_v37 = vld [vmem:[#allocation8 + $0x14c] ss:$16 sps:$4 sm:$0xff]  }
 0x8cb   :  { %3372 = vmatpush1.bf16.msra.mxu0 %v7319_v38  ;;  %3413 = vmatpush1.bf16.msra.mxu1 %v7322_v39  ;;  %v7403_v38 = vld [vmem:[#allocation8 + $0x140] ss:$16 sps:$4 sm:$0xff]   ;;  %v7406_v39 = vld [vmem:[#allocation8 + $0x148] ss:$16 sps:$4 sm:$0xff]  }
 0x8cc   :  { %3373 = vmatprep.subr.bf16.mxu0 %v7327_v40  ;;  %3414 = vmatprep.subr.bf16.mxu1 %v7330_v41  ;;  %v7411_v40 = vld [vmem:[#allocation8 + $0x164] ss:$16 sps:$4 sm:$0xff]   ;;  %v7414_v41 = vld [vmem:[#allocation8 + $0x16c] ss:$16 sps:$4 sm:$0xff]  }
 0x8cf   :  { %3374 = vmatpush1.bf16.msra.mxu0 %v7325_v42  ;;  %3415 = vmatpush1.bf16.msra.mxu1 %v7328_v45  ;;  %v7409_v42 = vld [vmem:[#allocation8 + $0x160] ss:$16 sps:$4 sm:$0xff]   ;;  %v7412_v45 = vld [vmem:[#allocation8 + $0x168] ss:$16 sps:$4 sm:$0xff]  }
 0x8d0   :  { %3375 = vmatprep.subr.bf16.mxu0 %v7333_v46  ;;  %3416 = vmatprep.subr.bf16.mxu1 %v7336_v47  ;;  %v7417_v46 = vld [vmem:[#allocation8 + $0x184] ss:$16 sps:$4 sm:$0xff]   ;;  %v7420_v47 = vld [vmem:[#allocation8 + $0x18c] ss:$16 sps:$4 sm:$0xff]  }
 0x8d3   :  { %3376 = vmatpush1.bf16.msra.mxu0 %v7331_v50  ;;  %3417 = vmatpush1.bf16.msra.mxu1 %v7334_v19  ;;  %v7415_v50 = vld [vmem:[#allocation8 + $0x180] ss:$16 sps:$4 sm:$0xff]   ;;  %v7418_v19 = vld [vmem:[#allocation8 + $0x188] ss:$16 sps:$4 sm:$0xff]  }
 0x8d4   :  { %3377 = vmatprep.subr.bf16.mxu0 %v7339_v51  ;;  %3418 = vmatprep.subr.bf16.mxu1 %v7342_v0  ;;  %v7423_v51 = vld [vmem:[#allocation8 + $0x1a4] ss:$16 sps:$4 sm:$0xff]   ;;  %v7426_v0 = vld [vmem:[#allocation8 + $0x1ac] ss:$16 sps:$4 sm:$0xff]  }
 0x8d7   :  { %3378 = vmatpush1.bf16.msra.mxu0 %v7337_v52  ;;  %3419 = vmatpush1.bf16.msra.mxu1 %v7340_v53  ;;  %v7421_v52 = vld [vmem:[#allocation8 + $0x1a0] ss:$16 sps:$4 sm:$0xff]   ;;  %v7424_v53 = vld [vmem:[#allocation8 + $0x1a8] ss:$16 sps:$4 sm:$0xff]  }
 0x8d8   :  { %4239 = vmatprep.subr.bf16.mxu0 %v7345_v54  ;;  %4321 = vmatprep.subr.bf16.mxu1 %v7348_v55  ;;  %v7429_v54 = vld [vmem:[#allocation8 + $0x1c4] ss:$16 sps:$4 sm:$0xff]   ;;  %v7432_v55 = vld [vmem:[#allocation8 + $0x1cc] ss:$16 sps:$4 sm:$0xff]  }
 0x8da   :  { %3380 = vmatmul.mubr.bf16.vlgmr.msra.gmra.mrb[16].mxu0 %v8546_v48  ;;  %3421 = vmatmul.mubr.bf16.vlgmr.msra.gmra.mrb[32].mxu1 %v8548_v49  ;;  %v7361_v48 = vld [vmem:[#allocation8 + $0x60] ss:$16 sps:$4 sm:$0xff]   ;;  %v7364_v49 = vld [vmem:[#allocation8 + $0x68] ss:$16 sps:$4 sm:$0xff]  }
 0x8db   :  { %4240 = vmatpush1.bf16.msra.mxu0 %v7343_v56  ;;  %4322 = vmatpush1.bf16.msra.mxu1 %v7346_v57  ;;  %v7427_v56 = vld [vmem:[#allocation8 + $0x1c0] ss:$16 sps:$4 sm:$0xff]   ;;  %v7430_v57 = vld [vmem:[#allocation8 + $0x1c8] ss:$16 sps:$4 sm:$0xff]  }
 0x8dc   :  { %4241 = vmatprep.subr.bf16.mxu0 %v7351_v58  ;;  %4323 = vmatprep.subr.bf16.mxu1 %v7354_v59  ;;  %v7435_v58 = vld [vmem:[#allocation8 + $0x1e4] ss:$16 sps:$4 sm:$0xff]   ;;  %v7438_v59 = vld [vmem:[#allocation8 + $0x1ec] ss:$16 sps:$4 sm:$0xff]  }
 0x8df   :  { %4242 = vmatpush1.bf16.msra.mxu0 %v7349_v60  ;;  %4324 = vmatpush1.bf16.msra.mxu1 %v7352_v61  ;;  %v7433_v60 = vld [vmem:[#allocation8 + $0x1e0] ss:$16 sps:$4 sm:$0xff]   ;;  %v7436_v61 = vld [vmem:[#allocation8 + $0x1e8] ss:$16 sps:$4 sm:$0xff]  }
 0x8e0   :  { %4243 = vmatprep.subr.bf16.mxu0 %v7357_v62  ;;  %4325 = vmatprep.subr.bf16.mxu1 %v7360_v63  ;;  %v7441_v62 = vld [vmem:[#allocation8 + $0x204] ss:$16 sps:$4 sm:$0xff]   ;;  %v7444_v63 = vld [vmem:[#allocation8 + $0x20c] ss:$16 sps:$4 sm:$0xff]  }
 0x8e3   :  { %4244 = vmatpush1.bf16.msra.mxu0 %v7355_v3  ;;  %4326 = vmatpush1.bf16.msra.mxu1 %v7358_v5  ;;  %v8557_v3 = vld [vmem:[%s8706_s19] sm:$0xf] }
 0x8e4   :  { %4245 = vmatprep.subr.bf16.mxu0 %v7363_v4  ;;  %4327 = vmatprep.subr.bf16.mxu1 %v7366_v6  ;;  %v2608_v5 = vrot.slane %v8557_v3, %v8326_v1  ;;  %v2612_v4 = vrot.slane %v8557_v3, %v8329_v2 }
 0x8e7   :  { %4246 = vmatpush1.bf16.msra.mxu0 %v7361_v48  ;;  %4328 = vmatpush1.bf16.msra.mxu1 %v7364_v49 }
 0x8e8   :  { %4247 = vmatprep.subr.bf16.mxu0 %v7369_v7  ;;  %4329 = vmatprep.subr.bf16.mxu1 %v7372_v8 }
 0x8eb   :  { %4248 = vmatpush1.bf16.msra.mxu0 %v7367_v9  ;;  %4330 = vmatpush1.bf16.msra.mxu1 %v7370_v10 }
 0x8ec   :  { %4249 = vmatprep.subr.bf16.mxu0 %v7375_v11  ;;  %4331 = vmatprep.subr.bf16.mxu1 %v7378_v13 }
 0x8ef   :  { %4250 = vmatpush1.bf16.msra.mxu0 %v7373_v14  ;;  %4332 = vmatpush1.bf16.msra.mxu1 %v7376_v15 }
 0x8f0   :  { %4251 = vmatprep.subr.bf16.mxu0 %v7381_v16  ;;  %4333 = vmatprep.subr.bf16.mxu1 %v7384_v12 }
 0x8f3   :  { %4252 = vmatpush1.bf16.msra.mxu0 %v7379_v17  ;;  %4334 = vmatpush1.bf16.msra.mxu1 %v7382_v22 }
 0x8f4   :  { %4253 = vmatprep.subr.bf16.mxu0 %v7387_v18  ;;  %4335 = vmatprep.subr.bf16.mxu1 %v7390_v23 }
 0x8f7   :  { %4254 = vmatpush1.bf16.msra.mxu0 %v7385_v24  ;;  %4336 = vmatpush1.bf16.msra.mxu1 %v7388_v25 }
 0x8f8   :  { %4255 = vmatprep.subr.bf16.mxu0 %v7393_v26  ;;  %4337 = vmatprep.subr.bf16.mxu1 %v7396_v27  ;;  %v7439_v26 = vld [vmem:[#allocation8 + $0x200] ss:$16 sps:$4 sm:$0xff]   ;;  %v7442_v27 = vld [vmem:[#allocation8 + $0x208] ss:$16 sps:$4 sm:$0xff]  }
 0x8fb   :  { %4256 = vmatpush1.bf16.msra.mxu0 %v7391_v28  ;;  %4338 = vmatpush1.bf16.msra.mxu1 %v7394_v29  ;;  %v7447_v29 = vld [vmem:[#allocation8 + $0x224] ss:$16 sps:$4 sm:$0xff]  }
 0x8fc   :  { %4257 = vmatprep.subr.bf16.mxu0 %v7399_v30  ;;  %4339 = vmatprep.subr.bf16.mxu1 %v7402_v33  ;;  %v7448_v30 = vld [vmem:[#allocation8 + $0x228] ss:$16 sps:$4 sm:$0xff]   ;;  %v7453_v33 = vld [vmem:[#allocation8 + $0x244] ss:$16 sps:$4 sm:$0xff]  }
 0x8ff   :  { %4258 = vmatpush1.bf16.msra.mxu0 %v7397_v34  ;;  %4340 = vmatpush1.bf16.msra.mxu1 %v7400_v35  ;;  %v7456_v34 = vld [vmem:[#allocation8 + $0x24c] ss:$16 sps:$4 sm:$0xff]   ;;  %v7451_v35 = vld [vmem:[#allocation8 + $0x240] ss:$16 sps:$4 sm:$0xff]  }
 0x900   :  { %4259 = vmatprep.subr.bf16.mxu0 %v7405_v36  ;;  %4341 = vmatprep.subr.bf16.mxu1 %v7408_v37  ;;  %v7454_v36 = vld [vmem:[#allocation8 + $0x248] ss:$16 sps:$4 sm:$0xff]   ;;  %v7459_v37 = vld [vmem:[#allocation8 + $0x264] ss:$16 sps:$4 sm:$0xff]  }
 0x903   :  { %4260 = vmatpush1.bf16.msra.mxu0 %v7403_v38  ;;  %4342 = vmatpush1.bf16.msra.mxu1 %v7406_v39  ;;  %v7462_v38 = vld [vmem:[#allocation8 + $0x26c] ss:$16 sps:$4 sm:$0xff]   ;;  %v7457_v39 = vld [vmem:[#allocation8 + $0x260] ss:$16 sps:$4 sm:$0xff]  }
 0x904   :  { %4261 = vmatprep.subr.bf16.mxu0 %v7411_v40  ;;  %4343 = vmatprep.subr.bf16.mxu1 %v7414_v41  ;;  %v7460_v40 = vld [vmem:[#allocation8 + $0x268] ss:$16 sps:$4 sm:$0xff]   ;;  %v7465_v41 = vld [vmem:[#allocation8 + $0x284] ss:$16 sps:$4 sm:$0xff]  }
 0x907   :  { %4262 = vmatpush1.bf16.msra.mxu0 %v7409_v42  ;;  %4344 = vmatpush1.bf16.msra.mxu1 %v7412_v45  ;;  %v7468_v42 = vld [vmem:[#allocation8 + $0x28c] ss:$16 sps:$4 sm:$0xff]   ;;  %v7463_v45 = vld [vmem:[#allocation8 + $0x280] ss:$16 sps:$4 sm:$0xff]  }
 0x908   :  { %4263 = vmatprep.subr.bf16.mxu0 %v7417_v46  ;;  %4345 = vmatprep.subr.bf16.mxu1 %v7420_v47  ;;  %v7466_v46 = vld [vmem:[#allocation8 + $0x288] ss:$16 sps:$4 sm:$0xff]   ;;  %v7471_v47 = vld [vmem:[#allocation8 + $0x2a4] ss:$16 sps:$4 sm:$0xff]  }
 0x90b   :  { %4264 = vmatpush1.bf16.msra.mxu0 %v7415_v50  ;;  %4346 = vmatpush1.bf16.msra.mxu1 %v7418_v19  ;;  %v7474_v50 = vld [vmem:[#allocation8 + $0x2ac] ss:$16 sps:$4 sm:$0xff]   ;;  %v7469_v19 = vld [vmem:[#allocation8 + $0x2a0] ss:$16 sps:$4 sm:$0xff]  }
 0x90c   :  { %4265 = vmatprep.subr.bf16.mxu0 %v7423_v51  ;;  %4347 = vmatprep.subr.bf16.mxu1 %v7426_v0  ;;  %v7472_v51 = vld [vmem:[#allocation8 + $0x2a8] ss:$16 sps:$4 sm:$0xff]   ;;  %v7477_v0 = vld [vmem:[#allocation8 + $0x2c4] ss:$16 sps:$4 sm:$0xff]  }
 0x90f   :  { %4266 = vmatpush1.bf16.msra.mxu0 %v7421_v52  ;;  %4348 = vmatpush1.bf16.msra.mxu1 %v7424_v53  ;;  %v7480_v52 = vld [vmem:[#allocation8 + $0x2cc] ss:$16 sps:$4 sm:$0xff]   ;;  %v7475_v53 = vld [vmem:[#allocation8 + $0x2c0] ss:$16 sps:$4 sm:$0xff]  }
 0x910   :  { %4267 = vmatprep.subr.bf16.mxu0 %v7429_v54  ;;  %4349 = vmatprep.subr.bf16.mxu1 %v7432_v55  ;;  %v7478_v54 = vld [vmem:[#allocation8 + $0x2c8] ss:$16 sps:$4 sm:$0xff]   ;;  %v7483_v55 = vld [vmem:[#allocation8 + $0x2e4] ss:$16 sps:$4 sm:$0xff]  }
 0x913   :  { %4268 = vmatpush1.bf16.msra.mxu0 %v7427_v56  ;;  %4350 = vmatpush1.bf16.msra.mxu1 %v7430_v57  ;;  %v7486_v56 = vld [vmem:[#allocation8 + $0x2ec] ss:$16 sps:$4 sm:$0xff]   ;;  %v7481_v57 = vld [vmem:[#allocation8 + $0x2e0] ss:$16 sps:$4 sm:$0xff]  }
 0x914   :  { %4269 = vmatprep.subr.bf16.mxu0 %v7435_v58  ;;  %4351 = vmatprep.subr.bf16.mxu1 %v7438_v59  ;;  %v7484_v58 = vld [vmem:[#allocation8 + $0x2e8] ss:$16 sps:$4 sm:$0xff]   ;;  %v7489_v59 = vld [vmem:[#allocation8 + $0x304] ss:$16 sps:$4 sm:$0xff]  }
 0x917   :  { %4270 = vmatpush1.bf16.msra.mxu0 %v7433_v60  ;;  %4352 = vmatpush1.bf16.msra.mxu1 %v7436_v61  ;;  %v7492_v60 = vld [vmem:[#allocation8 + $0x30c] ss:$16 sps:$4 sm:$0xff]   ;;  %v7487_v61 = vld [vmem:[#allocation8 + $0x300] ss:$16 sps:$4 sm:$0xff]  }
 0x918   :  { %4280 = vmatprep.subr.bf16.mxu0 %v7441_v62  ;;  %4362 = vmatprep.subr.bf16.mxu1 %v7444_v63  ;;  %v7490_v62 = vld [vmem:[#allocation8 + $0x308] ss:$16 sps:$4 sm:$0xff]   ;;  %v7495_v63 = vld [vmem:[#allocation8 + $0x324] ss:$16 sps:$4 sm:$0xff]  }
 0x96d   :  { %v3299_v6 = vpop.f32.mrb[12].mxu0  ;;  %v3340_v48 = vpop.f32.mrb[28].mxu1 }
 0x96e   :  { %v3300_v49 = vadd.f32 %v3299_v6, %v2608_v5  ;;  %v3301_v7 = vpop.f32.mrb[13].mxu0  ;;  %v3342_v8 = vpop.f32.mrb[29].mxu1  ;;  %v7498_v5 = vld [vmem:[#allocation8 + $0x32c] ss:$16 sps:$4 sm:$0xff]   ;;  %v7496_v6 = vld [vmem:[#allocation8 + $0x328] ss:$16 sps:$4 sm:$0xff]  }
 0x96f   :  { %v3302_v9 = vadd.f32 %v3301_v7, %v2612_v4  ;;  %v3303_v10 = vpop.f32.mrb[14].mxu0  ;;  %v3344_v11 = vpop.f32.mrb[30].mxu1  ;;  %v7493_v4 = vld [vmem:[#allocation8 + $0x320] ss:$16 sps:$4 sm:$0xff]  }
 0x970   :  { %v3341_v13 = vadd.f32 %v3340_v48, %v3300_v49  ;;  %v3304_v14 = vpop.f32.mrb[15].mxu0  ;;  %v3345_v15 = vpop.f32.mrb[31].mxu1  ;;  %v7501_v48 = vld [vmem:[#allocation8 + $0x344] ss:$16 sps:$4 sm:$0xff]   ;;  %v7504_v49 = vld [vmem:[#allocation8 + $0x34c] ss:$16 sps:$4 sm:$0xff]  }
 0x971   :  { %v3343_v16 = vadd.f32 %v3342_v8, %v3302_v9  ;;  %v7499_v7 = vld [vmem:[#allocation8 + $0x340] ss:$16 sps:$4 sm:$0xff]   ;;  %v7502_v8 = vld [vmem:[#allocation8 + $0x348] ss:$16 sps:$4 sm:$0xff]   ;;  %v7507_v9 = vld [vmem:[#allocation8 + $0x364] ss:$16 sps:$4 sm:$0xff]  }
 0x972   :  { %v3429_v12 = vadd.f32 %v3341_v13, %v8504_v31  ;;  %v7450_v31 = vld [vmem:[#allocation8 + $0x22c] ss:$16 sps:$4 sm:$0xff]   ;;  %v7505_v11 = vld [vmem:[#allocation8 + $0x360] ss:$16 sps:$4 sm:$0xff]   ;;  %v7508_v13 = vld [vmem:[#allocation8 + $0x368] ss:$16 sps:$4 sm:$0xff]  }
 0x973   :  { %v3430_v17 = vadd.f32 %v3343_v16, %v8506_v32  ;;  %v7445_v32 = vld [vmem:[#allocation8 + $0x220] ss:$16 sps:$4 sm:$0xff]   ;;  %v7510_v10 = vld [vmem:[#allocation8 + $0x36c] ss:$16 sps:$4 sm:$0xff]   ;;  %v7513_v14 = vld [vmem:[#allocation8 + $0x384] ss:$16 sps:$4 sm:$0xff]  }
 0x974   :  { %vm3433_vm2 = vcmp.gt.f32.partialorder %v3429_v12, 0.0  ;;  %v3437_v22 = vmul.f32 0.2, %v3429_v12  ;;  %v7516_v15 = vld [vmem:[#allocation8 + $0x38c] ss:$16 sps:$4 sm:$0xff]  }
 0x975   :  { %vm3434_vm3 = vcmp.gt.f32.partialorder %v3430_v17, 0.0  ;;  %v3438_v18 = vmul.f32 0.2, %v3430_v17  ;;  %v7511_v16 = vld [vmem:[#allocation8 + $0x380] ss:$16 sps:$4 sm:$0xff]  }
 0x976   :  { %v8565_v23 = vsel %vm3433_vm2, %v3429_v12, %v3437_v22  ;;  %v7514_v12 = vld [vmem:[#allocation8 + $0x388] ss:$16 sps:$4 sm:$0xff]   ;;  %v7522_v22 = vld [vmem:[#allocation8 + $0x3ac] ss:$16 sps:$4 sm:$0xff]  }
 0x977   :  { %v8567_v24 = vsel %vm3434_vm3, %v3430_v17, %v3438_v18  ;;  %v3445_v28 = vpack.c.bf16 %v8565_v23, %v8565_v23  ;;  %v7519_v17 = vld [vmem:[#allocation8 + $0x3a4] ss:$16 sps:$4 sm:$0xff]   ;;  %v2616_v18 = vrot.slane %v8557_v3, %v8513_v43 }
 0x978   :  { %v3446_v25 = vpack.c.bf16 %v8567_v24, %v8567_v24 }
 0x97a   :  { %4271 = vmatprep.mubr.bf16.mxu0 %v3446_v25  ;;  %4353 = vmatprep.mubr.bf16.mxu1 %v3446_v25  ;;  %v2620_v25 = vrot.slane %v8557_v3, %v8516_v44  ;;  %v7523_v3 = vld [vmem:[#allocation8 + $0x3c0] ss:$16 sps:$4 sm:$0xff]  }
 0x97b   :  { %4272 = vmatmul.mubr.bf16.vlgmr.msra.gmra.mrb[20].mxu0 %v3445_v28  ;;  %4354 = vmatmul.mubr.bf16.vlgmr.msra.gmra.mrb[36].mxu1 %v3445_v28 }
 0x97c   :  { %4281 = vmatpush1.bf16.msra.mxu0 %v7439_v26  ;;  %4363 = vmatpush1.bf16.msra.mxu1 %v7442_v27  ;;  %v7517_v26 = vld [vmem:[#allocation8 + $0x3a0] ss:$16 sps:$4 sm:$0xff]   ;;  %v7520_v27 = vld [vmem:[#allocation8 + $0x3a8] ss:$16 sps:$4 sm:$0xff]  }
 0x97d   :  { %4282 = vmatprep.subr.bf16.mxu0 %v7447_v29  ;;  %4364 = vmatprep.subr.bf16.mxu1 %v7450_v31  ;;  %v7525_v31 = vld [vmem:[#allocation8 + $0x3c4] ss:$16 sps:$4 sm:$0xff]  }
 0x980   :  { %4283 = vmatpush1.bf16.msra.mxu0 %v7445_v32  ;;  %4365 = vmatpush1.bf16.msra.mxu1 %v7448_v30  ;;  %v7528_v32 = vld [vmem:[#allocation8 + $0x3cc] ss:$16 sps:$4 sm:$0xff]  }
 0x981   :  { %4284 = vmatprep.subr.bf16.mxu0 %v7453_v33  ;;  %4366 = vmatprep.subr.bf16.mxu1 %v7456_v34 }
 0x984   :  { %4285 = vmatpush1.bf16.msra.mxu0 %v7451_v35  ;;  %4367 = vmatpush1.bf16.msra.mxu1 %v7454_v36 }
 0x985   :  { %4286 = vmatprep.subr.bf16.mxu0 %v7459_v37  ;;  %4368 = vmatprep.subr.bf16.mxu1 %v7462_v38 }
 0x988   :  { %4287 = vmatpush1.bf16.msra.mxu0 %v7457_v39  ;;  %4369 = vmatpush1.bf16.msra.mxu1 %v7460_v40 }
 0x989   :  { %4288 = vmatprep.subr.bf16.mxu0 %v7465_v41  ;;  %4370 = vmatprep.subr.bf16.mxu1 %v7468_v42  ;;  %v7526_v41 = vld [vmem:[#allocation8 + $0x3c8] ss:$16 sps:$4 sm:$0xff]  }
 0x98c   :  { %4289 = vmatpush1.bf16.msra.mxu0 %v7463_v45  ;;  %4371 = vmatpush1.bf16.msra.mxu1 %v7466_v46  ;;  %v7531_v45 = vld [vmem:[#allocation8 + $0x3e4] ss:$16 sps:$4 sm:$0xff]   ;;  %v7534_v46 = vld [vmem:[#allocation8 + $0x3ec] ss:$16 sps:$4 sm:$0xff]  }
 0x98d   :  { %4290 = vmatprep.subr.bf16.mxu0 %v7471_v47  ;;  %4372 = vmatprep.subr.bf16.mxu1 %v7474_v50 }
 0x990   :  { %4291 = vmatpush1.bf16.msra.mxu0 %v7469_v19  ;;  %4373 = vmatpush1.bf16.msra.mxu1 %v7472_v51  ;;  %v7529_v19 = vld [vmem:[#allocation8 + $0x3e0] ss:$16 sps:$4 sm:$0xff]   ;;  %v7532_v51 = vld [vmem:[#allocation8 + $0x3e8] ss:$16 sps:$4 sm:$0xff]  }
 0x991   :  { %4292 = vmatprep.subr.bf16.mxu0 %v7477_v0  ;;  %4374 = vmatprep.subr.bf16.mxu1 %v7480_v52  ;;  %v7537_v52 = vld [vmem:[#allocation10 + $0x4] ss:$16 sps:$4 sm:$0xff]  }
 0x994   :  { %4293 = vmatpush1.bf16.msra.mxu0 %v7475_v53  ;;  %4375 = vmatpush1.bf16.msra.mxu1 %v7478_v54  ;;  %v7540_v54 = vld [vmem:[#allocation10 + $0x204] ss:$16 sps:$4 sm:$0xff]  }
 0x995   :  { %4294 = vmatprep.subr.bf16.mxu0 %v7483_v55  ;;  %4376 = vmatprep.subr.bf16.mxu1 %v7486_v56 }
 0x998   :  { %4295 = vmatpush1.bf16.msra.mxu0 %v7481_v57  ;;  %4377 = vmatpush1.bf16.msra.mxu1 %v7484_v58  ;;  %v7538_v57 = vld [vmem:[#allocation10 + $0x200] ss:$16 sps:$4 sm:$0xff]  }
 0x999   :  { %4296 = vmatprep.subr.bf16.mxu0 %v7489_v59  ;;  %4378 = vmatprep.subr.bf16.mxu1 %v7492_v60  ;;  %v7543_v59 = vld [vmem:[#allocation10 + $0x24] ss:$16 sps:$4 sm:$0xff]  }
 0x99a   :  { %v7546_v60 = vld [vmem:[#allocation10 + $0x224] ss:$16 sps:$4 sm:$0xff]  }
 0x99c   :  { %4297 = vmatpush1.bf16.msra.mxu0 %v7487_v61  ;;  %4379 = vmatpush1.bf16.msra.mxu1 %v7490_v62  ;;  %v7541_v61 = vld [vmem:[#allocation10 + $0x20] ss:$16 sps:$4 sm:$0xff]  }
 0x99d   :  { %4298 = vmatprep.subr.bf16.mxu0 %v7495_v63  ;;  %4380 = vmatprep.subr.bf16.mxu1 %v7498_v5  ;;  %v7544_v62 = vld [vmem:[#allocation10 + $0x220] ss:$16 sps:$4 sm:$0xff]   ;;  %v7549_v63 = vld [vmem:[#allocation10 + $0x44] ss:$16 sps:$4 sm:$0xff]  }
 0x99e   :  { %v7552_v5 = vld [vmem:[#allocation10 + $0x244] ss:$16 sps:$4 sm:$0xff]  }
 0x9a0   :  { %4299 = vmatpush1.bf16.msra.mxu0 %v7493_v4  ;;  %4381 = vmatpush1.bf16.msra.mxu1 %v7496_v6  ;;  %v7547_v4 = vld [vmem:[#allocation10 + $0x40] ss:$16 sps:$4 sm:$0xff]  }
 0x9a1   :  { %4300 = vmatprep.subr.bf16.mxu0 %v7501_v48  ;;  %4382 = vmatprep.subr.bf16.mxu1 %v7504_v49  ;;  %v7550_v6 = vld [vmem:[#allocation10 + $0x240] ss:$16 sps:$4 sm:$0xff]   ;;  %v7555_v48 = vld [vmem:[#allocation10 + $0x64] ss:$16 sps:$4 sm:$0xff]  }
 0x9a2   :  { %v7558_v49 = vld [vmem:[#allocation10 + $0x264] ss:$16 sps:$4 sm:$0xff]  }
 0x9a4   :  { %4301 = vmatpush1.bf16.msra.mxu0 %v7499_v7  ;;  %4383 = vmatpush1.bf16.msra.mxu1 %v7502_v8  ;;  %v7553_v7 = vld [vmem:[#allocation10 + $0x60] ss:$16 sps:$4 sm:$0xff]  }
 0x9a5   :  { %4302 = vmatprep.subr.bf16.mxu0 %v7507_v9  ;;  %4384 = vmatprep.subr.bf16.mxu1 %v7510_v10  ;;  %v7556_v8 = vld [vmem:[#allocation10 + $0x260] ss:$16 sps:$4 sm:$0xff]   ;;  %v7561_v9 = vld [vmem:[#allocation10 + $0x84] ss:$16 sps:$4 sm:$0xff]  }
 0x9a6   :  { %v7564_v10 = vld [vmem:[#allocation10 + $0x284] ss:$16 sps:$4 sm:$0xff]  }
 0x9a8   :  { %4303 = vmatpush1.bf16.msra.mxu0 %v7505_v11  ;;  %4385 = vmatpush1.bf16.msra.mxu1 %v7508_v13  ;;  %v7559_v11 = vld [vmem:[#allocation10 + $0x80] ss:$16 sps:$4 sm:$0xff]  }
 0x9a9   :  { %4304 = vmatprep.subr.bf16.mxu0 %v7513_v14  ;;  %4386 = vmatprep.subr.bf16.mxu1 %v7516_v15  ;;  %v7562_v13 = vld [vmem:[#allocation10 + $0x280] ss:$16 sps:$4 sm:$0xff]   ;;  %v7567_v14 = vld [vmem:[#allocation10 + $0xa4] ss:$16 sps:$4 sm:$0xff]  }
 0x9aa   :  { %v7570_v15 = vld [vmem:[#allocation10 + $0x2a4] ss:$16 sps:$4 sm:$0xff]  }
 0x9ac   :  { %4305 = vmatpush1.bf16.msra.mxu0 %v7511_v16  ;;  %4387 = vmatpush1.bf16.msra.mxu1 %v7514_v12  ;;  %v7565_v16 = vld [vmem:[#allocation10 + $0xa0] ss:$16 sps:$4 sm:$0xff]  }
 0x9ad   :  { %v3381_v28 = vpop.f32.mrb[16].mxu0  ;;  %v3422_v29 = vpop.f32.mrb[32].mxu1  ;;  %4306 = vmatprep.subr.bf16.mxu0 %v7519_v17  ;;  %4388 = vmatprep.subr.bf16.mxu1 %v7522_v22  ;;  %v7568_v12 = vld [vmem:[#allocation10 + $0x2a0] ss:$16 sps:$4 sm:$0xff]   ;;  %v7573_v17 = vld [vmem:[#allocation10 + $0xc4] ss:$16 sps:$4 sm:$0xff]  }
 0x9ae   :  { %v3382_v30 = vadd.f32 %v3381_v28, %v2616_v18  ;;  %v3383_v33 = vpop.f32.mrb[17].mxu0  ;;  %v3424_v34 = vpop.f32.mrb[33].mxu1  ;;  %v7576_v22 = vld [vmem:[#allocation10 + $0x2c4] ss:$16 sps:$4 sm:$0xff]   ;;  %v7571_v18 = vld [vmem:[#allocation10 + $0xc0] ss:$16 sps:$4 sm:$0xff]  }
 0x9af   :  { %v3384_v35 = vadd.f32 %v3383_v33, %v2620_v25  ;;  %v3385_v36 = vpop.f32.mrb[18].mxu0  ;;  %v3426_v37 = vpop.f32.mrb[34].mxu1  ;;  %v7574_v25 = vld [vmem:[#allocation10 + $0x2c0] ss:$16 sps:$4 sm:$0xff]  }
 0x9b0   :  { %v3423_v38 = vadd.f32 %v3422_v29, %v3382_v30  ;;  %v3386_v39 = vpop.f32.mrb[19].mxu0  ;;  %v3427_v40 = vpop.f32.mrb[35].mxu1  ;;  %4307 = vmatpush1.bf16.msra.mxu0 %v7517_v26  ;;  %4389 = vmatpush1.bf16.msra.mxu1 %v7520_v27  ;;  %v7579_v26 = vld [vmem:[#allocation10 + $0xe4] ss:$16 sps:$4 sm:$0xff]   ;;  %v7577_v28 = vld [vmem:[#allocation10 + $0xe0] ss:$16 sps:$4 sm:$0xff]  }
 0x9b1   :  { %v3425_v42 = vadd.f32 %v3424_v34, %v3384_v35  ;;  %4308 = vmatprep.subr.bf16.mxu0 %v7525_v31  ;;  %4390 = vmatprep.subr.bf16.mxu1 %v7528_v32  ;;  %v7582_v27 = vld [vmem:[#allocation10 + $0x2e4] ss:$16 sps:$4 sm:$0xff]   ;;  %v7580_v29 = vld [vmem:[#allocation10 + $0x2e0] ss:$16 sps:$4 sm:$0xff]  }
 0x9b2   :  { %v3431_v47 = vadd.f32 %v3423_v38, %v8531_v20  ;;  %v7585_v31 = vld [vmem:[#allocation10 + $0x104] ss:$16 sps:$4 sm:$0xff]   ;;  %v7583_v30 = vld [vmem:[#allocation10 + $0x100] ss:$16 sps:$4 sm:$0xff]  }
 0x9b3   :  { %v3432_v50 = vadd.f32 %v3425_v42, %v8533_v21  ;;  %v7535_v21 = vld [vmem:[#allocation10] ss:$16 sps:$4 sm:$0xff]   ;;  %v7588_v32 = vld [vmem:[#allocation10 + $0x304] ss:$16 sps:$4 sm:$0xff]  }
 0x9b4   :  { %vm3435_vm4 = vcmp.gt.f32.partialorder %v3431_v47, 0.0  ;;  %v3439_v0 = vmul.f32 0.2, %v3431_v47  ;;  %4309 = vmatpush1.bf16.msra.mxu0 %v7523_v3  ;;  %4391 = vmatpush1.bf16.msra.mxu1 %v7526_v41  ;;  %v7586_v33 = vld [vmem:[#allocation10 + $0x300] ss:$16 sps:$4 sm:$0xff]  }
 0x9b5   :  { %vm3436_vm5 = vcmp.gt.f32.partialorder %v3432_v50, 0.0  ;;  %v3440_v53 = vmul.f32 0.2, %v3432_v50  ;;  %4310 = vmatprep.subr.bf16.mxu0 %v7531_v45  ;;  %4392 = vmatprep.subr.bf16.mxu1 %v7534_v46  ;;  %v7591_v34 = vld [vmem:[#allocation10 + $0x124] ss:$16 sps:$4 sm:$0xff]  }
 0x9b6   :  { %v8579_v55 = vsel %vm3435_vm4, %v3431_v47, %v3439_v0  ;;  %v7594_v35 = vld [vmem:[#allocation10 + $0x324] ss:$16 sps:$4 sm:$0xff]   ;;  %v7589_v36 = vld [vmem:[#allocation10 + $0x120] ss:$16 sps:$4 sm:$0xff]  }
 0x9b7   :  { %v8581_v56 = vsel %vm3436_vm5, %v3432_v50, %v3440_v53  ;;  %v3447_v58 = vpack.c.bf16 %v8579_v55, %v8579_v55  ;;  %v7592_v37 = vld [vmem:[#allocation10 + $0x320] ss:$16 sps:$4 sm:$0xff]   ;;  %v7597_v38 = vld [vmem:[#allocation10 + $0x144] ss:$16 sps:$4 sm:$0xff]  }
 0x9b8   :  { %4311 = vmatpush1.bf16.msra.mxu0 %v7529_v19  ;;  %4393 = vmatpush1.bf16.msra.mxu1 %v7532_v51  ;;  %v3448_v20 = vpack.c.bf16 %v8581_v56, %v8581_v56  ;;  %v7600_v39 = vld [vmem:[#allocation10 + $0x344] ss:$16 sps:$4 sm:$0xff]   ;;  %v7595_v40 = vld [vmem:[#allocation10 + $0x140] ss:$16 sps:$4 sm:$0xff]  }
 0x9b9   :  { %5209 = vmatprep.subr.bf16.mxu0 %v7537_v52  ;;  %5250 = vmatprep.subr.bf16.mxu1 %v7540_v54  ;;  %v7598_v3 = vld [vmem:[#allocation10 + $0x340] ss:$16 sps:$4 sm:$0xff]   ;;  %v7603_v41 = vld [vmem:[#allocation10 + $0x164] ss:$16 sps:$4 sm:$0xff]  }
 0x9ba   :  { %4312 = vmatprep.mubr.bf16.mxu0 %v3448_v20  ;;  %4394 = vmatprep.mubr.bf16.mxu1 %v3448_v20  ;;  %v7606_v42 = vld [vmem:[#allocation10 + $0x364] ss:$16 sps:$4 sm:$0xff]   ;;  %v7601_v45 = vld [vmem:[#allocation10 + $0x160] ss:$16 sps:$4 sm:$0xff]  }
 0x9bb   :  { %4313 = vmatmul.mubr.bf16.vlgmr.msra.gmra.mrb[20].mxu0 %v3447_v58  ;;  %4395 = vmatmul.mubr.bf16.vlgmr.msra.gmra.mrb[36].mxu1 %v3447_v58  ;;  %v7604_v46 = vld [vmem:[#allocation10 + $0x360] ss:$16 sps:$4 sm:$0xff]   ;;  %v7609_v47 = vld [vmem:[#allocation10 + $0x184] ss:$16 sps:$4 sm:$0xff]  }
 0x9bc   :  { %5210 = vmatpush1.bf16.msra.mxu0 %v7535_v21  ;;  %5251 = vmatpush1.bf16.msra.mxu1 %v7538_v57  ;;  %v7612_v50 = vld [vmem:[#allocation10 + $0x384] ss:$16 sps:$4 sm:$0xff]   ;;  %v7607_v19 = vld [vmem:[#allocation10 + $0x180] ss:$16 sps:$4 sm:$0xff]  }
 0x9bd   :  { %5211 = vmatprep.subr.bf16.mxu0 %v7543_v59  ;;  %5252 = vmatprep.subr.bf16.mxu1 %v7546_v60  ;;  %v7610_v51 = vld [vmem:[#allocation10 + $0x380] ss:$16 sps:$4 sm:$0xff]   ;;  %v7615_v0 = vld [vmem:[#allocation10 + $0x1a4] ss:$16 sps:$4 sm:$0xff]  }
 0x9be   :  { %v7618_v52 = vld [vmem:[#allocation10 + $0x3a4] ss:$16 sps:$4 sm:$0xff]   ;;  %v7613_v53 = vld [vmem:[#allocation10 + $0x1a0] ss:$16 sps:$4 sm:$0xff]  }
 0x9bf   :  { %v7616_v54 = vld [vmem:[#allocation10 + $0x3a0] ss:$16 sps:$4 sm:$0xff]   ;;  %v7621_v20 = vld [vmem:[#allocation10 + $0x1c4] ss:$16 sps:$4 sm:$0xff]  }
 0x9c0   :  { %5212 = vmatpush1.bf16.msra.mxu0 %v7541_v61  ;;  %5253 = vmatpush1.bf16.msra.mxu1 %v7544_v62  ;;  %v7624_v21 = vld [vmem:[#allocation10 + $0x3c4] ss:$16 sps:$4 sm:$0xff]   ;;  %v7619_v57 = vld [vmem:[#allocation10 + $0x1c0] ss:$16 sps:$4 sm:$0xff]  }
 0x9c1   :  { %5213 = vmatprep.subr.bf16.mxu0 %v7549_v63  ;;  %5254 = vmatprep.subr.bf16.mxu1 %v7552_v5  ;;  %v7622_v58 = vld [vmem:[#allocation10 + $0x3c0] ss:$16 sps:$4 sm:$0xff]   ;;  %v7627_v59 = vld [vmem:[#allocation10 + $0x1e4] ss:$16 sps:$4 sm:$0xff]   ;;  %v7633_v63 = vld [vmem:[#allocation10 + $0xc] ss:$16 sps:$4 sm:$0xff]  }
 0x9c2   :  { %v7630_v60 = vld [vmem:[#allocation10 + $0x3e4] ss:$16 sps:$4 sm:$0xff]   ;;  %v7625_v61 = vld [vmem:[#allocation10 + $0x1e0] ss:$16 sps:$4 sm:$0xff]   ;;  %v7636_v5 = vld [vmem:[#allocation10 + $0x20c] ss:$16 sps:$4 sm:$0xff]  }
 0x9c3   :  { %v7628_v62 = vld [vmem:[#allocation10 + $0x3e0] ss:$16 sps:$4 sm:$0xff]  }
 0x9c4   :  { %5214 = vmatpush1.bf16.msra.mxu0 %v7547_v4  ;;  %5255 = vmatpush1.bf16.msra.mxu1 %v7550_v6  ;;  %v3577_v4 = vld [vmem:[%s8708_s21] sm:$0xf] }
 0x9c5   :  { %5215 = vmatprep.subr.bf16.mxu0 %v7555_v48  ;;  %5256 = vmatprep.subr.bf16.mxu1 %v7558_v49  ;;  %v3582_v6 = vrot.slane %v3577_v4, %v8326_v1  ;;  %v3590_v48 = vrot.slane %v3577_v4, %v8513_v43  ;;  %v3586_v49 = vrot.slane %v3577_v4, %v8329_v2 }
 0x9c8   :  { %5216 = vmatpush1.bf16.msra.mxu0 %v7553_v7  ;;  %5257 = vmatpush1.bf16.msra.mxu1 %v7556_v8  ;;  %v3594_v7 = vrot.slane %v3577_v4, %v8516_v44  ;;  %v7678_v4 = vld [vmem:[#allocation10 + $0x2ec] ss:$16 sps:$4 sm:$0xff]  }
 0x9c9   :  { %5217 = vmatprep.subr.bf16.mxu0 %v7561_v9  ;;  %5258 = vmatprep.subr.bf16.mxu1 %v7564_v10 }
 0x9cc   :  { %5218 = vmatpush1.bf16.msra.mxu0 %v7559_v11  ;;  %5259 = vmatpush1.bf16.msra.mxu1 %v7562_v13 }
 0x9cd   :  { %5219 = vmatprep.subr.bf16.mxu0 %v7567_v14  ;;  %5260 = vmatprep.subr.bf16.mxu1 %v7570_v15 }
 0x9d0   :  { %5220 = vmatpush1.bf16.msra.mxu0 %v7565_v16  ;;  %5261 = vmatpush1.bf16.msra.mxu1 %v7568_v12 }
 0x9d1   :  { %5221 = vmatprep.subr.bf16.mxu0 %v7573_v17  ;;  %5262 = vmatprep.subr.bf16.mxu1 %v7576_v22 }
 0x9d4   :  { %5222 = vmatpush1.bf16.msra.mxu0 %v7571_v18  ;;  %5263 = vmatpush1.bf16.msra.mxu1 %v7574_v25 }
 0x9d5   :  { %5223 = vmatprep.subr.bf16.mxu0 %v7579_v26  ;;  %5264 = vmatprep.subr.bf16.mxu1 %v7582_v27 }
 0x9d8   :  { %5224 = vmatpush1.bf16.msra.mxu0 %v7577_v28  ;;  %5265 = vmatpush1.bf16.msra.mxu1 %v7580_v29 }
 0x9d9   :  { %5225 = vmatprep.subr.bf16.mxu0 %v7585_v31  ;;  %5266 = vmatprep.subr.bf16.mxu1 %v7588_v32 }
 0x9dc   :  { %5226 = vmatpush1.bf16.msra.mxu0 %v7583_v30  ;;  %5267 = vmatpush1.bf16.msra.mxu1 %v7586_v33 }
 0x9dd   :  { %5227 = vmatprep.subr.bf16.mxu0 %v7591_v34  ;;  %5268 = vmatprep.subr.bf16.mxu1 %v7594_v35  ;;  %v7631_v35 = vld [vmem:[#allocation10 + $0x8] ss:$16 sps:$4 sm:$0xff]  }
 0x9e0   :  { %5228 = vmatpush1.bf16.msra.mxu0 %v7589_v36  ;;  %5269 = vmatpush1.bf16.msra.mxu1 %v7592_v37  ;;  %v7634_v36 = vld [vmem:[#allocation10 + $0x208] ss:$16 sps:$4 sm:$0xff]  }
 0x9e1   :  { %5229 = vmatprep.subr.bf16.mxu0 %v7597_v38  ;;  %5270 = vmatprep.subr.bf16.mxu1 %v7600_v39  ;;  %v7639_v39 = vld [vmem:[#allocation10 + $0x2c] ss:$16 sps:$4 sm:$0xff]  }
 0x9e4   :  { %5230 = vmatpush1.bf16.msra.mxu0 %v7595_v40  ;;  %5271 = vmatpush1.bf16.msra.mxu1 %v7598_v3  ;;  %v7642_v40 = vld [vmem:[#allocation10 + $0x22c] ss:$16 sps:$4 sm:$0xff]   ;;  %v7637_v3 = vld [vmem:[#allocation10 + $0x28] ss:$16 sps:$4 sm:$0xff]  }
 0x9e5   :  { %5231 = vmatprep.subr.bf16.mxu0 %v7603_v41  ;;  %5272 = vmatprep.subr.bf16.mxu1 %v7606_v42  ;;  %v7640_v41 = vld [vmem:[#allocation10 + $0x228] ss:$16 sps:$4 sm:$0xff]   ;;  %v7645_v42 = vld [vmem:[#allocation10 + $0x4c] ss:$16 sps:$4 sm:$0xff]  }
 0x9e8   :  { %5232 = vmatpush1.bf16.msra.mxu0 %v7601_v45  ;;  %5273 = vmatpush1.bf16.msra.mxu1 %v7604_v46  ;;  %v7648_v45 = vld [vmem:[#allocation10 + $0x24c] ss:$16 sps:$4 sm:$0xff]   ;;  %v7643_v46 = vld [vmem:[#allocation10 + $0x48] ss:$16 sps:$4 sm:$0xff]  }
 0x9e9   :  { %5233 = vmatprep.subr.bf16.mxu0 %v7609_v47  ;;  %5274 = vmatprep.subr.bf16.mxu1 %v7612_v50  ;;  %v7646_v47 = vld [vmem:[#allocation10 + $0x248] ss:$16 sps:$4 sm:$0xff]   ;;  %v7651_v50 = vld [vmem:[#allocation10 + $0x6c] ss:$16 sps:$4 sm:$0xff]  }
 0x9ec   :  { %5234 = vmatpush1.bf16.msra.mxu0 %v7607_v19  ;;  %5275 = vmatpush1.bf16.msra.mxu1 %v7610_v51  ;;  %v7654_v19 = vld [vmem:[#allocation10 + $0x26c] ss:$16 sps:$4 sm:$0xff]   ;;  %v7649_v51 = vld [vmem:[#allocation10 + $0x68] ss:$16 sps:$4 sm:$0xff]  }
 0x9ed   :  { %5235 = vmatprep.subr.bf16.mxu0 %v7615_v0  ;;  %5276 = vmatprep.subr.bf16.mxu1 %v7618_v52  ;;  %v7652_v0 = vld [vmem:[#allocation10 + $0x268] ss:$16 sps:$4 sm:$0xff]   ;;  %v7657_v52 = vld [vmem:[#allocation10 + $0x8c] ss:$16 sps:$4 sm:$0xff]  }
 0x9f0   :  { %5236 = vmatpush1.bf16.msra.mxu0 %v7613_v53  ;;  %5277 = vmatpush1.bf16.msra.mxu1 %v7616_v54  ;;  %v7660_v53 = vld [vmem:[#allocation10 + $0x28c] ss:$16 sps:$4 sm:$0xff]   ;;  %v7655_v54 = vld [vmem:[#allocation10 + $0x88] ss:$16 sps:$4 sm:$0xff]  }
 0x9f1   :  { %5237 = vmatprep.subr.bf16.mxu0 %v7621_v20  ;;  %5278 = vmatprep.subr.bf16.mxu1 %v7624_v21  ;;  %v7658_v20 = vld [vmem:[#allocation10 + $0x288] ss:$16 sps:$4 sm:$0xff]   ;;  %v7663_v21 = vld [vmem:[#allocation10 + $0xac] ss:$16 sps:$4 sm:$0xff]  }
 0x9f4   :  { %5238 = vmatpush1.bf16.msra.mxu0 %v7619_v57  ;;  %5279 = vmatpush1.bf16.msra.mxu1 %v7622_v58  ;;  %v7666_v57 = vld [vmem:[#allocation10 + $0x2ac] ss:$16 sps:$4 sm:$0xff]   ;;  %v7661_v58 = vld [vmem:[#allocation10 + $0xa8] ss:$16 sps:$4 sm:$0xff]  }
 0x9f5   :  { %5239 = vmatprep.subr.bf16.mxu0 %v7627_v59  ;;  %5280 = vmatprep.subr.bf16.mxu1 %v7630_v60  ;;  %v7664_v59 = vld [vmem:[#allocation10 + $0x2a8] ss:$16 sps:$4 sm:$0xff]   ;;  %v7669_v60 = vld [vmem:[#allocation10 + $0xcc] ss:$16 sps:$4 sm:$0xff]  }
 0x9f8   :  { %5240 = vmatpush1.bf16.msra.mxu0 %v7625_v61  ;;  %5281 = vmatpush1.bf16.msra.mxu1 %v7628_v62  ;;  %v7672_v61 = vld [vmem:[#allocation10 + $0x2cc] ss:$16 sps:$4 sm:$0xff]   ;;  %v7667_v62 = vld [vmem:[#allocation10 + $0xc8] ss:$16 sps:$4 sm:$0xff]  }
 0x9f9   :  { %5291 = vmatprep.subr.bf16.mxu0 %v7633_v63  ;;  %5332 = vmatprep.subr.bf16.mxu1 %v7636_v5  ;;  %v7670_v63 = vld [vmem:[#allocation10 + $0x2c8] ss:$16 sps:$4 sm:$0xff]   ;;  %v7675_v5 = vld [vmem:[#allocation10 + $0xec] ss:$16 sps:$4 sm:$0xff]  }
 0xa8e   :  { %v4314_v8 = vpop.f32.mrb[20].mxu0  ;;  %v4396_v9 = vpop.f32.mrb[36].mxu1 }
 0xa8f   :  { %v6847_v10 = vadd.f32 %v4314_v8, %v3582_v6  ;;  %v6849_v11 = vadd.f32 %v4396_v9, %v3590_v48  ;;  %v4316_v13 = vpop.f32.mrb[21].mxu0  ;;  %v4398_v14 = vpop.f32.mrb[37].mxu1  ;;  %v7673_v6 = vld [vmem:[#allocation10 + $0xe8] ss:$16 sps:$4 sm:$0xff]  }
 0xa90   :  { %v6848_v15 = vadd.f32 %v4316_v13, %v3586_v49  ;;  %v6850_v16 = vadd.f32 %v4398_v14, %v3594_v7  ;;  %v4318_v12 = vpop.f32.mrb[22].mxu0  ;;  %v4400_v17 = vpop.f32.mrb[38].mxu1  ;;  %v7676_v48 = vld [vmem:[#allocation10 + $0x2e8] ss:$16 sps:$4 sm:$0xff]   ;;  %v7681_v49 = vld [vmem:[#allocation10 + $0x10c] ss:$16 sps:$4 sm:$0xff]  }
 0xa91   :  { %vm4403_vm6 = vcmp.gt.f32.partialorder %v6847_v10, 0.0  ;;  %v4407_v22 = vmul.f32 0.2, %v6847_v10  ;;  %vm4405_vm7 = vcmp.gt.f32.partialorder %v6849_v11, 0.0  ;;  %v4409_v18 = vmul.f32 0.2, %v6849_v11 }
 0xa92   :  { %vm4404_vm8 = vcmp.gt.f32.partialorder %v6848_v15, 0.0  ;;  %v4408_v25 = vmul.f32 0.2, %v6848_v15  ;;  %vm4406_vm9 = vcmp.gt.f32.partialorder %v6850_v16, 0.0  ;;  %v4410_v26 = vmul.f32 0.2, %v6850_v16 }
 0xa93   :  { %v4411_v27 = vsel %vm4403_vm6, %v6847_v10, %v4407_v22  ;;  %v4413_v28 = vsel %vm4405_vm7, %v6849_v11, %v4409_v18  ;;  %v4319_v29 = vpop.f32.mrb[23].mxu0  ;;  %v4401_v31 = vpop.f32.mrb[39].mxu1  ;;  %v7684_v7 = vld [vmem:[#allocation10 + $0x30c] ss:$16 sps:$4 sm:$0xff]   ;;  %v7679_v8 = vld [vmem:[#allocation10 + $0x108] ss:$16 sps:$4 sm:$0xff]  }
 0xa94   :  { %v4412_v32 = vsel %vm4404_vm8, %v6848_v15, %v4408_v25  ;;  %v4414_v30 = vsel %vm4406_vm9, %v6850_v16, %v4410_v26  ;;  %v8594_v37 = vpack.c.bf16 %v4411_v27, %v4411_v27  ;;  %v8596_v38 = vpack.c.bf16 %v4413_v28, %v4413_v28  ;;  %v7682_v9 = vld [vmem:[#allocation10 + $0x308] ss:$16 sps:$4 sm:$0xff]   ;;  %v7687_v10 = vld [vmem:[#allocation10 + $0x12c] ss:$16 sps:$4 sm:$0xff]  }
 0xa95   :  { %v4416_v33 = vpack.c.bf16 %v4412_v32, %v4412_v32  ;;  %v4418_v34 = vpack.c.bf16 %v4414_v30, %v4414_v30  ;;  %v7690_v11 = vld [vmem:[#allocation10 + $0x32c] ss:$16 sps:$4 sm:$0xff]   ;;  %v7685_v13 = vld [vmem:[#allocation10 + $0x128] ss:$16 sps:$4 sm:$0xff]  }
 0xa96   :  { %v7688_v14 = vld [vmem:[#allocation10 + $0x328] ss:$16 sps:$4 sm:$0xff]   ;;  %v7693_v15 = vld [vmem:[#allocation10 + $0x14c] ss:$16 sps:$4 sm:$0xff]  }
 0xa97   :  { %5241 = vmatprep.mubr.bf16.mxu0 %v4416_v33  ;;  %5282 = vmatprep.mubr.bf16.mxu1 %v4418_v34  ;;  %v7696_v16 = vld [vmem:[#allocation10 + $0x34c] ss:$16 sps:$4 sm:$0xff]   ;;  %v7691_v12 = vld [vmem:[#allocation10 + $0x148] ss:$16 sps:$4 sm:$0xff]  }
 0xa98   :  { %5242 = vmatmul.mubr.bf16.vlgmr.msra.gmra.mrb[24].mxu0 %v8594_v37  ;;  %5283 = vmatmul.mubr.bf16.vlgmr.msra.gmra.mrb[40].mxu1 %v8596_v38  ;;  %v7694_v17 = vld [vmem:[#allocation10 + $0x348] ss:$16 sps:$4 sm:$0xff]   ;;  %v7699_v22 = vld [vmem:[#allocation10 + $0x16c] ss:$16 sps:$4 sm:$0xff]  }
 0xa99   :  { %5292 = vmatpush1.bf16.msra.mxu0 %v7631_v35  ;;  %5333 = vmatpush1.bf16.msra.mxu1 %v7634_v36  ;;  %v7702_v18 = vld [vmem:[#allocation10 + $0x36c] ss:$16 sps:$4 sm:$0xff]   ;;  %v7697_v25 = vld [vmem:[#allocation10 + $0x168] ss:$16 sps:$4 sm:$0xff]  }
 0xa9a   :  { %5323 = vmatprep.mubr.bf16.mxu0 %v4416_v33  ;;  %5364 = vmatprep.mubr.bf16.mxu1 %v4418_v34  ;;  %v7700_v26 = vld [vmem:[#allocation10 + $0x368] ss:$16 sps:$4 sm:$0xff]   ;;  %v7705_v27 = vld [vmem:[#allocation10 + $0x18c] ss:$16 sps:$4 sm:$0xff]  }
 0xa9b   :  { %5293 = vmatprep.subr.bf16.mxu0 %v7639_v39  ;;  %5334 = vmatprep.subr.bf16.mxu1 %v7642_v40  ;;  %v7708_v28 = vld [vmem:[#allocation10 + $0x38c] ss:$16 sps:$4 sm:$0xff]   ;;  %v7703_v29 = vld [vmem:[#allocation10 + $0x188] ss:$16 sps:$4 sm:$0xff]  }
 0xa9c   :  { %v7706_v31 = vld [vmem:[#allocation10 + $0x388] ss:$16 sps:$4 sm:$0xff]   ;;  %v7711_v32 = vld [vmem:[#allocation10 + $0x1ac] ss:$16 sps:$4 sm:$0xff]  }
 0xa9d   :  { %5294 = vmatpush1.bf16.msra.mxu0 %v7637_v3  ;;  %5335 = vmatpush1.bf16.msra.mxu1 %v7640_v41  ;;  %v7714_v30 = vld [vmem:[#allocation10 + $0x3ac] ss:$16 sps:$4 sm:$0xff]   ;;  %v7709_v33 = vld [vmem:[#allocation10 + $0x1a8] ss:$16 sps:$4 sm:$0xff]  }
 0xa9e   :  { %5295 = vmatprep.subr.bf16.mxu0 %v7645_v42  ;;  %5336 = vmatprep.subr.bf16.mxu1 %v7648_v45  ;;  %v7712_v34 = vld [vmem:[#allocation10 + $0x3a8] ss:$16 sps:$4 sm:$0xff]   ;;  %v7717_v35 = vld [vmem:[#allocation10 + $0x1cc] ss:$16 sps:$4 sm:$0xff]  }
 0xa9f   :  { %v7720_v36 = vld [vmem:[#allocation10 + $0x3cc] ss:$16 sps:$4 sm:$0xff]   ;;  %v7715_v39 = vld [vmem:[#allocation10 + $0x1c8] ss:$16 sps:$4 sm:$0xff]  }
 0xaa0   :  { %v7718_v40 = vld [vmem:[#allocation10 + $0x3c8] ss:$16 sps:$4 sm:$0xff]   ;;  %v7723_v3 = vld [vmem:[#allocation10 + $0x1ec] ss:$16 sps:$4 sm:$0xff]  }
 0xaa1   :  { %5296 = vmatpush1.bf16.msra.mxu0 %v7643_v46  ;;  %5337 = vmatpush1.bf16.msra.mxu1 %v7646_v47  ;;  %v7726_v41 = vld [vmem:[#allocation10 + $0x3ec] ss:$16 sps:$4 sm:$0xff]   ;;  %v7721_v42 = vld [vmem:[#allocation10 + $0x1e8] ss:$16 sps:$4 sm:$0xff]  }
 0xaa2   :  { %5297 = vmatprep.subr.bf16.mxu0 %v7651_v50  ;;  %5338 = vmatprep.subr.bf16.mxu1 %v7654_v19  ;;  %v7724_v45 = vld [vmem:[#allocation10 + $0x3e8] ss:$16 sps:$4 sm:$0xff]   ;;  %v7729_v46 = vld [vmem:[#allocation11 + $0x4] ss:$8 sps:$4 sm:$0xff]   ;;  %v7732_v50 = vld [vmem:[#allocation11 + $0x14] ss:$8 sps:$4 sm:$0xff]  }
 0xaa3   :  { %v7727_v47 = vld [vmem:[#allocation11] ss:$8 sps:$4 sm:$0xff]   ;;  %v7730_v19 = vld [vmem:[#allocation11 + $0x10] ss:$8 sps:$4 sm:$0xff]  }
 0xaa5   :  { %5298 = vmatpush1.bf16.msra.mxu0 %v7649_v51  ;;  %5339 = vmatpush1.bf16.msra.mxu1 %v7652_v0  ;;  %v7735_v51 = vld [vmem:[#allocation11 + $0x24] ss:$8 sps:$4 sm:$0xff]   ;;  %v7733_v0 = vld [vmem:[#allocation11 + $0x20] ss:$8 sps:$4 sm:$0xff]  }
 0xaa6   :  { %5299 = vmatprep.subr.bf16.mxu0 %v7657_v52  ;;  %5340 = vmatprep.subr.bf16.mxu1 %v7660_v53  ;;  %v7738_v52 = vld [vmem:[#allocation11 + $0x34] ss:$8 sps:$4 sm:$0xff]   ;;  %v7736_v53 = vld [vmem:[#allocation11 + $0x30] ss:$8 sps:$4 sm:$0xff]  }
 0xaa9   :  { %5300 = vmatpush1.bf16.msra.mxu0 %v7655_v54  ;;  %5341 = vmatpush1.bf16.msra.mxu1 %v7658_v20  ;;  %v7741_v54 = vld [vmem:[#allocation11 + $0x44] ss:$8 sps:$4 sm:$0xff]   ;;  %v7739_v20 = vld [vmem:[#allocation11 + $0x40] ss:$8 sps:$4 sm:$0xff]  }
 0xaaa   :  { %5301 = vmatprep.subr.bf16.mxu0 %v7663_v21  ;;  %5342 = vmatprep.subr.bf16.mxu1 %v7666_v57  ;;  %v7744_v21 = vld [vmem:[#allocation11 + $0x54] ss:$8 sps:$4 sm:$0xff]   ;;  %v7745_v57 = vld [vmem:[#allocation11 + $0x60] ss:$8 sps:$4 sm:$0xff]  }
 0xaad   :  { %5302 = vmatpush1.bf16.msra.mxu0 %v7661_v58  ;;  %5343 = vmatpush1.bf16.msra.mxu1 %v7664_v59  ;;  %v7750_v58 = vld [vmem:[#allocation11 + $0x74] ss:$8 sps:$4 sm:$0xff]   ;;  %v7748_v59 = vld [vmem:[#allocation11 + $0x70] ss:$8 sps:$4 sm:$0xff]  }
 0xaae   :  { %5303 = vmatprep.subr.bf16.mxu0 %v7669_v60  ;;  %5344 = vmatprep.subr.bf16.mxu1 %v7672_v61  ;;  %v7753_v60 = vld [vmem:[#allocation11 + $0x84] ss:$8 sps:$4 sm:$0xff]   ;;  %v7751_v61 = vld [vmem:[#allocation11 + $0x80] ss:$8 sps:$4 sm:$0xff]  }
 0xab1   :  { %5304 = vmatpush1.bf16.msra.mxu0 %v7667_v62  ;;  %5345 = vmatpush1.bf16.msra.mxu1 %v7670_v63  ;;  %v7756_v62 = vld [vmem:[#allocation11 + $0x94] ss:$8 sps:$4 sm:$0xff]   ;;  %v7754_v63 = vld [vmem:[#allocation11 + $0x90] ss:$8 sps:$4 sm:$0xff]  }
 0xab2   :  { %5305 = vmatprep.subr.bf16.mxu0 %v7675_v5  ;;  %5346 = vmatprep.subr.bf16.mxu1 %v7678_v4  ;;  %v7759_v5 = vld [vmem:[#allocation11 + $0xa4] ss:$8 sps:$4 sm:$0xff]   ;;  %v7757_v4 = vld [vmem:[#allocation11 + $0xa0] ss:$8 sps:$4 sm:$0xff]  }
 0xab5   :  { %5306 = vmatpush1.bf16.msra.mxu0 %v7673_v6  ;;  %5347 = vmatpush1.bf16.msra.mxu1 %v7676_v48  ;;  %v7762_v6 = vld [vmem:[#allocation11 + $0xb4] ss:$8 sps:$4 sm:$0xff]   ;;  %v7760_v48 = vld [vmem:[#allocation11 + $0xb0] ss:$8 sps:$4 sm:$0xff]  }
 0xab6   :  { %5307 = vmatprep.subr.bf16.mxu0 %v7681_v49  ;;  %5348 = vmatprep.subr.bf16.mxu1 %v7684_v7  ;;  %v7765_v49 = vld [vmem:[#allocation11 + $0xc4] ss:$8 sps:$4 sm:$0xff]   ;;  %v7763_v7 = vld [vmem:[#allocation11 + $0xc0] ss:$8 sps:$4 sm:$0xff]  }
 0xab9   :  { %5308 = vmatpush1.bf16.msra.mxu0 %v7679_v8  ;;  %5349 = vmatpush1.bf16.msra.mxu1 %v7682_v9  ;;  %v7768_v8 = vld [vmem:[#allocation11 + $0xd4] ss:$8 sps:$4 sm:$0xff]   ;;  %v7766_v9 = vld [vmem:[#allocation11 + $0xd0] ss:$8 sps:$4 sm:$0xff]  }
 0xaba   :  { %5309 = vmatprep.subr.bf16.mxu0 %v7687_v10  ;;  %5350 = vmatprep.subr.bf16.mxu1 %v7690_v11  ;;  %v7771_v10 = vld [vmem:[#allocation11 + $0xe4] ss:$8 sps:$4 sm:$0xff]   ;;  %v7769_v11 = vld [vmem:[#allocation11 + $0xe0] ss:$8 sps:$4 sm:$0xff]  }
 0xabd   :  { %5310 = vmatpush1.bf16.msra.mxu0 %v7685_v13  ;;  %5351 = vmatpush1.bf16.msra.mxu1 %v7688_v14  ;;  %v7774_v13 = vld [vmem:[#allocation11 + $0xf4] ss:$8 sps:$4 sm:$0xff]   ;;  %v7772_v14 = vld [vmem:[#allocation11 + $0xf0] ss:$8 sps:$4 sm:$0xff]  }
 0xabe   :  { %5311 = vmatprep.subr.bf16.mxu0 %v7693_v15  ;;  %5352 = vmatprep.subr.bf16.mxu1 %v7696_v16  ;;  %v7777_v15 = vld [vmem:[#allocation11 + $0x104] ss:$8 sps:$4 sm:$0xff]   ;;  %v7823_v16 = vld [vmem:[%s8713_s26 + $0x40] sm:$0xff]  }
 0xac1   :  { %5312 = vmatpush1.bf16.msra.mxu0 %v7691_v12  ;;  %5353 = vmatpush1.bf16.msra.mxu1 %v7694_v17  ;;  %v7824_v12 = vld [vmem:[%s8713_s26] sm:$0xff]   ;;  %v7825_v17 = vld [vmem:[%s8713_s26 + $0x48] sm:$0xff]  }
 0xac2   :  { %5313 = vmatprep.subr.bf16.mxu0 %v7699_v22  ;;  %5354 = vmatprep.subr.bf16.mxu1 %v7702_v18  ;;  %v7826_v22 = vld [vmem:[%s8713_s26 + $0x8] sm:$0xff]   ;;  %v7827_v18 = vld [vmem:[%s8713_s26 + $0x50] sm:$0xff]  }
 0xac5   :  { %5314 = vmatpush1.bf16.msra.mxu0 %v7697_v25  ;;  %5355 = vmatpush1.bf16.msra.mxu1 %v7700_v26  ;;  %v7828_v25 = vld [vmem:[%s8713_s26 + $0x10] sm:$0xff]   ;;  %v7829_v26 = vld [vmem:[%s8713_s26 + $0x58] sm:$0xff]  }
 0xac6   :  { %5315 = vmatprep.subr.bf16.mxu0 %v7705_v27  ;;  %5356 = vmatprep.subr.bf16.mxu1 %v7708_v28  ;;  %v7830_v27 = vld [vmem:[%s8713_s26 + $0x18] sm:$0xff]   ;;  %v7831_v28 = vld [vmem:[%s8713_s26 + $0x60] sm:$0xff]  }
 0xac9   :  { %5316 = vmatpush1.bf16.msra.mxu0 %v7703_v29  ;;  %5357 = vmatpush1.bf16.msra.mxu1 %v7706_v31  ;;  %v7832_v29 = vld [vmem:[%s8713_s26 + $0x20] sm:$0xff]   ;;  %v7833_v31 = vld [vmem:[%s8713_s26 + $0x68] sm:$0xff]  }
 0xaca   :  { %5317 = vmatprep.subr.bf16.mxu0 %v7711_v32  ;;  %5358 = vmatprep.subr.bf16.mxu1 %v7714_v30  ;;  %v7834_v32 = vld [vmem:[%s8713_s26 + $0x28] sm:$0xff]   ;;  %v8641_v30 = vld [vmem:[%s8710_s23] sm:$0xf] }
 0xacd   :  { %5318 = vmatpush1.bf16.msra.mxu0 %v7709_v33  ;;  %5359 = vmatpush1.bf16.msra.mxu1 %v7712_v34  ;;  %v4552_v33 = vrot.slane %v8641_v30, %v8326_v1  ;;  %v4556_v34 = vrot.slane %v8641_v30, %v8329_v2 }
 0xace   :  { %5319 = vmatprep.subr.bf16.mxu0 %v7717_v35  ;;  %5360 = vmatprep.subr.bf16.mxu1 %v7720_v36 }
 0xad1   :  { %5320 = vmatpush1.bf16.msra.mxu0 %v7715_v39  ;;  %5361 = vmatpush1.bf16.msra.mxu1 %v7718_v40 }
 0xad2   :  { %5321 = vmatprep.subr.bf16.mxu0 %v7723_v3  ;;  %5362 = vmatprep.subr.bf16.mxu1 %v7726_v41 }
 0xad5   :  { %5322 = vmatpush1.bf16.msra.mxu0 %v7721_v42  ;;  %5363 = vmatpush1.bf16.msra.mxu1 %v7724_v45 }
 0xad6   :  { %5789 = vmatprep.subr.bf16.mxu0 %v7729_v46  ;;  %6768 = vmatprep.subr.bf16.mxu1 %v7823_v16  ;;  %v7813_v16 = vld [vmem:[#allocation11 + $0x1c4] ss:$8 sps:$4 sm:$0xff]  }
 0xad8   :  { %5324 = vmatmul.mubr.bf16.vlgmr.msra.gmra.mrb[28].mxu0 %v8594_v37  ;;  %5365 = vmatmul.mubr.bf16.vlgmr.msra.gmra.mrb[44].mxu1 %v8596_v38  ;;  %v7742_v37 = vld [vmem:[#allocation11 + $0x50] ss:$8 sps:$4 sm:$0xff]   ;;  %v7747_v38 = vld [vmem:[#allocation11 + $0x64] ss:$8 sps:$4 sm:$0xff]  }
 0xad9   :  { %5790 = vmatpush1.bf16.msra.mxu0 %v7727_v47  ;;  %6769 = vmatpush3.bf16.msra.mxu1 %v7824_v12  ;;  %v7811_v12 = vld [vmem:[#allocation11 + $0x1c0] ss:$8 sps:$4 sm:$0xff]  }
 0xada   :  { %5791 = vmatprep.subr.bf16.mxu0 %v7732_v50  ;;  %6770 = vmatprep.subr.bf16.mxu1 %v7825_v17  ;;  %v7816_v17 = vld [vmem:[#allocation11 + $0x1d4] ss:$8 sps:$4 sm:$0xff]  }
 0xadd   :  { %5792 = vmatpush1.bf16.msra.mxu0 %v7730_v19  ;;  %6771 = vmatpush3.bf16.msra.mxu1 %v7826_v22  ;;  %v4560_v22 = vrot.slane %v8641_v30, %v8513_v43  ;;  %v7817_v43 = vld [vmem:[#allocation11 + $0x1e0] ss:$8 sps:$4 sm:$0xff]  }
 0xade   :  { %5793 = vmatprep.subr.bf16.mxu0 %v7735_v51  ;;  %6772 = vmatprep.subr.bf16.mxu1 %v7827_v18  ;;  %v4564_v18 = vrot.slane %v8641_v30, %v8516_v44  ;;  %v7822_v44 = vld [vmem:[#allocation11 + $0x1f4] ss:$8 sps:$4 sm:$0xff]  }
 0xae1   :  { %5794 = vmatpush1.bf16.msra.mxu0 %v7733_v0  ;;  %6773 = vmatpush3.bf16.msra.mxu1 %v7828_v25  ;;  %v7814_v25 = vld [vmem:[#allocation11 + $0x1d0] ss:$8 sps:$4 sm:$0xff]  }
 0xae2   :  { %5795 = vmatprep.subr.bf16.mxu0 %v7738_v52  ;;  %6774 = vmatprep.subr.bf16.mxu1 %v7829_v26 }
 0xae5   :  { %5796 = vmatpush1.bf16.msra.mxu0 %v7736_v53  ;;  %6775 = vmatpush3.bf16.msra.mxu1 %v7830_v27 }
 0xae6   :  { %5797 = vmatprep.subr.bf16.mxu0 %v7741_v54  ;;  %6776 = vmatprep.subr.bf16.mxu1 %v7831_v28  ;;  %v7819_v28 = vld [vmem:[#allocation11 + $0x1e4] ss:$8 sps:$4 sm:$0xff]  }
 0xae9   :  { %5798 = vmatpush1.bf16.msra.mxu0 %v7739_v20  ;;  %6777 = vmatpush3.bf16.msra.mxu1 %v7832_v29 }
 0xaea   :  { %5799 = vmatprep.subr.bf16.mxu0 %v7744_v21  ;;  %6778 = vmatprep.subr.bf16.mxu1 %v7833_v31 }
 0xaed   :  { %5800 = vmatpush1.bf16.msra.mxu0 %v7742_v37  ;;  %6779 = vmatpush3.bf16.msra.mxu1 %v7834_v32  ;;  %v7775_v37 = vld [vmem:[#allocation11 + $0x100] ss:$8 sps:$4 sm:$0xff]  }
 0xaee   :  { %5801 = vmatprep.subr.bf16.mxu0 %v7747_v38 }
 0xaf1   :  { %5802 = vmatpush1.bf16.msra.mxu0 %v7745_v57  ;;  %v7780_v57 = vld [vmem:[#allocation11 + $0x114] ss:$8 sps:$4 sm:$0xff]  }
 0xaf2   :  { %5803 = vmatprep.subr.bf16.mxu0 %v7750_v58  ;;  %v7778_v58 = vld [vmem:[#allocation11 + $0x110] ss:$8 sps:$4 sm:$0xff]  }
 0xaf5   :  { %5804 = vmatpush1.bf16.msra.mxu0 %v7748_v59  ;;  %v7783_v59 = vld [vmem:[#allocation11 + $0x124] ss:$8 sps:$4 sm:$0xff]  }
 0xaf6   :  { %5805 = vmatprep.subr.bf16.mxu0 %v7753_v60  ;;  %v7784_v60 = vld [vmem:[#allocation11 + $0x130] ss:$8 sps:$4 sm:$0xff]  }
 0xaf9   :  { %5806 = vmatpush1.bf16.msra.mxu0 %v7751_v61  ;;  %v7789_v61 = vld [vmem:[#allocation11 + $0x144] ss:$8 sps:$4 sm:$0xff]  }
 0xafa   :  { %5807 = vmatprep.subr.bf16.mxu0 %v7756_v62  ;;  %v7787_v62 = vld [vmem:[#allocation11 + $0x140] ss:$8 sps:$4 sm:$0xff]  }
 0xafd   :  { %5808 = vmatpush1.bf16.msra.mxu0 %v7754_v63  ;;  %v7792_v63 = vld [vmem:[#allocation11 + $0x154] ss:$8 sps:$4 sm:$0xff]  }
 0xafe   :  { %5809 = vmatprep.subr.bf16.mxu0 %v7759_v5  ;;  %v7790_v5 = vld [vmem:[#allocation11 + $0x150] ss:$8 sps:$4 sm:$0xff]  }
 0xb01   :  { %5810 = vmatpush1.bf16.msra.mxu0 %v7757_v4  ;;  %v7795_v4 = vld [vmem:[#allocation11 + $0x164] ss:$8 sps:$4 sm:$0xff]  }
 0xb02   :  { %5811 = vmatprep.subr.bf16.mxu0 %v7762_v6  ;;  %v7793_v6 = vld [vmem:[#allocation11 + $0x160] ss:$8 sps:$4 sm:$0xff]  }
 0xb05   :  { %5812 = vmatpush1.bf16.msra.mxu0 %v7760_v48  ;;  %v7798_v48 = vld [vmem:[#allocation11 + $0x174] ss:$8 sps:$4 sm:$0xff]  }
 0xb06   :  { %5813 = vmatprep.subr.bf16.mxu0 %v7765_v49  ;;  %v7796_v49 = vld [vmem:[#allocation11 + $0x170] ss:$8 sps:$4 sm:$0xff]  }
 0xb09   :  { %5814 = vmatpush1.bf16.msra.mxu0 %v7763_v7  ;;  %v7801_v7 = vld [vmem:[#allocation11 + $0x184] ss:$8 sps:$4 sm:$0xff]  }
 0xb0a   :  { %5815 = vmatprep.subr.bf16.mxu0 %v7768_v8  ;;  %v7799_v8 = vld [vmem:[#allocation11 + $0x180] ss:$8 sps:$4 sm:$0xff]  }
 0xb0d   :  { %5816 = vmatpush1.bf16.msra.mxu0 %v7766_v9  ;;  %v7804_v9 = vld [vmem:[#allocation11 + $0x194] ss:$8 sps:$4 sm:$0xff]  }
 0xb0e   :  { %5817 = vmatprep.subr.bf16.mxu0 %v7771_v10  ;;  %v7802_v10 = vld [vmem:[#allocation11 + $0x190] ss:$8 sps:$4 sm:$0xff]  }
 0xb11   :  { %5818 = vmatpush1.bf16.msra.mxu0 %v7769_v11  ;;  %v7807_v11 = vld [vmem:[#allocation11 + $0x1a4] ss:$8 sps:$4 sm:$0xff]  }
 0xb12   :  { %5819 = vmatprep.subr.bf16.mxu0 %v7774_v13  ;;  %v7805_v13 = vld [vmem:[#allocation11 + $0x1a0] ss:$8 sps:$4 sm:$0xff]  }
 0xb15   :  { %5820 = vmatpush1.bf16.msra.mxu0 %v7772_v14  ;;  %v7810_v14 = vld [vmem:[#allocation11 + $0x1b4] ss:$8 sps:$4 sm:$0xff]  }
 0xb16   :  { %5830 = vmatprep.subr.bf16.mxu0 %v7777_v15  ;;  %v7808_v15 = vld [vmem:[#allocation11 + $0x1b0] ss:$8 sps:$4 sm:$0xff]  }
 0xb6b   :  { %v5243_v35 = vpop.f32.mrb[24].mxu0  ;;  %v5284_v36 = vpop.f32.mrb[40].mxu1 }
 0xb6c   :  { %v5244_v39 = vadd.f32 %v5243_v35, %v4552_v33  ;;  %v5245_v40 = vpop.f32.mrb[25].mxu0  ;;  %v5286_v3 = vpop.f32.mrb[41].mxu1 }
 0xb6d   :  { %v5246_v41 = vadd.f32 %v5245_v40, %v4556_v34  ;;  %v5247_v42 = vpop.f32.mrb[26].mxu0  ;;  %v5288_v45 = vpop.f32.mrb[42].mxu1 }
 0xb6e   :  { %v5285_v46 = vadd.f32 %v5284_v36, %v5244_v39  ;;  %v5248_v47 = vpop.f32.mrb[27].mxu0  ;;  %v5289_v50 = vpop.f32.mrb[43].mxu1  ;;  %v7820_v45 = vld [vmem:[#allocation11 + $0x1f0] ss:$8 sps:$4 sm:$0xff]  }
 0xb6f   :  { %v5287_v19 = vadd.f32 %v5286_v3, %v5246_v41 }
 0xb70   :  { %v5373_v51 = vadd.f32 %v5285_v46, %v8565_v23  ;;  %v7781_v23 = vld [vmem:[#allocation11 + $0x120] ss:$8 sps:$4 sm:$0xff]  }
 0xb71   :  { %v5374_v0 = vadd.f32 %v5287_v19, %v8567_v24  ;;  %v7786_v24 = vld [vmem:[#allocation11 + $0x134] ss:$8 sps:$4 sm:$0xff]  }
 0xb72   :  { %vm5377_vm10 = vcmp.gt.f32.partialorder %v5373_v51, 0.0  ;;  %v5381_v52 = vmul.f32 0.2, %v5373_v51 }
 0xb73   :  { %v5382_v53 = vmul.f32 0.2, %v5374_v0  ;;  %vm5378_vm11 = vcmp.gt.f32.partialorder %v5374_v0, 0.0 }
 0xb74   :  { %v5385_v54 = vsel %vm5377_vm10, %v5373_v51, %v5381_v52  ;;  %v7838_v52 = vld [vmem:[%s8713_s26 + $0x38] sm:$0xff]  }
 0xb75   :  { %v5386_v20 = vsel %vm5378_vm11, %v5374_v0, %v5382_v53  ;;  %v5389_v38 = vpack.c.bf16 %v5385_v54, %v5385_v54  ;;  %v7837_v0 = vld [vmem:[%s8713_s26 + $0x78] sm:$0xff]   ;;  %v5457_v53 = vld [vmem:[%s8712_s25] sm:$0x3] }
 0xb76   :  { %v5390_v21 = vpack.c.bf16 %v5386_v20, %v5386_v20  ;;  %v5462_v54 = vrot.slane %v5457_v53, %v8326_v1  ;;  %v5466_v20 = vrot.slane %v5457_v53, %v8329_v2  ;;  %v6727_v1 = vld [vmem:[%s8714_s27] ss:$0 sm:$0xff] }
 0xb78   :  { %5821 = vmatprep.mubr.bf16.mxu0 %v5390_v21 }
 0xb79   :  { %5822 = vmatmul.mubr.bf16.vlgmr.msra.gmra.mrb[32].mxu0 %v5389_v38 }
 0xb7a   :  { %5831 = vmatpush1.bf16.msra.mxu0 %v7775_v37 }
 0xb7b   :  { %5832 = vmatprep.subr.bf16.mxu0 %v7780_v57 }
 0xb7e   :  { %5833 = vmatpush1.bf16.msra.mxu0 %v7778_v58 }
 0xb7f   :  { %5834 = vmatprep.subr.bf16.mxu0 %v7783_v59 }
 0xb82   :  { %5835 = vmatpush1.bf16.msra.mxu0 %v7781_v23 }
 0xb83   :  { %5836 = vmatprep.subr.bf16.mxu0 %v7786_v24 }
 0xb86   :  { %5837 = vmatpush1.bf16.msra.mxu0 %v7784_v60 }
 0xb87   :  { %5838 = vmatprep.subr.bf16.mxu0 %v7789_v61 }
 0xb8a   :  { %5839 = vmatpush1.bf16.msra.mxu0 %v7787_v62 }
 0xb8b   :  { %5840 = vmatprep.subr.bf16.mxu0 %v7792_v63 }
 0xb8e   :  { %5841 = vmatpush1.bf16.msra.mxu0 %v7790_v5 }
 0xb8f   :  { %5842 = vmatprep.subr.bf16.mxu0 %v7795_v4 }
 0xb92   :  { %5843 = vmatpush1.bf16.msra.mxu0 %v7793_v6 }
 0xb93   :  { %5844 = vmatprep.subr.bf16.mxu0 %v7798_v48 }
 0xb96   :  { %5845 = vmatpush1.bf16.msra.mxu0 %v7796_v49 }
 0xb97   :  { %5846 = vmatprep.subr.bf16.mxu0 %v7801_v7 }
 0xb9a   :  { %5847 = vmatpush1.bf16.msra.mxu0 %v7799_v8 }
 0xb9b   :  { %5848 = vmatprep.subr.bf16.mxu0 %v7804_v9 }
 0xb9e   :  { %5849 = vmatpush1.bf16.msra.mxu0 %v7802_v10 }
 0xb9f   :  { %5850 = vmatprep.subr.bf16.mxu0 %v7807_v11 }
 0xba2   :  { %5851 = vmatpush1.bf16.msra.mxu0 %v7805_v13 }
 0xba3   :  { %5852 = vmatprep.subr.bf16.mxu0 %v7810_v14 }
 0xba6   :  { %5853 = vmatpush1.bf16.msra.mxu0 %v7808_v15 }
 0xba7   :  { %5854 = vmatprep.subr.bf16.mxu0 %v7813_v16 }
 0xbaa   :  { %5855 = vmatpush1.bf16.msra.mxu0 %v7811_v12 }
 0xbab   :  { %v5325_v26 = vpop.f32.mrb[28].mxu0  ;;  %v5366_v27 = vpop.f32.mrb[44].mxu1  ;;  %5856 = vmatprep.subr.bf16.mxu0 %v7816_v17 }
 0xbac   :  { %v5326_v29 = vadd.f32 %v5325_v26, %v4560_v22  ;;  %v5327_v31 = vpop.f32.mrb[29].mxu0  ;;  %v5368_v32 = vpop.f32.mrb[45].mxu1 }
 0xbad   :  { %v5328_v33 = vadd.f32 %v5327_v31, %v4564_v18  ;;  %v5329_v34 = vpop.f32.mrb[30].mxu0  ;;  %v5370_v35 = vpop.f32.mrb[46].mxu1 }
 0xbae   :  { %v5367_v36 = vadd.f32 %v5366_v27, %v5326_v29  ;;  %v5330_v39 = vpop.f32.mrb[31].mxu0  ;;  %v5371_v40 = vpop.f32.mrb[47].mxu1  ;;  %5857 = vmatpush1.bf16.msra.mxu0 %v7814_v25 }
 0xbaf   :  { %v5369_v3 = vadd.f32 %v5368_v32, %v5328_v33  ;;  %5858 = vmatprep.subr.bf16.mxu0 %v7819_v28 }
 0xbb0   :  { %v5375_v30 = vadd.f32 %v5367_v36, %v8579_v55  ;;  %v7835_v55 = vld [vmem:[%s8713_s26 + $0x70] sm:$0xff]  }
 0xbb1   :  { %v5376_v41 = vadd.f32 %v5369_v3, %v8581_v56  ;;  %v7836_v56 = vld [vmem:[%s8713_s26 + $0x30] sm:$0xff]   ;;  %6780 = vmatprep.subr.bf16.mxu1 %v7835_v55 }
 0xbb2   :  { %vm5379_vm12 = vcmp.gt.f32.partialorder %v5375_v30, 0.0  ;;  %v5383_v42 = vmul.f32 0.2, %v5375_v30  ;;  %5859 = vmatpush1.bf16.msra.mxu0 %v7817_v43  ;;  %6781 = vmatpush3.bf16.msra.mxu1 %v7836_v56 }
 0xbb3   :  { %v5384_v46 = vmul.f32 0.2, %v5376_v41  ;;  %5860 = vmatprep.subr.bf16.mxu0 %v7822_v44  ;;  %vm5380_vm13 = vcmp.gt.f32.partialorder %v5376_v41, 0.0  ;;  %6782 = vmatprep.subr.bf16.mxu1 %v7837_v0 }
 0xbb4   :  { %v5387_v47 = vsel %vm5379_vm12, %v5375_v30, %v5383_v42 }
 0xbb5   :  { %v5388_v50 = vsel %vm5380_vm13, %v5376_v41, %v5384_v46  ;;  %v5391_v51 = vpack.c.bf16 %v5387_v47, %v5387_v47 }
 0xbb6   :  { %5861 = vmatpush1.bf16.msra.mxu0 %v7820_v45  ;;  %v5392_v19 = vpack.c.bf16 %v5388_v50, %v5388_v50  ;;  %6783 = vmatpush3.bf16.msra.mxu1 %v7838_v52 }
 0xbb8   :  { %5862 = vmatprep.mubr.bf16.mxu0 %v5392_v19 }
 0xbb9   :  { %5863 = vmatmul.mubr.bf16.vlgmr.msra.gmra.mrb[32].mxu0 %v5391_v51 }
 0xc8c   :  { %v5864_v21 = vpop.f32.mrb[32].mxu0 }
 0xc8d   :  { %v6851_v37 = vadd.f32 %v5864_v21, %v5462_v54  ;;  %v5866_v38 = vpop.f32.mrb[33].mxu0 }
 0xc8e   :  { %v6852_v57 = vadd.f32 %v5866_v38, %v5466_v20  ;;  %v5868_v58 = vpop.f32.mrb[34].mxu0 }
 0xc8f   :  { %vm5871_vm14 = vcmp.gt.f32.partialorder %v6851_v37, 0.0  ;;  %v5873_v59 = vmul.f32 0.2, %v6851_v37  ;;  %v5869_v23 = vpop.f32.mrb[35].mxu0 }
 0xc90   :  { %vm5872_vm15 = vcmp.gt.f32.partialorder %v6852_v57, 0.0  ;;  %v5874_v24 = vmul.f32 0.2, %v6852_v57 }
 0xc91   :  { %v5875_v60 = vsel %vm5871_vm14, %v6851_v37, %v5873_v59 }
 0xc92   :  { %v5876_v61 = vsel %vm5872_vm15, %v6852_v57, %v5874_v24  ;;  %v5877_v63 = vpack.c.bf16 %v5875_v60, %v5875_v60 }
 0xc93   :  { %v5878_v62 = vpack.c.bf16 %v5876_v61, %v5876_v61 }
 0xc95   :  { %6046 = vmatprep.mubr.bf16.mxu1 %v5878_v62 }
 0xc96   :  { %6047 = vmatmul.mubr.bf16.vlgmr.msra.gmra.mrb[48].mxu1 %v5877_v63 }
 0xd69   :  { %v6784_v5 = vpop.f32.mrb[48].mxu1 }
 0xd6a   :  { %v6785_v2 = vpop.f32.mrb[49].mxu1 }
 0xd6b   :  { %v6786_v4 = vadd.f32 %v6785_v2, %v6784_v5  ;;  %v6787_v6 = vpop.f32.mrb[50].mxu1 }
 0xd6c   :  { %v6788_v48 = vpop.f32.mrb[51].mxu1 }
 0xd6d   :  { %v6049_v49 = vadd.f32 %v6786_v4, %v6727_v1 }
 0xd6f   :  { %6055 = vst.msk [vmem:[#allocation13] sm:$0x3] %vm6054_vm0, %v6049_v49 }
 0xd70   :  { %7994 = shalt.err (!%p7991_p10)
}
 0xd71   :  { %s8748_s27 = sld [smem:[#allocation32_spill]] }
 0xd77   :  { %s7995_s10 = scalar_lea.hbm %s8748_s27, 32 }
 0xd78   :  { %p7996_p11 = scmp.ne.s32.totalorder %s8748_s27, %s7995_s10  ;;  %p7999_p12 = scmp.lt.u32.totalorder %s7995_s10, %s8748_s27 }
 0xd7a   :  { %p8001_p13 = pnand %p7999_p12, %p7996_p11 }
 0xd7c   :  { %8004 = shalt.err (!%p8001_p13)
}
 0xd7d   :  { %6065 = dma.vmem_to_hbm [thread:$0]  %s6063_s18, 32, %s8748_s27, [#allocation4]  }
 0xd7e   :  { %8013 = dma.done.wait [#allocation4], 32  }
 0xd7f   :  { %8014 = vsyncadd [#allocation4], 4294967264 }
 0xd80   :  { %6069 = vsyncpa [#allocation3], 1 }
 0xd81   :  { %6070 = vsyncpa [#allocation6], 1 }
 0xd82   :  { %6071 = vsyncpa [#allocation9], 1 }
 0xd83   :  { %6072 = vsyncpa [#allocation12], 1 }
 0xd84   :  { %6073 = vsyncpa [#allocation4], 1 }

</bundles_post_ra>
